<compile_context>
chip_gen: v5e
topology: v5e:2x2
jax: 0.10.0
libtpu: 0.0.40
codegen_flags: <defaults>
</compile_context>

<pallas_src>
import math

import jax
import jax.numpy as jnp
from jax.experimental import pallas as pl
from jax.experimental.pallas import tpu as pltpu

# ------------------------- configuration (small, shape-consistent) -------------------------
FEATURE_DIM = 16          # FeatureDim == LSTFEncoder enc_in == GCN in_feats   (orig 56400)
EXPERT_OUT  = 32          # ExpertOutDim == d_model == GCN out_feats (must match for concats)
D_MODEL     = 32          # orig 512
N_HEADS     = 4           # orig 8
D_HEAD      = D_MODEL // N_HEADS
D_FF        = 32          # orig 512
E_LAYERS    = 3
GCN_HID     = 24          # orig 200
TASK_EXPERT_NUM   = 1     # the reference forward's concats are only shape-consistent for 1
COMMON_EXPERT_NUM = 1
GATE_NUM    = 2           # unused in forward (as in the reference module)

BATCH   = 2
SEQ_LEN = 8
N_NODES = 6

_BN_SCALE = 1.0 / math.sqrt(1.0 + 1e-5)   # BatchNorm1d eval with fresh running stats
_NEG = -1e30

_VMEM = pl.BlockSpec(memory_space=pltpu.MemorySpace.VMEM)


def _pool_len(l):
    # MaxPool1d(kernel_size=3, stride=2, padding=1)
    return (l + 2 - 3) // 2 + 1


def _stage_lengths(l, n_stages):
    ls = [l]
    for _ in range(n_stages - 1):
        ls.append(_pool_len(ls[-1]))
    return ls


# ================================ the single fused kernel ==================================

def _extraction_kernel(
        x_ref, xb_ref, an_ref,
        mask0_ref, mask1_ref, mask2_ref,
        pe_ref, tok_w_ref,
        w_q_ref, b_q_ref, w_k_ref, b_k_ref, w_v_ref, b_v_ref,
        w_o_ref, b_o_ref,
        w_ff1_ref, b_ff1_ref, w_ff2_ref, b_ff2_ref,
        ln1_g_ref, ln1_b_ref, ln2_g_ref, ln2_b_ref,
        conv_w_ref, conv_b_ref,
        norm_g_ref, norm_b_ref,
        ew1_ref, eb1_ref, ew2_ref, eb2_ref,
        gw1_ref, gb1_ref, gw2_ref, gb2_ref,
        gate_w_ref, gate_b_ref,
        oa_ref, ob_ref):
    f32 = jnp.float32
    mask_refs = (mask0_ref, mask1_ref, mask2_ref)

    x3 = x_ref[...]                               # (B, L, F)
    bsz, seq, fdim = x3.shape

    # ------------------------------------ helpers ------------------------------------
    def layernorm(z, g, b):
        # one-pass stats: the two lane reduces (E[x], E[x^2]) are independent.
        mu = jnp.mean(z, axis=-1, keepdims=True)
        msq = jnp.mean(z * z, axis=-1, keepdims=True)
        var = msq - mu * mu
        return (z - mu) * jax.lax.rsqrt(var + 1e-5) * g + b

    def circ_conv(h3, w0, w1, w2, b):
        # channel-last circular Conv1d(kernel=3, padding=1): per-tap GEMMs on rolled
        # copies (sublane-only movement; no 3C-wide lane concat).
        bc, lc, cc = h3.shape
        hp = jnp.roll(h3, 1, axis=1)              # h[t-1]
        hn = jnp.roll(h3, -1, axis=1)             # h[t+1]
        y = (jnp.dot(hp.reshape(bc * lc, cc), w0, preferred_element_type=f32)
             + jnp.dot(h3.reshape(bc * lc, cc), w1, preferred_element_type=f32)
             + jnp.dot(hn.reshape(bc * lc, cc), w2, preferred_element_type=f32))
        if b is not None:
            y = y + b
        return y                                   # (bc*lc, C_out)

    def encoder_layer(x2, l, mask):
        # x2: (R, D) with R = B * L_stage ; mask: (R, R) block-diagonal batch mask.
        r = x2.shape[0]
        scale = 1.0 / math.sqrt(D_HEAD)
        att = jnp.zeros((r, D_MODEL), f32)
        # Per-head weights live on leading dims -> no lane slicing of activations and no
        # lane-axis concat of head outputs (out-proj accumulated per head).
        # TODO(synk): ProbAttention's random top-u query sparsification is replaced by
        # exact full softmax attention (the dense limit of ProbAttention).
        for h in range(N_HEADS):
            qh = (jnp.dot(x2, w_q_ref[l, h], preferred_element_type=f32)
                  + b_q_ref[l, h]) * scale
            kh = jnp.dot(x2, w_k_ref[l, h], preferred_element_type=f32) + b_k_ref[l, h]
            vh = jnp.dot(x2, w_v_ref[l, h], preferred_element_type=f32) + b_v_ref[l, h]
            s = jnp.einsum("nd,md->nm", qh, kh, preferred_element_type=f32) + mask
            m = jnp.max(s, axis=-1, keepdims=True)
            e = jnp.exp(s - m)
            p = e * pl.reciprocal(jnp.sum(e, axis=-1, keepdims=True), approx=True)
            ctx = jnp.dot(p, vh, preferred_element_type=f32)
            att = att + jnp.dot(ctx, w_o_ref[l, h], preferred_element_type=f32)
        att = att + b_o_ref[l]
        h1 = x2 + att                                            # dropout = 0.0
        hf = layernorm(h1, ln1_g_ref[l], ln1_b_ref[l])
        # FFN: Conv1d(k=1) == Linear
        # TODO(synk): PyTorch F.gelu uses the exact erf form; tanh approximation here.
        y = jnp.dot(hf, w_ff1_ref[l], preferred_element_type=f32) + b_ff1_ref[l]
        y = jax.nn.gelu(y, approximate=True)
        y = jnp.dot(y, w_ff2_ref[l], preferred_element_type=f32) + b_ff2_ref[l]
        return layernorm(hf + y, ln2_g_ref[l], ln2_b_ref[l])

    def distill(h3, l):
        # ConvLayer: circular Conv1d(k=3) + BatchNorm1d + ELU + MaxPool1d(3, stride 2, pad 1)
        bc, lc, dc = h3.shape
        y = circ_conv(h3, conv_w_ref[l, 0], conv_w_ref[l, 1], conv_w_ref[l, 2],
                      conv_b_ref[l])
        y = y * _BN_SCALE                                        # BN eval, default stats
        y = jnp.where(y > 0, y, jnp.exp(jnp.minimum(y, 0.0)) - 1.0)   # numerically safe ELU
        y = y.reshape(bc, lc, dc)
        neg = jnp.full((bc, 1, dc), _NEG, f32)
        yp = jnp.concatenate([neg, y, neg], axis=1)              # (-inf)-padded
        # vectorized 3-tap running max (two VPU maxes), then pick even-index windows
        full = jnp.maximum(jnp.maximum(yp[:, 0:lc], yp[:, 1:lc + 1]), yp[:, 2:lc + 2])
        l_out = _pool_len(lc)
        return jnp.concatenate([full[:, 2 * j:2 * j + 1] for j in range(l_out)], axis=1)

    # -------------------------- LSTFEncoder (task-A expert) ---------------------------
    # DataEmbedding = TokenEmbedding (circular conv1d, no bias) + PositionalEmbedding.
    # TODO(synk): temporal embedding omitted — the reference forward calls enc_embedding(x_enc) only.
    emb = circ_conv(x3, tok_w_ref[0], tok_w_ref[1], tok_w_ref[2], None)   # (B*L, D)
    h3 = emb.reshape(bsz, seq, D_MODEL) + pe_ref[...][None, :, :]
    lc = seq
    h2 = h3.reshape(bsz * lc, D_MODEL)
    for l in range(E_LAYERS - 1):
        h2 = encoder_layer(h2, l, mask_refs[l][...])
        h3 = distill(h2.reshape(bsz, lc, D_MODEL), l)
        lc = _pool_len(lc)
        h2 = h3.reshape(bsz * lc, D_MODEL)
    h2 = encoder_layer(h2, E_LAYERS - 1, mask_refs[E_LAYERS - 1][...])
    enc2 = layernorm(h2, norm_g_ref[...], norm_b_ref[...])       # (B*l_final, D)

    # -------------------- shared expert + GCN expert + gates + mixing ------------------
    xa2 = x3.reshape(bsz * seq, fdim)
    xb = xb_ref[...]                               # (N, F)
    xs = jnp.concatenate([xa2, xb], axis=0)        # (B*L + N, F)

    # shared Expert_net: Linear -> ReLU -> (Dropout=id) -> Linear -> ReLU -> (Dropout=id)
    hs = jnp.maximum(jnp.dot(xs, ew1_ref[...], preferred_element_type=f32) + eb1_ref[...], 0.0)
    shared = jnp.maximum(jnp.dot(hs, ew2_ref[...], preferred_element_type=f32) + eb2_ref[...], 0.0)

    # GCNEncoder: relu(A_norm @ (X @ W1) + b1) ; A_norm @ (H @ W2) + b2
    an = an_ref[...]                               # (N, N) sym-normalized adjacency w/ self loops
    gh = jnp.maximum(
        jnp.dot(an, jnp.dot(xb, gw1_ref[...], preferred_element_type=f32),
                preferred_element_type=f32) + gb1_ref[...], 0.0)
    gcn_out = jnp.dot(an, jnp.dot(gh, gw2_ref[...], preferred_element_type=f32),
                      preferred_element_type=f32) + gb2_ref[...]          # (N, D)

    # shared Task_Gate_Layer: Linear(F, 2) + Softmax(dim=1).  Width-2 softmax ==
    # sigmoid of the logit difference -> one 1-column GEMM + one sigmoid per row.
    gw = gate_w_ref[...]                           # (F, 2)
    gbias = gate_b_ref[...]                        # (1, 2)
    dlogit = (jnp.dot(xs, gw[:, 0:1] - gw[:, 1:2], preferred_element_type=f32)
              + (gbias[:, 0:1] - gbias[:, 1:2]))
    g0 = 1.0 / (1.0 + jnp.exp(-dlogit))            # gate weight of the task expert
    g1 = 1.0 - g0                                  # gate weight of the shared expert

    la = enc2.shape[0]                             # B * l_final   (TASK_EXPERT_NUM == 1)
    lb = bsz * seq
    # Row semantics follow the PyTorch reference exactly: the task-A mix uses the FIRST
    # `la` rows of the shared-expert output / gate (both computed on raw flattened x_A).
    oa_ref[...] = enc2 * g0[:la] + shared[:la] * g1[:la]
    ob_ref[...] = gcn_out * g0[lb:] + shared[lb:] * g1[lb:]


# =============================== Extraction_Network.forward ================================

def _block_diag_mask(b, l):
    ids = jnp.repeat(jnp.arange(b, dtype=jnp.int32), l)
    return jnp.where(ids[:, None] == ids[None, :], 0.0, _NEG).astype(jnp.float32)


@jax.jit
def extraction_network_forward(params, x_A, x_B_x, x_B_edge_index):
    bat, seq_len, _ = x_A.shape
    n_nodes = x_B_x.shape[0]

    x_A = x_A.astype(jnp.float32)
    x_B_x = x_B_x.astype(jnp.float32)

    # dense symmetric-normalized adjacency with self loops (tiny; built with XLA before the
    # fused kernel; constant-folds if edge_index is static across calls)
    src, dst = x_B_edge_index[0], x_B_edge_index[1]
    a = jnp.zeros((n_nodes, n_nodes), jnp.float32).at[dst, src].set(1.0)
    a = a + jnp.eye(n_nodes, dtype=jnp.float32)
    dinv = jax.lax.rsqrt(jnp.sum(a, axis=1))
    a_norm = dinv[:, None] * a * dinv[None, :]

    # per-stage block-diagonal batch masks for the in-kernel attention (shape-only
    # constants, folded by XLA); E_LAYERS == 3 stages.
    ls = _stage_lengths(seq_len, E_LAYERS)
    masks = tuple(_block_diag_mask(bat, l) for l in ls)
    l_final = ls[-1]
    la = bat * l_final

    seq = params["seq"]
    expp = params["expert"]
    gcnp = params["gcn"]
    args = (x_A, x_B_x, a_norm,
            masks[0], masks[1], masks[2],
            seq["pe"], seq["tok_w"],
            seq["w_q"], seq["b_q"], seq["w_k"], seq["b_k"], seq["w_v"], seq["b_v"],
            seq["w_o"], seq["b_o"],
            seq["w_ff1"], seq["b_ff1"], seq["w_ff2"], seq["b_ff2"],
            seq["ln1_g"], seq["ln1_b"], seq["ln2_g"], seq["ln2_b"],
            seq["conv_w"], seq["conv_b"],
            seq["norm_g"], seq["norm_b"],
            expp["w1"], expp["b1"], expp["w2"], expp["b2"],
            gcnp["w1"], gcnp["b1"], gcnp["w2"], gcnp["b2"],
            params["gate_w"], params["gate_b"])

    gate_a_out, gate_b_out = pl.pallas_call(
        _extraction_kernel,
        out_shape=(jax.ShapeDtypeStruct((la, D_MODEL), jnp.float32),
                   jax.ShapeDtypeStruct((n_nodes, D_MODEL), jnp.float32)),
        in_specs=[_VMEM] * len(args),
        out_specs=(_VMEM, _VMEM),
    )(*args)

    gate_a_out = gate_a_out.reshape(bat, -1, D_MODEL)
    return gate_a_out, (gate_b_out, x_B_edge_index)


# ==================================== deterministic init ===================================

class _KeyGen:
    def __init__(self, seed):
        self._key = jax.random.PRNGKey(seed)

    def __call__(self):
        self._key, sub = jax.random.split(self._key)
        return sub


def positional_embedding(L, d_model):
    pos = jnp.arange(L, dtype=jnp.float32)[:, None]
    div = jnp.exp(jnp.arange(0, d_model, 2, dtype=jnp.float32) * (-math.log(10000.0) / d_model))
    sin = jnp.sin(pos * div)
    cos = jnp.cos(pos * div)
    return jnp.stack([sin, cos], axis=-1).reshape(L, d_model)   # interleaved sin/cos


def init_params(seed=0):
    kg = _KeyGen(seed)

    def W(*shape):
        return 0.1 * jax.random.normal(kg(), shape, dtype=jnp.float32)

    params = {}
    params["expert"] = dict(w1=W(FEATURE_DIM, 64), b1=W(1, 64),
                            w2=W(64, EXPERT_OUT), b2=W(1, EXPERT_OUT))
    params["seq"] = dict(
        tok_w=W(3, FEATURE_DIM, D_MODEL),                      # per-tap token-embedding conv
        w_q=W(E_LAYERS, N_HEADS, D_MODEL, D_HEAD), b_q=W(E_LAYERS, N_HEADS, 1, D_HEAD),
        w_k=W(E_LAYERS, N_HEADS, D_MODEL, D_HEAD), b_k=W(E_LAYERS, N_HEADS, 1, D_HEAD),
        w_v=W(E_LAYERS, N_HEADS, D_MODEL, D_HEAD), b_v=W(E_LAYERS, N_HEADS, 1, D_HEAD),
        w_o=W(E_LAYERS, N_HEADS, D_HEAD, D_MODEL), b_o=W(E_LAYERS, 1, D_MODEL),
        w_ff1=W(E_LAYERS, D_MODEL, D_FF), b_ff1=W(E_LAYERS, 1, D_FF),
        w_ff2=W(E_LAYERS, D_FF, D_MODEL), b_ff2=W(E_LAYERS, 1, D_MODEL),
        ln1_g=jnp.ones((E_LAYERS, 1, D_MODEL), jnp.float32),
        ln1_b=jnp.zeros((E_LAYERS, 1, D_MODEL), jnp.float32),
        ln2_g=jnp.ones((E_LAYERS, 1, D_MODEL), jnp.float32),
        ln2_b=jnp.zeros((E_LAYERS, 1, D_MODEL), jnp.float32),
        conv_w=W(E_LAYERS - 1, 3, D_MODEL, D_MODEL),           # per-tap distilling conv
        conv_b=W(E_LAYERS - 1, 1, D_MODEL),
        norm_g=jnp.ones((1, D_MODEL), jnp.float32),
        norm_b=jnp.zeros((1, D_MODEL), jnp.float32),
        pe=positional_embedding(SEQ_LEN, D_MODEL),             # constant, precomputed once
    )
    params["gcn"] = dict(w1=W(FEATURE_DIM, GCN_HID), b1=W(1, GCN_HID),
                         w2=W(GCN_HID, EXPERT_OUT), b2=W(1, EXPERT_OUT))
    params["gate_w"] = W(FEATURE_DIM, TASK_EXPERT_NUM + COMMON_EXPERT_NUM)
    params["gate_b"] = W(1, TASK_EXPERT_NUM + COMMON_EXPERT_NUM)
    # Shared_Gate_Layer exists in __init__ but is unused in forward -> not initialized here.
    return params


# ========================================== main ===========================================

if __name__ == "__main__":
    params = init_params(0)

    key = jax.random.PRNGKey(0)
    k1, k2 = jax.random.split(key)
    x_A = jax.random.normal(k1, (BATCH, SEQ_LEN, FEATURE_DIM), dtype=jnp.float32)
    x_B_x = jax.random.normal(k2, (N_NODES, FEATURE_DIM), dtype=jnp.float32)
    x_B_edge_index = jnp.array([[0, 1, 1, 2, 2, 3, 3, 4, 4, 5, 5, 0],
                                [1, 0, 2, 1, 3, 2, 4, 3, 5, 4, 0, 5]], dtype=jnp.int32)

    gate_a_out, (gate_b_out, edge_index_out) = extraction_network_forward(
        params, x_A, x_B_x, x_B_edge_index)
    jax.block_until_ready((gate_a_out, gate_b_out, edge_index_out))

    # seq len 8 is distilled twice (8 -> 4 -> 2) by the Informer conv layers.
    l_final = _stage_lengths(SEQ_LEN, E_LAYERS)[-1]
    assert gate_a_out.shape == (BATCH, TASK_EXPERT_NUM * l_final, D_MODEL), gate_a_out.shape
    assert gate_b_out.shape == (N_NODES, D_MODEL), gate_b_out.shape
    assert bool(jnp.isfinite(gate_a_out).all()) and bool(jnp.isfinite(gate_b_out).all())

    print("KERNEL_OK")
</pallas_src>

<mosaic_0001>
module attributes {stable_mosaic.version = 11 : i64} {
  func.func @_extraction_kernel(%arg0: memref<2x8x16xf32, #tpu.memory_space<vmem>>, %arg1: memref<6x16xf32, #tpu.memory_space<vmem>>, %arg2: memref<6x6xf32, #tpu.memory_space<vmem>>, %arg3: memref<16x16xf32, #tpu.memory_space<vmem>>, %arg4: memref<8x8xf32, #tpu.memory_space<vmem>>, %arg5: memref<4x4xf32, #tpu.memory_space<vmem>>, %arg6: memref<8x32xf32, #tpu.memory_space<vmem>>, %arg7: memref<3x16x32xf32, #tpu.memory_space<vmem>>, %arg8: memref<3x4x32x8xf32, #tpu.memory_space<vmem>>, %arg9: memref<3x4x1x8xf32, #tpu.memory_space<vmem>>, %arg10: memref<3x4x32x8xf32, #tpu.memory_space<vmem>>, %arg11: memref<3x4x1x8xf32, #tpu.memory_space<vmem>>, %arg12: memref<3x4x32x8xf32, #tpu.memory_space<vmem>>, %arg13: memref<3x4x1x8xf32, #tpu.memory_space<vmem>>, %arg14: memref<3x4x8x32xf32, #tpu.memory_space<vmem>>, %arg15: memref<3x1x32xf32, #tpu.memory_space<vmem>>, %arg16: memref<3x32x32xf32, #tpu.memory_space<vmem>>, %arg17: memref<3x1x32xf32, #tpu.memory_space<vmem>>, %arg18: memref<3x32x32xf32, #tpu.memory_space<vmem>>, %arg19: memref<3x1x32xf32, #tpu.memory_space<vmem>>, %arg20: memref<3x1x32xf32, #tpu.memory_space<vmem>>, %arg21: memref<3x1x32xf32, #tpu.memory_space<vmem>>, %arg22: memref<3x1x32xf32, #tpu.memory_space<vmem>>, %arg23: memref<3x1x32xf32, #tpu.memory_space<vmem>>, %arg24: memref<2x3x32x32xf32, #tpu.memory_space<vmem>>, %arg25: memref<2x1x32xf32, #tpu.memory_space<vmem>>, %arg26: memref<1x32xf32, #tpu.memory_space<vmem>>, %arg27: memref<1x32xf32, #tpu.memory_space<vmem>>, %arg28: memref<16x64xf32, #tpu.memory_space<vmem>>, %arg29: memref<1x64xf32, #tpu.memory_space<vmem>>, %arg30: memref<64x32xf32, #tpu.memory_space<vmem>>, %arg31: memref<1x32xf32, #tpu.memory_space<vmem>>, %arg32: memref<16x24xf32, #tpu.memory_space<vmem>>, %arg33: memref<1x24xf32, #tpu.memory_space<vmem>>, %arg34: memref<24x32xf32, #tpu.memory_space<vmem>>, %arg35: memref<1x32xf32, #tpu.memory_space<vmem>>, %arg36: memref<16x2xf32, #tpu.memory_space<vmem>>, %arg37: memref<1x2xf32, #tpu.memory_space<vmem>>, %arg38: memref<4x32xf32, #tpu.memory_space<vmem>>, %arg39: memref<6x32xf32, #tpu.memory_space<vmem>>) attributes {dimension_semantics = [], scalar_prefetch = 0 : i64, scratch_operands = 0 : i64, tpu.core_type = #tpu.core_type<tc>} {
    %c0 = arith.constant 0 : index
    %c0_0 = arith.constant 0 : index
    %c0_1 = arith.constant 0 : index
    %0 = vector.load %arg0[%c0, %c0_0, %c0_1] : memref<2x8x16xf32, #tpu.memory_space<vmem>>, vector<2x8x16xf32>
    %c0_2 = arith.constant 0 : index
    %c0_3 = arith.constant 0 : index
    %c0_4 = arith.constant 0 : index
    %1 = vector.load %arg7[%c0_2, %c0_3, %c0_4] : memref<3x16x32xf32, #tpu.memory_space<vmem>>, vector<1x16x32xf32>
    %2 = vector.shape_cast %1 : vector<1x16x32xf32> to vector<16x32xf32>
    %c1 = arith.constant 1 : index
    %c0_5 = arith.constant 0 : index
    %c0_6 = arith.constant 0 : index
    %3 = vector.load %arg7[%c1, %c0_5, %c0_6] : memref<3x16x32xf32, #tpu.memory_space<vmem>>, vector<1x16x32xf32>
    %4 = vector.shape_cast %3 : vector<1x16x32xf32> to vector<16x32xf32>
    %c2 = arith.constant 2 : index
    %c0_7 = arith.constant 0 : index
    %c0_8 = arith.constant 0 : index
    %5 = vector.load %arg7[%c2, %c0_7, %c0_8] : memref<3x16x32xf32, #tpu.memory_space<vmem>>, vector<1x16x32xf32>
    %6 = vector.shape_cast %5 : vector<1x16x32xf32> to vector<16x32xf32>
    %7 = vector.extract_strided_slice %0 {offsets = [0, 7, 0], sizes = [2, 1, 16], strides = [1, 1, 1]} : vector<2x8x16xf32> to vector<2x1x16xf32>
    %8 = vector.extract_strided_slice %0 {offsets = [0, 0, 0], sizes = [2, 7, 16], strides = [1, 1, 1]} : vector<2x8x16xf32> to vector<2x7x16xf32>
    %9 = tpu.concatenate %7, %8 in 1 : vector<2x1x16xf32>, vector<2x7x16xf32> -> vector<2x8x16xf32>
    %10 = vector.extract_strided_slice %0 {offsets = [0, 1, 0], sizes = [2, 7, 16], strides = [1, 1, 1]} : vector<2x8x16xf32> to vector<2x7x16xf32>
    %11 = vector.extract_strided_slice %0 {offsets = [0, 0, 0], sizes = [2, 1, 16], strides = [1, 1, 1]} : vector<2x8x16xf32> to vector<2x1x16xf32>
    %12 = tpu.concatenate %10, %11 in 1 : vector<2x7x16xf32>, vector<2x1x16xf32> -> vector<2x8x16xf32>
    %13 = vector.shape_cast %9 : vector<2x8x16xf32> to vector<16x16xf32>
    %cst = arith.constant dense<0.000000e+00> : vector<16x32xf32>
    %14 = tpu.matmul %13, %2, %cst {dimension_numbers = #tpu.dot_dimension_numbers<[1], [0], [0], [1], [0, 0, 1, 1], [], []>} : vector<16x16xf32>, vector<16x32xf32>, vector<16x32xf32> -> vector<16x32xf32>
    %15 = vector.shape_cast %0 : vector<2x8x16xf32> to vector<16x16xf32>
    %cst_9 = arith.constant dense<0.000000e+00> : vector<16x32xf32>
    %16 = tpu.matmul %15, %4, %cst_9 {dimension_numbers = #tpu.dot_dimension_numbers<[1], [0], [0], [1], [0, 0, 1, 1], [], []>} : vector<16x16xf32>, vector<16x32xf32>, vector<16x32xf32> -> vector<16x32xf32>
    %17 = arith.addf %14, %16 : vector<16x32xf32>
    %18 = vector.shape_cast %12 : vector<2x8x16xf32> to vector<16x16xf32>
    %cst_10 = arith.constant dense<0.000000e+00> : vector<16x32xf32>
    %19 = tpu.matmul %18, %6, %cst_10 {dimension_numbers = #tpu.dot_dimension_numbers<[1], [0], [0], [1], [0, 0, 1, 1], [], []>} : vector<16x16xf32>, vector<16x32xf32>, vector<16x32xf32> -> vector<16x32xf32>
    %20 = arith.addf %17, %19 : vector<16x32xf32>
    %21 = vector.shape_cast %20 : vector<16x32xf32> to vector<2x8x32xf32>
    %c0_11 = arith.constant 0 : index
    %c0_12 = arith.constant 0 : index
    %22 = vector.load %arg6[%c0_11, %c0_12] : memref<8x32xf32, #tpu.memory_space<vmem>>, vector<8x32xf32>
    %23 = vector.shape_cast %22 : vector<8x32xf32> to vector<1x8x32xf32>
    %24 = vector.broadcast %23 : vector<1x8x32xf32> to vector<2x8x32xf32>
    %25 = arith.addf %21, %24 : vector<2x8x32xf32>
    %26 = vector.shape_cast %25 : vector<2x8x32xf32> to vector<16x32xf32>
    %c0_13 = arith.constant 0 : index
    %c0_14 = arith.constant 0 : index
    %27 = vector.load %arg3[%c0_13, %c0_14] : memref<16x16xf32, #tpu.memory_space<vmem>>, vector<16x16xf32>
    %cst_15 = arith.constant 0.000000e+00 : f32
    %28 = vector.broadcast %cst_15 : f32 to vector<16x32xf32>
    %c0_16 = arith.constant 0 : index
    %c0_17 = arith.constant 0 : index
    %c0_18 = arith.constant 0 : index
    %c0_19 = arith.constant 0 : index
    %29 = vector.load %arg8[%c0_16, %c0_17, %c0_18, %c0_19] : memref<3x4x32x8xf32, #tpu.memory_space<vmem>>, vector<1x1x32x8xf32>
    %30 = vector.shape_cast %29 : vector<1x1x32x8xf32> to vector<32x8xf32>
    %cst_20 = arith.constant dense<0.000000e+00> : vector<16x8xf32>
    %31 = tpu.matmul %26, %30, %cst_20 {dimension_numbers = #tpu.dot_dimension_numbers<[1], [0], [0], [1], [0, 0, 1, 1], [], []>} : vector<16x32xf32>, vector<32x8xf32>, vector<16x8xf32> -> vector<16x8xf32>
    %c0_21 = arith.constant 0 : index
    %c0_22 = arith.constant 0 : index
    %c0_23 = arith.constant 0 : index
    %c0_24 = arith.constant 0 : index
    %32 = vector.load %arg9[%c0_21, %c0_22, %c0_23, %c0_24] : memref<3x4x1x8xf32, #tpu.memory_space<vmem>>, vector<1x1x1x8xf32>
    %33 = vector.shape_cast %32 : vector<1x1x1x8xf32> to vector<1x8xf32>
    %34 = vector.broadcast %33 : vector<1x8xf32> to vector<16x8xf32>
    %35 = arith.addf %31, %34 : vector<16x8xf32>
    %cst_25 = arith.constant 0.353553385 : f32
    %36 = vector.broadcast %cst_25 : f32 to vector<16x8xf32>
    %37 = arith.mulf %35, %36 : vector<16x8xf32>
    %c0_26 = arith.constant 0 : index
    %c0_27 = arith.constant 0 : index
    %c0_28 = arith.constant 0 : index
    %c0_29 = arith.constant 0 : index
    %38 = vector.load %arg10[%c0_26, %c0_27, %c0_28, %c0_29] : memref<3x4x32x8xf32, #tpu.memory_space<vmem>>, vector<1x1x32x8xf32>
    %39 = vector.shape_cast %38 : vector<1x1x32x8xf32> to vector<32x8xf32>
    %cst_30 = arith.constant dense<0.000000e+00> : vector<16x8xf32>
    %40 = tpu.matmul %26, %39, %cst_30 {dimension_numbers = #tpu.dot_dimension_numbers<[1], [0], [0], [1], [0, 0, 1, 1], [], []>} : vector<16x32xf32>, vector<32x8xf32>, vector<16x8xf32> -> vector<16x8xf32>
    %c0_31 = arith.constant 0 : index
    %c0_32 = arith.constant 0 : index
    %c0_33 = arith.constant 0 : index
    %c0_34 = arith.constant 0 : index
    %41 = vector.load %arg11[%c0_31, %c0_32, %c0_33, %c0_34] : memref<3x4x1x8xf32, #tpu.memory_space<vmem>>, vector<1x1x1x8xf32>
    %42 = vector.shape_cast %41 : vector<1x1x1x8xf32> to vector<1x8xf32>
    %43 = vector.broadcast %42 : vector<1x8xf32> to vector<16x8xf32>
    %44 = arith.addf %40, %43 : vector<16x8xf32>
    %c0_35 = arith.constant 0 : index
    %c0_36 = arith.constant 0 : index
    %c0_37 = arith.constant 0 : index
    %c0_38 = arith.constant 0 : index
    %45 = vector.load %arg12[%c0_35, %c0_36, %c0_37, %c0_38] : memref<3x4x32x8xf32, #tpu.memory_space<vmem>>, vector<1x1x32x8xf32>
    %46 = vector.shape_cast %45 : vector<1x1x32x8xf32> to vector<32x8xf32>
    %cst_39 = arith.constant dense<0.000000e+00> : vector<16x8xf32>
    %47 = tpu.matmul %26, %46, %cst_39 {dimension_numbers = #tpu.dot_dimension_numbers<[1], [0], [0], [1], [0, 0, 1, 1], [], []>} : vector<16x32xf32>, vector<32x8xf32>, vector<16x8xf32> -> vector<16x8xf32>
    %c0_40 = arith.constant 0 : index
    %c0_41 = arith.constant 0 : index
    %c0_42 = arith.constant 0 : index
    %c0_43 = arith.constant 0 : index
    %48 = vector.load %arg13[%c0_40, %c0_41, %c0_42, %c0_43] : memref<3x4x1x8xf32, #tpu.memory_space<vmem>>, vector<1x1x1x8xf32>
    %49 = vector.shape_cast %48 : vector<1x1x1x8xf32> to vector<1x8xf32>
    %50 = vector.broadcast %49 : vector<1x8xf32> to vector<16x8xf32>
    %51 = arith.addf %47, %50 : vector<16x8xf32>
    "tpu.trace_start"() <{level = 10 : i32, message = "nd,md->nm"}> : () -> ()
    %cst_44 = arith.constant dense<0.000000e+00> : vector<16x16xf32>
    %52 = tpu.matmul %37, %44, %cst_44 {dimension_numbers = #tpu.dot_dimension_numbers<[1], [1], [0], [0], [0, 0, 1, 0], [], []>} : vector<16x8xf32>, vector<16x8xf32>, vector<16x16xf32> -> vector<16x16xf32>
    "tpu.trace_stop"() : () -> ()
    %53 = arith.addf %52, %27 : vector<16x16xf32>
    %cst_45 = arith.constant dense<0xFF800000> : vector<16xf32>
    %54 = vector.multi_reduction <maximumf>, %53, %cst_45 [1] : vector<16x16xf32> to vector<16xf32>
    %55 = vector.shape_cast %54 : vector<16xf32> to vector<16x1xf32>
    %56 = vector.broadcast %55 : vector<16x1xf32> to vector<16x16xf32>
    %57 = arith.subf %53, %56 : vector<16x16xf32>
    %58 = math.exp %57 : vector<16x16xf32>
    %cst_46 = arith.constant dense<0.000000e+00> : vector<16xf32>
    %59 = vector.multi_reduction <add>, %58, %cst_46 [1] : vector<16x16xf32> to vector<16xf32>
    %60 = vector.shape_cast %59 : vector<16xf32> to vector<16x1xf32>
    %61 = tpu.reciprocal %60 {approx = true} : vector<16x1xf32> -> vector<16x1xf32>
    %62 = vector.broadcast %61 : vector<16x1xf32> to vector<16x16xf32>
    %63 = arith.mulf %58, %62 : vector<16x16xf32>
    %cst_47 = arith.constant dense<0.000000e+00> : vector<16x8xf32>
    %64 = tpu.matmul %63, %51, %cst_47 {dimension_numbers = #tpu.dot_dimension_numbers<[1], [0], [0], [1], [0, 0, 1, 1], [], []>} : vector<16x16xf32>, vector<16x8xf32>, vector<16x8xf32> -> vector<16x8xf32>
    %c0_48 = arith.constant 0 : index
    %c0_49 = arith.constant 0 : index
    %c0_50 = arith.constant 0 : index
    %c0_51 = arith.constant 0 : index
    %65 = vector.load %arg14[%c0_48, %c0_49, %c0_50, %c0_51] : memref<3x4x8x32xf32, #tpu.memory_space<vmem>>, vector<1x1x8x32xf32>
    %66 = vector.shape_cast %65 : vector<1x1x8x32xf32> to vector<8x32xf32>
    %cst_52 = arith.constant dense<0.000000e+00> : vector<16x32xf32>
    %67 = tpu.matmul %64, %66, %cst_52 {dimension_numbers = #tpu.dot_dimension_numbers<[1], [0], [0], [1], [0, 0, 1, 1], [], []>} : vector<16x8xf32>, vector<8x32xf32>, vector<16x32xf32> -> vector<16x32xf32>
    %68 = arith.addf %28, %67 : vector<16x32xf32>
    %c0_53 = arith.constant 0 : index
    %c1_54 = arith.constant 1 : index
    %c0_55 = arith.constant 0 : index
    %c0_56 = arith.constant 0 : index
    %69 = vector.load %arg8[%c0_53, %c1_54, %c0_55, %c0_56] : memref<3x4x32x8xf32, #tpu.memory_space<vmem>>, vector<1x1x32x8xf32>
    %70 = vector.shape_cast %69 : vector<1x1x32x8xf32> to vector<32x8xf32>
    %cst_57 = arith.constant dense<0.000000e+00> : vector<16x8xf32>
    %71 = tpu.matmul %26, %70, %cst_57 {dimension_numbers = #tpu.dot_dimension_numbers<[1], [0], [0], [1], [0, 0, 1, 1], [], []>} : vector<16x32xf32>, vector<32x8xf32>, vector<16x8xf32> -> vector<16x8xf32>
    %c0_58 = arith.constant 0 : index
    %c1_59 = arith.constant 1 : index
    %c0_60 = arith.constant 0 : index
    %c0_61 = arith.constant 0 : index
    %72 = vector.load %arg9[%c0_58, %c1_59, %c0_60, %c0_61] : memref<3x4x1x8xf32, #tpu.memory_space<vmem>>, vector<1x1x1x8xf32>
    %73 = vector.shape_cast %72 : vector<1x1x1x8xf32> to vector<1x8xf32>
    %74 = vector.broadcast %73 : vector<1x8xf32> to vector<16x8xf32>
    %75 = arith.addf %71, %74 : vector<16x8xf32>
    %cst_62 = arith.constant 0.353553385 : f32
    %76 = vector.broadcast %cst_62 : f32 to vector<16x8xf32>
    %77 = arith.mulf %75, %76 : vector<16x8xf32>
    %c0_63 = arith.constant 0 : index
    %c1_64 = arith.constant 1 : index
    %c0_65 = arith.constant 0 : index
    %c0_66 = arith.constant 0 : index
    %78 = vector.load %arg10[%c0_63, %c1_64, %c0_65, %c0_66] : memref<3x4x32x8xf32, #tpu.memory_space<vmem>>, vector<1x1x32x8xf32>
    %79 = vector.shape_cast %78 : vector<1x1x32x8xf32> to vector<32x8xf32>
    %cst_67 = arith.constant dense<0.000000e+00> : vector<16x8xf32>
    %80 = tpu.matmul %26, %79, %cst_67 {dimension_numbers = #tpu.dot_dimension_numbers<[1], [0], [0], [1], [0, 0, 1, 1], [], []>} : vector<16x32xf32>, vector<32x8xf32>, vector<16x8xf32> -> vector<16x8xf32>
    %c0_68 = arith.constant 0 : index
    %c1_69 = arith.constant 1 : index
    %c0_70 = arith.constant 0 : index
    %c0_71 = arith.constant 0 : index
    %81 = vector.load %arg11[%c0_68, %c1_69, %c0_70, %c0_71] : memref<3x4x1x8xf32, #tpu.memory_space<vmem>>, vector<1x1x1x8xf32>
    %82 = vector.shape_cast %81 : vector<1x1x1x8xf32> to vector<1x8xf32>
    %83 = vector.broadcast %82 : vector<1x8xf32> to vector<16x8xf32>
    %84 = arith.addf %80, %83 : vector<16x8xf32>
    %c0_72 = arith.constant 0 : index
    %c1_73 = arith.constant 1 : index
    %c0_74 = arith.constant 0 : index
    %c0_75 = arith.constant 0 : index
    %85 = vector.load %arg12[%c0_72, %c1_73, %c0_74, %c0_75] : memref<3x4x32x8xf32, #tpu.memory_space<vmem>>, vector<1x1x32x8xf32>
    %86 = vector.shape_cast %85 : vector<1x1x32x8xf32> to vector<32x8xf32>
    %cst_76 = arith.constant dense<0.000000e+00> : vector<16x8xf32>
    %87 = tpu.matmul %26, %86, %cst_76 {dimension_numbers = #tpu.dot_dimension_numbers<[1], [0], [0], [1], [0, 0, 1, 1], [], []>} : vector<16x32xf32>, vector<32x8xf32>, vector<16x8xf32> -> vector<16x8xf32>
    %c0_77 = arith.constant 0 : index
    %c1_78 = arith.constant 1 : index
    %c0_79 = arith.constant 0 : index
    %c0_80 = arith.constant 0 : index
    %88 = vector.load %arg13[%c0_77, %c1_78, %c0_79, %c0_80] : memref<3x4x1x8xf32, #tpu.memory_space<vmem>>, vector<1x1x1x8xf32>
    %89 = vector.shape_cast %88 : vector<1x1x1x8xf32> to vector<1x8xf32>
    %90 = vector.broadcast %89 : vector<1x8xf32> to vector<16x8xf32>
    %91 = arith.addf %87, %90 : vector<16x8xf32>
    "tpu.trace_start"() <{level = 10 : i32, message = "nd,md->nm"}> : () -> ()
    %cst_81 = arith.constant dense<0.000000e+00> : vector<16x16xf32>
    %92 = tpu.matmul %77, %84, %cst_81 {dimension_numbers = #tpu.dot_dimension_numbers<[1], [1], [0], [0], [0, 0, 1, 0], [], []>} : vector<16x8xf32>, vector<16x8xf32>, vector<16x16xf32> -> vector<16x16xf32>
    "tpu.trace_stop"() : () -> ()
    %93 = arith.addf %92, %27 : vector<16x16xf32>
    %cst_82 = arith.constant dense<0xFF800000> : vector<16xf32>
    %94 = vector.multi_reduction <maximumf>, %93, %cst_82 [1] : vector<16x16xf32> to vector<16xf32>
    %95 = vector.shape_cast %94 : vector<16xf32> to vector<16x1xf32>
    %96 = vector.broadcast %95 : vector<16x1xf32> to vector<16x16xf32>
    %97 = arith.subf %93, %96 : vector<16x16xf32>
    %98 = math.exp %97 : vector<16x16xf32>
    %cst_83 = arith.constant dense<0.000000e+00> : vector<16xf32>
    %99 = vector.multi_reduction <add>, %98, %cst_83 [1] : vector<16x16xf32> to vector<16xf32>
    %100 = vector.shape_cast %99 : vector<16xf32> to vector<16x1xf32>
    %101 = tpu.reciprocal %100 {approx = true} : vector<16x1xf32> -> vector<16x1xf32>
    %102 = vector.broadcast %101 : vector<16x1xf32> to vector<16x16xf32>
    %103 = arith.mulf %98, %102 : vector<16x16xf32>
    %cst_84 = arith.constant dense<0.000000e+00> : vector<16x8xf32>
    %104 = tpu.matmul %103, %91, %cst_84 {dimension_numbers = #tpu.dot_dimension_numbers<[1], [0], [0], [1], [0, 0, 1, 1], [], []>} : vector<16x16xf32>, vector<16x8xf32>, vector<16x8xf32> -> vector<16x8xf32>
    %c0_85 = arith.constant 0 : index
    %c1_86 = arith.constant 1 : index
    %c0_87 = arith.constant 0 : index
    %c0_88 = arith.constant 0 : index
    %105 = vector.load %arg14[%c0_85, %c1_86, %c0_87, %c0_88] : memref<3x4x8x32xf32, #tpu.memory_space<vmem>>, vector<1x1x8x32xf32>
    %106 = vector.shape_cast %105 : vector<1x1x8x32xf32> to vector<8x32xf32>
    %cst_89 = arith.constant dense<0.000000e+00> : vector<16x32xf32>
    %107 = tpu.matmul %104, %106, %cst_89 {dimension_numbers = #tpu.dot_dimension_numbers<[1], [0], [0], [1], [0, 0, 1, 1], [], []>} : vector<16x8xf32>, vector<8x32xf32>, vector<16x32xf32> -> vector<16x32xf32>
    %108 = arith.addf %68, %107 : vector<16x32xf32>
    %c0_90 = arith.constant 0 : index
    %c2_91 = arith.constant 2 : index
    %c0_92 = arith.constant 0 : index
    %c0_93 = arith.constant 0 : index
    %109 = vector.load %arg8[%c0_90, %c2_91, %c0_92, %c0_93] : memref<3x4x32x8xf32, #tpu.memory_space<vmem>>, vector<1x1x32x8xf32>
    %110 = vector.shape_cast %109 : vector<1x1x32x8xf32> to vector<32x8xf32>
    %cst_94 = arith.constant dense<0.000000e+00> : vector<16x8xf32>
    %111 = tpu.matmul %26, %110, %cst_94 {dimension_numbers = #tpu.dot_dimension_numbers<[1], [0], [0], [1], [0, 0, 1, 1], [], []>} : vector<16x32xf32>, vector<32x8xf32>, vector<16x8xf32> -> vector<16x8xf32>
    %c0_95 = arith.constant 0 : index
    %c2_96 = arith.constant 2 : index
    %c0_97 = arith.constant 0 : index
    %c0_98 = arith.constant 0 : index
    %112 = vector.load %arg9[%c0_95, %c2_96, %c0_97, %c0_98] : memref<3x4x1x8xf32, #tpu.memory_space<vmem>>, vector<1x1x1x8xf32>
    %113 = vector.shape_cast %112 : vector<1x1x1x8xf32> to vector<1x8xf32>
    %114 = vector.broadcast %113 : vector<1x8xf32> to vector<16x8xf32>
    %115 = arith.addf %111, %114 : vector<16x8xf32>
    %cst_99 = arith.constant 0.353553385 : f32
    %116 = vector.broadcast %cst_99 : f32 to vector<16x8xf32>
    %117 = arith.mulf %115, %116 : vector<16x8xf32>
    %c0_100 = arith.constant 0 : index
    %c2_101 = arith.constant 2 : index
    %c0_102 = arith.constant 0 : index
    %c0_103 = arith.constant 0 : index
    %118 = vector.load %arg10[%c0_100, %c2_101, %c0_102, %c0_103] : memref<3x4x32x8xf32, #tpu.memory_space<vmem>>, vector<1x1x32x8xf32>
    %119 = vector.shape_cast %118 : vector<1x1x32x8xf32> to vector<32x8xf32>
    %cst_104 = arith.constant dense<0.000000e+00> : vector<16x8xf32>
    %120 = tpu.matmul %26, %119, %cst_104 {dimension_numbers = #tpu.dot_dimension_numbers<[1], [0], [0], [1], [0, 0, 1, 1], [], []>} : vector<16x32xf32>, vector<32x8xf32>, vector<16x8xf32> -> vector<16x8xf32>
    %c0_105 = arith.constant 0 : index
    %c2_106 = arith.constant 2 : index
    %c0_107 = arith.constant 0 : index
    %c0_108 = arith.constant 0 : index
    %121 = vector.load %arg11[%c0_105, %c2_106, %c0_107, %c0_108] : memref<3x4x1x8xf32, #tpu.memory_space<vmem>>, vector<1x1x1x8xf32>
    %122 = vector.shape_cast %121 : vector<1x1x1x8xf32> to vector<1x8xf32>
    %123 = vector.broadcast %122 : vector<1x8xf32> to vector<16x8xf32>
    %124 = arith.addf %120, %123 : vector<16x8xf32>
    %c0_109 = arith.constant 0 : index
    %c2_110 = arith.constant 2 : index
    %c0_111 = arith.constant 0 : index
    %c0_112 = arith.constant 0 : index
    %125 = vector.load %arg12[%c0_109, %c2_110, %c0_111, %c0_112] : memref<3x4x32x8xf32, #tpu.memory_space<vmem>>, vector<1x1x32x8xf32>
    %126 = vector.shape_cast %125 : vector<1x1x32x8xf32> to vector<32x8xf32>
    %cst_113 = arith.constant dense<0.000000e+00> : vector<16x8xf32>
    %127 = tpu.matmul %26, %126, %cst_113 {dimension_numbers = #tpu.dot_dimension_numbers<[1], [0], [0], [1], [0, 0, 1, 1], [], []>} : vector<16x32xf32>, vector<32x8xf32>, vector<16x8xf32> -> vector<16x8xf32>
    %c0_114 = arith.constant 0 : index
    %c2_115 = arith.constant 2 : index
    %c0_116 = arith.constant 0 : index
    %c0_117 = arith.constant 0 : index
    %128 = vector.load %arg13[%c0_114, %c2_115, %c0_116, %c0_117] : memref<3x4x1x8xf32, #tpu.memory_space<vmem>>, vector<1x1x1x8xf32>
    %129 = vector.shape_cast %128 : vector<1x1x1x8xf32> to vector<1x8xf32>
    %130 = vector.broadcast %129 : vector<1x8xf32> to vector<16x8xf32>
    %131 = arith.addf %127, %130 : vector<16x8xf32>
    "tpu.trace_start"() <{level = 10 : i32, message = "nd,md->nm"}> : () -> ()
    %cst_118 = arith.constant dense<0.000000e+00> : vector<16x16xf32>
    %132 = tpu.matmul %117, %124, %cst_118 {dimension_numbers = #tpu.dot_dimension_numbers<[1], [1], [0], [0], [0, 0, 1, 0], [], []>} : vector<16x8xf32>, vector<16x8xf32>, vector<16x16xf32> -> vector<16x16xf32>
    "tpu.trace_stop"() : () -> ()
    %133 = arith.addf %132, %27 : vector<16x16xf32>
    %cst_119 = arith.constant dense<0xFF800000> : vector<16xf32>
    %134 = vector.multi_reduction <maximumf>, %133, %cst_119 [1] : vector<16x16xf32> to vector<16xf32>
    %135 = vector.shape_cast %134 : vector<16xf32> to vector<16x1xf32>
    %136 = vector.broadcast %135 : vector<16x1xf32> to vector<16x16xf32>
    %137 = arith.subf %133, %136 : vector<16x16xf32>
    %138 = math.exp %137 : vector<16x16xf32>
    %cst_120 = arith.constant dense<0.000000e+00> : vector<16xf32>
    %139 = vector.multi_reduction <add>, %138, %cst_120 [1] : vector<16x16xf32> to vector<16xf32>
    %140 = vector.shape_cast %139 : vector<16xf32> to vector<16x1xf32>
    %141 = tpu.reciprocal %140 {approx = true} : vector<16x1xf32> -> vector<16x1xf32>
    %142 = vector.broadcast %141 : vector<16x1xf32> to vector<16x16xf32>
    %143 = arith.mulf %138, %142 : vector<16x16xf32>
    %cst_121 = arith.constant dense<0.000000e+00> : vector<16x8xf32>
    %144 = tpu.matmul %143, %131, %cst_121 {dimension_numbers = #tpu.dot_dimension_numbers<[1], [0], [0], [1], [0, 0, 1, 1], [], []>} : vector<16x16xf32>, vector<16x8xf32>, vector<16x8xf32> -> vector<16x8xf32>
    %c0_122 = arith.constant 0 : index
    %c2_123 = arith.constant 2 : index
    %c0_124 = arith.constant 0 : index
    %c0_125 = arith.constant 0 : index
    %145 = vector.load %arg14[%c0_122, %c2_123, %c0_124, %c0_125] : memref<3x4x8x32xf32, #tpu.memory_space<vmem>>, vector<1x1x8x32xf32>
    %146 = vector.shape_cast %145 : vector<1x1x8x32xf32> to vector<8x32xf32>
    %cst_126 = arith.constant dense<0.000000e+00> : vector<16x32xf32>
    %147 = tpu.matmul %144, %146, %cst_126 {dimension_numbers = #tpu.dot_dimension_numbers<[1], [0], [0], [1], [0, 0, 1, 1], [], []>} : vector<16x8xf32>, vector<8x32xf32>, vector<16x32xf32> -> vector<16x32xf32>
    %148 = arith.addf %108, %147 : vector<16x32xf32>
    %c0_127 = arith.constant 0 : index
    %c3 = arith.constant 3 : index
    %c0_128 = arith.constant 0 : index
    %c0_129 = arith.constant 0 : index
    %149 = vector.load %arg8[%c0_127, %c3, %c0_128, %c0_129] : memref<3x4x32x8xf32, #tpu.memory_space<vmem>>, vector<1x1x32x8xf32>
    %150 = vector.shape_cast %149 : vector<1x1x32x8xf32> to vector<32x8xf32>
    %cst_130 = arith.constant dense<0.000000e+00> : vector<16x8xf32>
    %151 = tpu.matmul %26, %150, %cst_130 {dimension_numbers = #tpu.dot_dimension_numbers<[1], [0], [0], [1], [0, 0, 1, 1], [], []>} : vector<16x32xf32>, vector<32x8xf32>, vector<16x8xf32> -> vector<16x8xf32>
    %c0_131 = arith.constant 0 : index
    %c3_132 = arith.constant 3 : index
    %c0_133 = arith.constant 0 : index
    %c0_134 = arith.constant 0 : index
    %152 = vector.load %arg9[%c0_131, %c3_132, %c0_133, %c0_134] : memref<3x4x1x8xf32, #tpu.memory_space<vmem>>, vector<1x1x1x8xf32>
    %153 = vector.shape_cast %152 : vector<1x1x1x8xf32> to vector<1x8xf32>
    %154 = vector.broadcast %153 : vector<1x8xf32> to vector<16x8xf32>
    %155 = arith.addf %151, %154 : vector<16x8xf32>
    %cst_135 = arith.constant 0.353553385 : f32
    %156 = vector.broadcast %cst_135 : f32 to vector<16x8xf32>
    %157 = arith.mulf %155, %156 : vector<16x8xf32>
    %c0_136 = arith.constant 0 : index
    %c3_137 = arith.constant 3 : index
    %c0_138 = arith.constant 0 : index
    %c0_139 = arith.constant 0 : index
    %158 = vector.load %arg10[%c0_136, %c3_137, %c0_138, %c0_139] : memref<3x4x32x8xf32, #tpu.memory_space<vmem>>, vector<1x1x32x8xf32>
    %159 = vector.shape_cast %158 : vector<1x1x32x8xf32> to vector<32x8xf32>
    %cst_140 = arith.constant dense<0.000000e+00> : vector<16x8xf32>
    %160 = tpu.matmul %26, %159, %cst_140 {dimension_numbers = #tpu.dot_dimension_numbers<[1], [0], [0], [1], [0, 0, 1, 1], [], []>} : vector<16x32xf32>, vector<32x8xf32>, vector<16x8xf32> -> vector<16x8xf32>
    %c0_141 = arith.constant 0 : index
    %c3_142 = arith.constant 3 : index
    %c0_143 = arith.constant 0 : index
    %c0_144 = arith.constant 0 : index
    %161 = vector.load %arg11[%c0_141, %c3_142, %c0_143, %c0_144] : memref<3x4x1x8xf32, #tpu.memory_space<vmem>>, vector<1x1x1x8xf32>
    %162 = vector.shape_cast %161 : vector<1x1x1x8xf32> to vector<1x8xf32>
    %163 = vector.broadcast %162 : vector<1x8xf32> to vector<16x8xf32>
    %164 = arith.addf %160, %163 : vector<16x8xf32>
    %c0_145 = arith.constant 0 : index
    %c3_146 = arith.constant 3 : index
    %c0_147 = arith.constant 0 : index
    %c0_148 = arith.constant 0 : index
    %165 = vector.load %arg12[%c0_145, %c3_146, %c0_147, %c0_148] : memref<3x4x32x8xf32, #tpu.memory_space<vmem>>, vector<1x1x32x8xf32>
    %166 = vector.shape_cast %165 : vector<1x1x32x8xf32> to vector<32x8xf32>
    %cst_149 = arith.constant dense<0.000000e+00> : vector<16x8xf32>
    %167 = tpu.matmul %26, %166, %cst_149 {dimension_numbers = #tpu.dot_dimension_numbers<[1], [0], [0], [1], [0, 0, 1, 1], [], []>} : vector<16x32xf32>, vector<32x8xf32>, vector<16x8xf32> -> vector<16x8xf32>
    %c0_150 = arith.constant 0 : index
    %c3_151 = arith.constant 3 : index
    %c0_152 = arith.constant 0 : index
    %c0_153 = arith.constant 0 : index
    %168 = vector.load %arg13[%c0_150, %c3_151, %c0_152, %c0_153] : memref<3x4x1x8xf32, #tpu.memory_space<vmem>>, vector<1x1x1x8xf32>
    %169 = vector.shape_cast %168 : vector<1x1x1x8xf32> to vector<1x8xf32>
    %170 = vector.broadcast %169 : vector<1x8xf32> to vector<16x8xf32>
    %171 = arith.addf %167, %170 : vector<16x8xf32>
    "tpu.trace_start"() <{level = 10 : i32, message = "nd,md->nm"}> : () -> ()
    %cst_154 = arith.constant dense<0.000000e+00> : vector<16x16xf32>
    %172 = tpu.matmul %157, %164, %cst_154 {dimension_numbers = #tpu.dot_dimension_numbers<[1], [1], [0], [0], [0, 0, 1, 0], [], []>} : vector<16x8xf32>, vector<16x8xf32>, vector<16x16xf32> -> vector<16x16xf32>
    "tpu.trace_stop"() : () -> ()
    %173 = arith.addf %172, %27 : vector<16x16xf32>
    %cst_155 = arith.constant dense<0xFF800000> : vector<16xf32>
    %174 = vector.multi_reduction <maximumf>, %173, %cst_155 [1] : vector<16x16xf32> to vector<16xf32>
    %175 = vector.shape_cast %174 : vector<16xf32> to vector<16x1xf32>
    %176 = vector.broadcast %175 : vector<16x1xf32> to vector<16x16xf32>
    %177 = arith.subf %173, %176 : vector<16x16xf32>
    %178 = math.exp %177 : vector<16x16xf32>
    %cst_156 = arith.constant dense<0.000000e+00> : vector<16xf32>
    %179 = vector.multi_reduction <add>, %178, %cst_156 [1] : vector<16x16xf32> to vector<16xf32>
    %180 = vector.shape_cast %179 : vector<16xf32> to vector<16x1xf32>
    %181 = tpu.reciprocal %180 {approx = true} : vector<16x1xf32> -> vector<16x1xf32>
    %182 = vector.broadcast %181 : vector<16x1xf32> to vector<16x16xf32>
    %183 = arith.mulf %178, %182 : vector<16x16xf32>
    %cst_157 = arith.constant dense<0.000000e+00> : vector<16x8xf32>
    %184 = tpu.matmul %183, %171, %cst_157 {dimension_numbers = #tpu.dot_dimension_numbers<[1], [0], [0], [1], [0, 0, 1, 1], [], []>} : vector<16x16xf32>, vector<16x8xf32>, vector<16x8xf32> -> vector<16x8xf32>
    %c0_158 = arith.constant 0 : index
    %c3_159 = arith.constant 3 : index
    %c0_160 = arith.constant 0 : index
    %c0_161 = arith.constant 0 : index
    %185 = vector.load %arg14[%c0_158, %c3_159, %c0_160, %c0_161] : memref<3x4x8x32xf32, #tpu.memory_space<vmem>>, vector<1x1x8x32xf32>
    %186 = vector.shape_cast %185 : vector<1x1x8x32xf32> to vector<8x32xf32>
    %cst_162 = arith.constant dense<0.000000e+00> : vector<16x32xf32>
    %187 = tpu.matmul %184, %186, %cst_162 {dimension_numbers = #tpu.dot_dimension_numbers<[1], [0], [0], [1], [0, 0, 1, 1], [], []>} : vector<16x8xf32>, vector<8x32xf32>, vector<16x32xf32> -> vector<16x32xf32>
    %188 = arith.addf %148, %187 : vector<16x32xf32>
    %c0_163 = arith.constant 0 : index
    %c0_164 = arith.constant 0 : index
    %c0_165 = arith.constant 0 : index
    %189 = vector.load %arg15[%c0_163, %c0_164, %c0_165] : memref<3x1x32xf32, #tpu.memory_space<vmem>>, vector<1x1x32xf32>
    %190 = vector.shape_cast %189 : vector<1x1x32xf32> to vector<1x32xf32>
    %191 = vector.broadcast %190 : vector<1x32xf32> to vector<16x32xf32>
    %192 = arith.addf %188, %191 : vector<16x32xf32>
    %193 = arith.addf %26, %192 : vector<16x32xf32>
    %c0_166 = arith.constant 0 : index
    %c0_167 = arith.constant 0 : index
    %c0_168 = arith.constant 0 : index
    %194 = vector.load %arg20[%c0_166, %c0_167, %c0_168] : memref<3x1x32xf32, #tpu.memory_space<vmem>>, vector<1x1x32xf32>
    %195 = vector.shape_cast %194 : vector<1x1x32xf32> to vector<1x32xf32>
    %c0_169 = arith.constant 0 : index
    %c0_170 = arith.constant 0 : index
    %c0_171 = arith.constant 0 : index
    %196 = vector.load %arg21[%c0_169, %c0_170, %c0_171] : memref<3x1x32xf32, #tpu.memory_space<vmem>>, vector<1x1x32xf32>
    %197 = vector.shape_cast %196 : vector<1x1x32xf32> to vector<1x32xf32>
    %cst_172 = arith.constant dense<0.000000e+00> : vector<16xf32>
    %198 = vector.multi_reduction <add>, %193, %cst_172 [1] : vector<16x32xf32> to vector<16xf32>
    %199 = vector.shape_cast %198 : vector<16xf32> to vector<16x1xf32>
    %cst_173 = arith.constant 3.200000e+01 : f32
    %200 = vector.broadcast %cst_173 : f32 to vector<16x1xf32>
    %201 = arith.divf %199, %200 : vector<16x1xf32>
    %202 = arith.mulf %193, %193 : vector<16x32xf32>
    %cst_174 = arith.constant dense<0.000000e+00> : vector<16xf32>
    %203 = vector.multi_reduction <add>, %202, %cst_174 [1] : vector<16x32xf32> to vector<16xf32>
    %204 = vector.shape_cast %203 : vector<16xf32> to vector<16x1xf32>
    %cst_175 = arith.constant 3.200000e+01 : f32
    %205 = vector.broadcast %cst_175 : f32 to vector<16x1xf32>
    %206 = arith.divf %204, %205 : vector<16x1xf32>
    %207 = arith.mulf %201, %201 : vector<16x1xf32>
    %208 = arith.subf %206, %207 : vector<16x1xf32>
    %209 = vector.broadcast %201 : vector<16x1xf32> to vector<16x32xf32>
    %210 = arith.subf %193, %209 : vector<16x32xf32>
    %cst_176 = arith.constant 9.99999974E-6 : f32
    %211 = vector.broadcast %cst_176 : f32 to vector<16x1xf32>
    %212 = arith.addf %208, %211 : vector<16x1xf32>
    %213 = math.rsqrt %212 : vector<16x1xf32>
    %214 = vector.broadcast %213 : vector<16x1xf32> to vector<16x32xf32>
    %215 = arith.mulf %210, %214 : vector<16x32xf32>
    %216 = vector.broadcast %195 : vector<1x32xf32> to vector<16x32xf32>
    %217 = arith.mulf %215, %216 : vector<16x32xf32>
    %218 = vector.broadcast %197 : vector<1x32xf32> to vector<16x32xf32>
    %219 = arith.addf %217, %218 : vector<16x32xf32>
    %c0_177 = arith.constant 0 : index
    %c0_178 = arith.constant 0 : index
    %c0_179 = arith.constant 0 : index
    %220 = vector.load %arg16[%c0_177, %c0_178, %c0_179] : memref<3x32x32xf32, #tpu.memory_space<vmem>>, vector<1x32x32xf32>
    %221 = vector.shape_cast %220 : vector<1x32x32xf32> to vector<32x32xf32>
    %cst_180 = arith.constant dense<0.000000e+00> : vector<16x32xf32>
    %222 = tpu.matmul %219, %221, %cst_180 {dimension_numbers = #tpu.dot_dimension_numbers<[1], [0], [0], [1], [0, 0, 1, 1], [], []>} : vector<16x32xf32>, vector<32x32xf32>, vector<16x32xf32> -> vector<16x32xf32>
    %c0_181 = arith.constant 0 : index
    %c0_182 = arith.constant 0 : index
    %c0_183 = arith.constant 0 : index
    %223 = vector.load %arg17[%c0_181, %c0_182, %c0_183] : memref<3x1x32xf32, #tpu.memory_space<vmem>>, vector<1x1x32xf32>
    %224 = vector.shape_cast %223 : vector<1x1x32xf32> to vector<1x32xf32>
    %225 = vector.broadcast %224 : vector<1x32xf32> to vector<16x32xf32>
    %226 = arith.addf %222, %225 : vector<16x32xf32>
    %227 = arith.mulf %226, %226 : vector<16x32xf32>
    %228 = arith.mulf %226, %227 : vector<16x32xf32>
    %cst_184 = arith.constant 4.471500e-02 : f32
    %229 = vector.broadcast %cst_184 : f32 to vector<16x32xf32>
    %230 = arith.mulf %229, %228 : vector<16x32xf32>
    %231 = arith.addf %226, %230 : vector<16x32xf32>
    %cst_185 = arith.constant 0.797884583 : f32
    %232 = vector.broadcast %cst_185 : f32 to vector<16x32xf32>
    %233 = arith.mulf %232, %231 : vector<16x32xf32>
    %234 = math.tanh %233 : vector<16x32xf32>
    %cst_186 = arith.constant 1.000000e+00 : f32
    %235 = vector.broadcast %cst_186 : f32 to vector<16x32xf32>
    %236 = arith.addf %235, %234 : vector<16x32xf32>
    %cst_187 = arith.constant 5.000000e-01 : f32
    %237 = vector.broadcast %cst_187 : f32 to vector<16x32xf32>
    %238 = arith.mulf %237, %236 : vector<16x32xf32>
    %239 = arith.mulf %226, %238 : vector<16x32xf32>
    %c0_188 = arith.constant 0 : index
    %c0_189 = arith.constant 0 : index
    %c0_190 = arith.constant 0 : index
    %240 = vector.load %arg18[%c0_188, %c0_189, %c0_190] : memref<3x32x32xf32, #tpu.memory_space<vmem>>, vector<1x32x32xf32>
    %241 = vector.shape_cast %240 : vector<1x32x32xf32> to vector<32x32xf32>
    %cst_191 = arith.constant dense<0.000000e+00> : vector<16x32xf32>
    %242 = tpu.matmul %239, %241, %cst_191 {dimension_numbers = #tpu.dot_dimension_numbers<[1], [0], [0], [1], [0, 0, 1, 1], [], []>} : vector<16x32xf32>, vector<32x32xf32>, vector<16x32xf32> -> vector<16x32xf32>
    %c0_192 = arith.constant 0 : index
    %c0_193 = arith.constant 0 : index
    %c0_194 = arith.constant 0 : index
    %243 = vector.load %arg19[%c0_192, %c0_193, %c0_194] : memref<3x1x32xf32, #tpu.memory_space<vmem>>, vector<1x1x32xf32>
    %244 = vector.shape_cast %243 : vector<1x1x32xf32> to vector<1x32xf32>
    %245 = vector.broadcast %244 : vector<1x32xf32> to vector<16x32xf32>
    %246 = arith.addf %242, %245 : vector<16x32xf32>
    %247 = arith.addf %219, %246 : vector<16x32xf32>
    %c0_195 = arith.constant 0 : index
    %c0_196 = arith.constant 0 : index
    %c0_197 = arith.constant 0 : index
    %248 = vector.load %arg22[%c0_195, %c0_196, %c0_197] : memref<3x1x32xf32, #tpu.memory_space<vmem>>, vector<1x1x32xf32>
    %249 = vector.shape_cast %248 : vector<1x1x32xf32> to vector<1x32xf32>
    %c0_198 = arith.constant 0 : index
    %c0_199 = arith.constant 0 : index
    %c0_200 = arith.constant 0 : index
    %250 = vector.load %arg23[%c0_198, %c0_199, %c0_200] : memref<3x1x32xf32, #tpu.memory_space<vmem>>, vector<1x1x32xf32>
    %251 = vector.shape_cast %250 : vector<1x1x32xf32> to vector<1x32xf32>
    %cst_201 = arith.constant dense<0.000000e+00> : vector<16xf32>
    %252 = vector.multi_reduction <add>, %247, %cst_201 [1] : vector<16x32xf32> to vector<16xf32>
    %253 = vector.shape_cast %252 : vector<16xf32> to vector<16x1xf32>
    %cst_202 = arith.constant 3.200000e+01 : f32
    %254 = vector.broadcast %cst_202 : f32 to vector<16x1xf32>
    %255 = arith.divf %253, %254 : vector<16x1xf32>
    %256 = arith.mulf %247, %247 : vector<16x32xf32>
    %cst_203 = arith.constant dense<0.000000e+00> : vector<16xf32>
    %257 = vector.multi_reduction <add>, %256, %cst_203 [1] : vector<16x32xf32> to vector<16xf32>
    %258 = vector.shape_cast %257 : vector<16xf32> to vector<16x1xf32>
    %cst_204 = arith.constant 3.200000e+01 : f32
    %259 = vector.broadcast %cst_204 : f32 to vector<16x1xf32>
    %260 = arith.divf %258, %259 : vector<16x1xf32>
    %261 = arith.mulf %255, %255 : vector<16x1xf32>
    %262 = arith.subf %260, %261 : vector<16x1xf32>
    %263 = vector.broadcast %255 : vector<16x1xf32> to vector<16x32xf32>
    %264 = arith.subf %247, %263 : vector<16x32xf32>
    %cst_205 = arith.constant 9.99999974E-6 : f32
    %265 = vector.broadcast %cst_205 : f32 to vector<16x1xf32>
    %266 = arith.addf %262, %265 : vector<16x1xf32>
    %267 = math.rsqrt %266 : vector<16x1xf32>
    %268 = vector.broadcast %267 : vector<16x1xf32> to vector<16x32xf32>
    %269 = arith.mulf %264, %268 : vector<16x32xf32>
    %270 = vector.broadcast %249 : vector<1x32xf32> to vector<16x32xf32>
    %271 = arith.mulf %269, %270 : vector<16x32xf32>
    %272 = vector.broadcast %251 : vector<1x32xf32> to vector<16x32xf32>
    %273 = arith.addf %271, %272 : vector<16x32xf32>
    %274 = vector.shape_cast %273 : vector<16x32xf32> to vector<2x8x32xf32>
    %c0_206 = arith.constant 0 : index
    %c0_207 = arith.constant 0 : index
    %c0_208 = arith.constant 0 : index
    %c0_209 = arith.constant 0 : index
    %275 = vector.load %arg24[%c0_206, %c0_207, %c0_208, %c0_209] : memref<2x3x32x32xf32, #tpu.memory_space<vmem>>, vector<1x1x32x32xf32>
    %276 = vector.shape_cast %275 : vector<1x1x32x32xf32> to vector<32x32xf32>
    %c0_210 = arith.constant 0 : index
    %c1_211 = arith.constant 1 : index
    %c0_212 = arith.constant 0 : index
    %c0_213 = arith.constant 0 : index
    %277 = vector.load %arg24[%c0_210, %c1_211, %c0_212, %c0_213] : memref<2x3x32x32xf32, #tpu.memory_space<vmem>>, vector<1x1x32x32xf32>
    %278 = vector.shape_cast %277 : vector<1x1x32x32xf32> to vector<32x32xf32>
    %c0_214 = arith.constant 0 : index
    %c2_215 = arith.constant 2 : index
    %c0_216 = arith.constant 0 : index
    %c0_217 = arith.constant 0 : index
    %279 = vector.load %arg24[%c0_214, %c2_215, %c0_216, %c0_217] : memref<2x3x32x32xf32, #tpu.memory_space<vmem>>, vector<1x1x32x32xf32>
    %280 = vector.shape_cast %279 : vector<1x1x32x32xf32> to vector<32x32xf32>
    %c0_218 = arith.constant 0 : index
    %c0_219 = arith.constant 0 : index
    %c0_220 = arith.constant 0 : index
    %281 = vector.load %arg25[%c0_218, %c0_219, %c0_220] : memref<2x1x32xf32, #tpu.memory_space<vmem>>, vector<1x1x32xf32>
    %282 = vector.shape_cast %281 : vector<1x1x32xf32> to vector<1x32xf32>
    %283 = vector.extract_strided_slice %274 {offsets = [0, 7, 0], sizes = [2, 1, 32], strides = [1, 1, 1]} : vector<2x8x32xf32> to vector<2x1x32xf32>
    %284 = vector.extract_strided_slice %274 {offsets = [0, 0, 0], sizes = [2, 7, 32], strides = [1, 1, 1]} : vector<2x8x32xf32> to vector<2x7x32xf32>
    %285 = tpu.concatenate %283, %284 in 1 : vector<2x1x32xf32>, vector<2x7x32xf32> -> vector<2x8x32xf32>
    %286 = vector.extract_strided_slice %274 {offsets = [0, 1, 0], sizes = [2, 7, 32], strides = [1, 1, 1]} : vector<2x8x32xf32> to vector<2x7x32xf32>
    %287 = vector.extract_strided_slice %274 {offsets = [0, 0, 0], sizes = [2, 1, 32], strides = [1, 1, 1]} : vector<2x8x32xf32> to vector<2x1x32xf32>
    %288 = tpu.concatenate %286, %287 in 1 : vector<2x7x32xf32>, vector<2x1x32xf32> -> vector<2x8x32xf32>
    %289 = vector.shape_cast %285 : vector<2x8x32xf32> to vector<16x32xf32>
    %cst_221 = arith.constant dense<0.000000e+00> : vector<16x32xf32>
    %290 = tpu.matmul %289, %276, %cst_221 {dimension_numbers = #tpu.dot_dimension_numbers<[1], [0], [0], [1], [0, 0, 1, 1], [], []>} : vector<16x32xf32>, vector<32x32xf32>, vector<16x32xf32> -> vector<16x32xf32>
    %291 = vector.shape_cast %274 : vector<2x8x32xf32> to vector<16x32xf32>
    %cst_222 = arith.constant dense<0.000000e+00> : vector<16x32xf32>
    %292 = tpu.matmul %291, %278, %cst_222 {dimension_numbers = #tpu.dot_dimension_numbers<[1], [0], [0], [1], [0, 0, 1, 1], [], []>} : vector<16x32xf32>, vector<32x32xf32>, vector<16x32xf32> -> vector<16x32xf32>
    %293 = arith.addf %290, %292 : vector<16x32xf32>
    %294 = vector.shape_cast %288 : vector<2x8x32xf32> to vector<16x32xf32>
    %cst_223 = arith.constant dense<0.000000e+00> : vector<16x32xf32>
    %295 = tpu.matmul %294, %280, %cst_223 {dimension_numbers = #tpu.dot_dimension_numbers<[1], [0], [0], [1], [0, 0, 1, 1], [], []>} : vector<16x32xf32>, vector<32x32xf32>, vector<16x32xf32> -> vector<16x32xf32>
    %296 = arith.addf %293, %295 : vector<16x32xf32>
    %297 = vector.broadcast %282 : vector<1x32xf32> to vector<16x32xf32>
    %298 = arith.addf %296, %297 : vector<16x32xf32>
    %cst_224 = arith.constant 0.999994993 : f32
    %299 = vector.broadcast %cst_224 : f32 to vector<16x32xf32>
    %300 = arith.mulf %298, %299 : vector<16x32xf32>
    %cst_225 = arith.constant 0.000000e+00 : f32
    %301 = vector.broadcast %cst_225 : f32 to vector<16x32xf32>
    %302 = arith.cmpf ogt, %300, %301 : vector<16x32xf32>
    %cst_226 = arith.constant 0.000000e+00 : f32
    %303 = vector.broadcast %cst_226 : f32 to vector<16x32xf32>
    %304 = arith.minimumf %300, %303 : vector<16x32xf32>
    %305 = math.exp %304 : vector<16x32xf32>
    %cst_227 = arith.constant 1.000000e+00 : f32
    %306 = vector.broadcast %cst_227 : f32 to vector<16x32xf32>
    %307 = arith.subf %305, %306 : vector<16x32xf32>
    %308 = arith.select %302, %300, %307 : vector<16x32xi1>, vector<16x32xf32>
    %309 = vector.shape_cast %308 : vector<16x32xf32> to vector<2x8x32xf32>
    %cst_228 = arith.constant -1.000000e+30 : f32
    %310 = vector.broadcast %cst_228 : f32 to vector<2x1x32xf32>
    %311 = tpu.concatenate %310, %309, %310 in 1 : vector<2x1x32xf32>, vector<2x8x32xf32>, vector<2x1x32xf32> -> vector<2x10x32xf32>
    %312 = vector.extract_strided_slice %311 {offsets = [0, 0, 0], sizes = [2, 8, 32], strides = [1, 1, 1]} : vector<2x10x32xf32> to vector<2x8x32xf32>
    %313 = vector.extract_strided_slice %311 {offsets = [0, 1, 0], sizes = [2, 8, 32], strides = [1, 1, 1]} : vector<2x10x32xf32> to vector<2x8x32xf32>
    %314 = arith.maximumf %312, %313 : vector<2x8x32xf32>
    %315 = vector.extract_strided_slice %311 {offsets = [0, 2, 0], sizes = [2, 8, 32], strides = [1, 1, 1]} : vector<2x10x32xf32> to vector<2x8x32xf32>
    %316 = arith.maximumf %314, %315 : vector<2x8x32xf32>
    %317 = vector.extract_strided_slice %316 {offsets = [0, 0, 0], sizes = [2, 1, 32], strides = [1, 1, 1]} : vector<2x8x32xf32> to vector<2x1x32xf32>
    %318 = vector.extract_strided_slice %316 {offsets = [0, 2, 0], sizes = [2, 1, 32], strides = [1, 1, 1]} : vector<2x8x32xf32> to vector<2x1x32xf32>
    %319 = vector.extract_strided_slice %316 {offsets = [0, 4, 0], sizes = [2, 1, 32], strides = [1, 1, 1]} : vector<2x8x32xf32> to vector<2x1x32xf32>
    %320 = vector.extract_strided_slice %316 {offsets = [0, 6, 0], sizes = [2, 1, 32], strides = [1, 1, 1]} : vector<2x8x32xf32> to vector<2x1x32xf32>
    %321 = tpu.concatenate %317, %318, %319, %320 in 1 : vector<2x1x32xf32>, vector<2x1x32xf32>, vector<2x1x32xf32>, vector<2x1x32xf32> -> vector<2x4x32xf32>
    %322 = vector.shape_cast %321 : vector<2x4x32xf32> to vector<8x32xf32>
    %c0_229 = arith.constant 0 : index
    %c0_230 = arith.constant 0 : index
    %323 = vector.load %arg4[%c0_229, %c0_230] : memref<8x8xf32, #tpu.memory_space<vmem>>, vector<8x8xf32>
    %cst_231 = arith.constant 0.000000e+00 : f32
    %324 = vector.broadcast %cst_231 : f32 to vector<8x32xf32>
    %c1_232 = arith.constant 1 : index
    %c0_233 = arith.constant 0 : index
    %c0_234 = arith.constant 0 : index
    %c0_235 = arith.constant 0 : index
    %325 = vector.load %arg8[%c1_232, %c0_233, %c0_234, %c0_235] : memref<3x4x32x8xf32, #tpu.memory_space<vmem>>, vector<1x1x32x8xf32>
    %326 = vector.shape_cast %325 : vector<1x1x32x8xf32> to vector<32x8xf32>
    %cst_236 = arith.constant dense<0.000000e+00> : vector<8x8xf32>
    %327 = tpu.matmul %322, %326, %cst_236 {dimension_numbers = #tpu.dot_dimension_numbers<[1], [0], [0], [1], [0, 0, 1, 1], [], []>} : vector<8x32xf32>, vector<32x8xf32>, vector<8x8xf32> -> vector<8x8xf32>
    %c1_237 = arith.constant 1 : index
    %c0_238 = arith.constant 0 : index
    %c0_239 = arith.constant 0 : index
    %c0_240 = arith.constant 0 : index
    %328 = vector.load %arg9[%c1_237, %c0_238, %c0_239, %c0_240] : memref<3x4x1x8xf32, #tpu.memory_space<vmem>>, vector<1x1x1x8xf32>
    %329 = vector.shape_cast %328 : vector<1x1x1x8xf32> to vector<1x8xf32>
    %330 = vector.broadcast %329 : vector<1x8xf32> to vector<8x8xf32>
    %331 = arith.addf %327, %330 : vector<8x8xf32>
    %cst_241 = arith.constant 0.353553385 : f32
    %332 = vector.broadcast %cst_241 : f32 to vector<8x8xf32>
    %333 = arith.mulf %331, %332 : vector<8x8xf32>
    %c1_242 = arith.constant 1 : index
    %c0_243 = arith.constant 0 : index
    %c0_244 = arith.constant 0 : index
    %c0_245 = arith.constant 0 : index
    %334 = vector.load %arg10[%c1_242, %c0_243, %c0_244, %c0_245] : memref<3x4x32x8xf32, #tpu.memory_space<vmem>>, vector<1x1x32x8xf32>
    %335 = vector.shape_cast %334 : vector<1x1x32x8xf32> to vector<32x8xf32>
    %cst_246 = arith.constant dense<0.000000e+00> : vector<8x8xf32>
    %336 = tpu.matmul %322, %335, %cst_246 {dimension_numbers = #tpu.dot_dimension_numbers<[1], [0], [0], [1], [0, 0, 1, 1], [], []>} : vector<8x32xf32>, vector<32x8xf32>, vector<8x8xf32> -> vector<8x8xf32>
    %c1_247 = arith.constant 1 : index
    %c0_248 = arith.constant 0 : index
    %c0_249 = arith.constant 0 : index
    %c0_250 = arith.constant 0 : index
    %337 = vector.load %arg11[%c1_247, %c0_248, %c0_249, %c0_250] : memref<3x4x1x8xf32, #tpu.memory_space<vmem>>, vector<1x1x1x8xf32>
    %338 = vector.shape_cast %337 : vector<1x1x1x8xf32> to vector<1x8xf32>
    %339 = vector.broadcast %338 : vector<1x8xf32> to vector<8x8xf32>
    %340 = arith.addf %336, %339 : vector<8x8xf32>
    %c1_251 = arith.constant 1 : index
    %c0_252 = arith.constant 0 : index
    %c0_253 = arith.constant 0 : index
    %c0_254 = arith.constant 0 : index
    %341 = vector.load %arg12[%c1_251, %c0_252, %c0_253, %c0_254] : memref<3x4x32x8xf32, #tpu.memory_space<vmem>>, vector<1x1x32x8xf32>
    %342 = vector.shape_cast %341 : vector<1x1x32x8xf32> to vector<32x8xf32>
    %cst_255 = arith.constant dense<0.000000e+00> : vector<8x8xf32>
    %343 = tpu.matmul %322, %342, %cst_255 {dimension_numbers = #tpu.dot_dimension_numbers<[1], [0], [0], [1], [0, 0, 1, 1], [], []>} : vector<8x32xf32>, vector<32x8xf32>, vector<8x8xf32> -> vector<8x8xf32>
    %c1_256 = arith.constant 1 : index
    %c0_257 = arith.constant 0 : index
    %c0_258 = arith.constant 0 : index
    %c0_259 = arith.constant 0 : index
    %344 = vector.load %arg13[%c1_256, %c0_257, %c0_258, %c0_259] : memref<3x4x1x8xf32, #tpu.memory_space<vmem>>, vector<1x1x1x8xf32>
    %345 = vector.shape_cast %344 : vector<1x1x1x8xf32> to vector<1x8xf32>
    %346 = vector.broadcast %345 : vector<1x8xf32> to vector<8x8xf32>
    %347 = arith.addf %343, %346 : vector<8x8xf32>
    "tpu.trace_start"() <{level = 10 : i32, message = "nd,md->nm"}> : () -> ()
    %cst_260 = arith.constant dense<0.000000e+00> : vector<8x8xf32>
    %348 = tpu.matmul %333, %340, %cst_260 {dimension_numbers = #tpu.dot_dimension_numbers<[1], [1], [0], [0], [0, 0, 1, 0], [], []>} : vector<8x8xf32>, vector<8x8xf32>, vector<8x8xf32> -> vector<8x8xf32>
    "tpu.trace_stop"() : () -> ()
    %349 = arith.addf %348, %323 : vector<8x8xf32>
    %cst_261 = arith.constant dense<0xFF800000> : vector<8xf32>
    %350 = vector.multi_reduction <maximumf>, %349, %cst_261 [1] : vector<8x8xf32> to vector<8xf32>
    %351 = vector.shape_cast %350 : vector<8xf32> to vector<8x1xf32>
    %352 = vector.broadcast %351 : vector<8x1xf32> to vector<8x8xf32>
    %353 = arith.subf %349, %352 : vector<8x8xf32>
    %354 = math.exp %353 : vector<8x8xf32>
    %cst_262 = arith.constant dense<0.000000e+00> : vector<8xf32>
    %355 = vector.multi_reduction <add>, %354, %cst_262 [1] : vector<8x8xf32> to vector<8xf32>
    %356 = vector.shape_cast %355 : vector<8xf32> to vector<8x1xf32>
    %357 = tpu.reciprocal %356 {approx = true} : vector<8x1xf32> -> vector<8x1xf32>
    %358 = vector.broadcast %357 : vector<8x1xf32> to vector<8x8xf32>
    %359 = arith.mulf %354, %358 : vector<8x8xf32>
    %cst_263 = arith.constant dense<0.000000e+00> : vector<8x8xf32>
    %360 = tpu.matmul %359, %347, %cst_263 {dimension_numbers = #tpu.dot_dimension_numbers<[1], [0], [0], [1], [0, 0, 1, 1], [], []>} : vector<8x8xf32>, vector<8x8xf32>, vector<8x8xf32> -> vector<8x8xf32>
    %c1_264 = arith.constant 1 : index
    %c0_265 = arith.constant 0 : index
    %c0_266 = arith.constant 0 : index
    %c0_267 = arith.constant 0 : index
    %361 = vector.load %arg14[%c1_264, %c0_265, %c0_266, %c0_267] : memref<3x4x8x32xf32, #tpu.memory_space<vmem>>, vector<1x1x8x32xf32>
    %362 = vector.shape_cast %361 : vector<1x1x8x32xf32> to vector<8x32xf32>
    %cst_268 = arith.constant dense<0.000000e+00> : vector<8x32xf32>
    %363 = tpu.matmul %360, %362, %cst_268 {dimension_numbers = #tpu.dot_dimension_numbers<[1], [0], [0], [1], [0, 0, 1, 1], [], []>} : vector<8x8xf32>, vector<8x32xf32>, vector<8x32xf32> -> vector<8x32xf32>
    %364 = arith.addf %324, %363 : vector<8x32xf32>
    %c1_269 = arith.constant 1 : index
    %c1_270 = arith.constant 1 : index
    %c0_271 = arith.constant 0 : index
    %c0_272 = arith.constant 0 : index
    %365 = vector.load %arg8[%c1_269, %c1_270, %c0_271, %c0_272] : memref<3x4x32x8xf32, #tpu.memory_space<vmem>>, vector<1x1x32x8xf32>
    %366 = vector.shape_cast %365 : vector<1x1x32x8xf32> to vector<32x8xf32>
    %cst_273 = arith.constant dense<0.000000e+00> : vector<8x8xf32>
    %367 = tpu.matmul %322, %366, %cst_273 {dimension_numbers = #tpu.dot_dimension_numbers<[1], [0], [0], [1], [0, 0, 1, 1], [], []>} : vector<8x32xf32>, vector<32x8xf32>, vector<8x8xf32> -> vector<8x8xf32>
    %c1_274 = arith.constant 1 : index
    %c1_275 = arith.constant 1 : index
    %c0_276 = arith.constant 0 : index
    %c0_277 = arith.constant 0 : index
    %368 = vector.load %arg9[%c1_274, %c1_275, %c0_276, %c0_277] : memref<3x4x1x8xf32, #tpu.memory_space<vmem>>, vector<1x1x1x8xf32>
    %369 = vector.shape_cast %368 : vector<1x1x1x8xf32> to vector<1x8xf32>
    %370 = vector.broadcast %369 : vector<1x8xf32> to vector<8x8xf32>
    %371 = arith.addf %367, %370 : vector<8x8xf32>
    %cst_278 = arith.constant 0.353553385 : f32
    %372 = vector.broadcast %cst_278 : f32 to vector<8x8xf32>
    %373 = arith.mulf %371, %372 : vector<8x8xf32>
    %c1_279 = arith.constant 1 : index
    %c1_280 = arith.constant 1 : index
    %c0_281 = arith.constant 0 : index
    %c0_282 = arith.constant 0 : index
    %374 = vector.load %arg10[%c1_279, %c1_280, %c0_281, %c0_282] : memref<3x4x32x8xf32, #tpu.memory_space<vmem>>, vector<1x1x32x8xf32>
    %375 = vector.shape_cast %374 : vector<1x1x32x8xf32> to vector<32x8xf32>
    %cst_283 = arith.constant dense<0.000000e+00> : vector<8x8xf32>
    %376 = tpu.matmul %322, %375, %cst_283 {dimension_numbers = #tpu.dot_dimension_numbers<[1], [0], [0], [1], [0, 0, 1, 1], [], []>} : vector<8x32xf32>, vector<32x8xf32>, vector<8x8xf32> -> vector<8x8xf32>
    %c1_284 = arith.constant 1 : index
    %c1_285 = arith.constant 1 : index
    %c0_286 = arith.constant 0 : index
    %c0_287 = arith.constant 0 : index
    %377 = vector.load %arg11[%c1_284, %c1_285, %c0_286, %c0_287] : memref<3x4x1x8xf32, #tpu.memory_space<vmem>>, vector<1x1x1x8xf32>
    %378 = vector.shape_cast %377 : vector<1x1x1x8xf32> to vector<1x8xf32>
    %379 = vector.broadcast %378 : vector<1x8xf32> to vector<8x8xf32>
    %380 = arith.addf %376, %379 : vector<8x8xf32>
    %c1_288 = arith.constant 1 : index
    %c1_289 = arith.constant 1 : index
    %c0_290 = arith.constant 0 : index
    %c0_291 = arith.constant 0 : index
    %381 = vector.load %arg12[%c1_288, %c1_289, %c0_290, %c0_291] : memref<3x4x32x8xf32, #tpu.memory_space<vmem>>, vector<1x1x32x8xf32>
    %382 = vector.shape_cast %381 : vector<1x1x32x8xf32> to vector<32x8xf32>
    %cst_292 = arith.constant dense<0.000000e+00> : vector<8x8xf32>
    %383 = tpu.matmul %322, %382, %cst_292 {dimension_numbers = #tpu.dot_dimension_numbers<[1], [0], [0], [1], [0, 0, 1, 1], [], []>} : vector<8x32xf32>, vector<32x8xf32>, vector<8x8xf32> -> vector<8x8xf32>
    %c1_293 = arith.constant 1 : index
    %c1_294 = arith.constant 1 : index
    %c0_295 = arith.constant 0 : index
    %c0_296 = arith.constant 0 : index
    %384 = vector.load %arg13[%c1_293, %c1_294, %c0_295, %c0_296] : memref<3x4x1x8xf32, #tpu.memory_space<vmem>>, vector<1x1x1x8xf32>
    %385 = vector.shape_cast %384 : vector<1x1x1x8xf32> to vector<1x8xf32>
    %386 = vector.broadcast %385 : vector<1x8xf32> to vector<8x8xf32>
    %387 = arith.addf %383, %386 : vector<8x8xf32>
    "tpu.trace_start"() <{level = 10 : i32, message = "nd,md->nm"}> : () -> ()
    %cst_297 = arith.constant dense<0.000000e+00> : vector<8x8xf32>
    %388 = tpu.matmul %373, %380, %cst_297 {dimension_numbers = #tpu.dot_dimension_numbers<[1], [1], [0], [0], [0, 0, 1, 0], [], []>} : vector<8x8xf32>, vector<8x8xf32>, vector<8x8xf32> -> vector<8x8xf32>
    "tpu.trace_stop"() : () -> ()
    %389 = arith.addf %388, %323 : vector<8x8xf32>
    %cst_298 = arith.constant dense<0xFF800000> : vector<8xf32>
    %390 = vector.multi_reduction <maximumf>, %389, %cst_298 [1] : vector<8x8xf32> to vector<8xf32>
    %391 = vector.shape_cast %390 : vector<8xf32> to vector<8x1xf32>
    %392 = vector.broadcast %391 : vector<8x1xf32> to vector<8x8xf32>
    %393 = arith.subf %389, %392 : vector<8x8xf32>
    %394 = math.exp %393 : vector<8x8xf32>
    %cst_299 = arith.constant dense<0.000000e+00> : vector<8xf32>
    %395 = vector.multi_reduction <add>, %394, %cst_299 [1] : vector<8x8xf32> to vector<8xf32>
    %396 = vector.shape_cast %395 : vector<8xf32> to vector<8x1xf32>
    %397 = tpu.reciprocal %396 {approx = true} : vector<8x1xf32> -> vector<8x1xf32>
    %398 = vector.broadcast %397 : vector<8x1xf32> to vector<8x8xf32>
    %399 = arith.mulf %394, %398 : vector<8x8xf32>
    %cst_300 = arith.constant dense<0.000000e+00> : vector<8x8xf32>
    %400 = tpu.matmul %399, %387, %cst_300 {dimension_numbers = #tpu.dot_dimension_numbers<[1], [0], [0], [1], [0, 0, 1, 1], [], []>} : vector<8x8xf32>, vector<8x8xf32>, vector<8x8xf32> -> vector<8x8xf32>
    %c1_301 = arith.constant 1 : index
    %c1_302 = arith.constant 1 : index
    %c0_303 = arith.constant 0 : index
    %c0_304 = arith.constant 0 : index
    %401 = vector.load %arg14[%c1_301, %c1_302, %c0_303, %c0_304] : memref<3x4x8x32xf32, #tpu.memory_space<vmem>>, vector<1x1x8x32xf32>
    %402 = vector.shape_cast %401 : vector<1x1x8x32xf32> to vector<8x32xf32>
    %cst_305 = arith.constant dense<0.000000e+00> : vector<8x32xf32>
    %403 = tpu.matmul %400, %402, %cst_305 {dimension_numbers = #tpu.dot_dimension_numbers<[1], [0], [0], [1], [0, 0, 1, 1], [], []>} : vector<8x8xf32>, vector<8x32xf32>, vector<8x32xf32> -> vector<8x32xf32>
    %404 = arith.addf %364, %403 : vector<8x32xf32>
    %c1_306 = arith.constant 1 : index
    %c2_307 = arith.constant 2 : index
    %c0_308 = arith.constant 0 : index
    %c0_309 = arith.constant 0 : index
    %405 = vector.load %arg8[%c1_306, %c2_307, %c0_308, %c0_309] : memref<3x4x32x8xf32, #tpu.memory_space<vmem>>, vector<1x1x32x8xf32>
    %406 = vector.shape_cast %405 : vector<1x1x32x8xf32> to vector<32x8xf32>
    %cst_310 = arith.constant dense<0.000000e+00> : vector<8x8xf32>
    %407 = tpu.matmul %322, %406, %cst_310 {dimension_numbers = #tpu.dot_dimension_numbers<[1], [0], [0], [1], [0, 0, 1, 1], [], []>} : vector<8x32xf32>, vector<32x8xf32>, vector<8x8xf32> -> vector<8x8xf32>
    %c1_311 = arith.constant 1 : index
    %c2_312 = arith.constant 2 : index
    %c0_313 = arith.constant 0 : index
    %c0_314 = arith.constant 0 : index
    %408 = vector.load %arg9[%c1_311, %c2_312, %c0_313, %c0_314] : memref<3x4x1x8xf32, #tpu.memory_space<vmem>>, vector<1x1x1x8xf32>
    %409 = vector.shape_cast %408 : vector<1x1x1x8xf32> to vector<1x8xf32>
    %410 = vector.broadcast %409 : vector<1x8xf32> to vector<8x8xf32>
    %411 = arith.addf %407, %410 : vector<8x8xf32>
    %cst_315 = arith.constant 0.353553385 : f32
    %412 = vector.broadcast %cst_315 : f32 to vector<8x8xf32>
    %413 = arith.mulf %411, %412 : vector<8x8xf32>
    %c1_316 = arith.constant 1 : index
    %c2_317 = arith.constant 2 : index
    %c0_318 = arith.constant 0 : index
    %c0_319 = arith.constant 0 : index
    %414 = vector.load %arg10[%c1_316, %c2_317, %c0_318, %c0_319] : memref<3x4x32x8xf32, #tpu.memory_space<vmem>>, vector<1x1x32x8xf32>
    %415 = vector.shape_cast %414 : vector<1x1x32x8xf32> to vector<32x8xf32>
    %cst_320 = arith.constant dense<0.000000e+00> : vector<8x8xf32>
    %416 = tpu.matmul %322, %415, %cst_320 {dimension_numbers = #tpu.dot_dimension_numbers<[1], [0], [0], [1], [0, 0, 1, 1], [], []>} : vector<8x32xf32>, vector<32x8xf32>, vector<8x8xf32> -> vector<8x8xf32>
    %c1_321 = arith.constant 1 : index
    %c2_322 = arith.constant 2 : index
    %c0_323 = arith.constant 0 : index
    %c0_324 = arith.constant 0 : index
    %417 = vector.load %arg11[%c1_321, %c2_322, %c0_323, %c0_324] : memref<3x4x1x8xf32, #tpu.memory_space<vmem>>, vector<1x1x1x8xf32>
    %418 = vector.shape_cast %417 : vector<1x1x1x8xf32> to vector<1x8xf32>
    %419 = vector.broadcast %418 : vector<1x8xf32> to vector<8x8xf32>
    %420 = arith.addf %416, %419 : vector<8x8xf32>
    %c1_325 = arith.constant 1 : index
    %c2_326 = arith.constant 2 : index
    %c0_327 = arith.constant 0 : index
    %c0_328 = arith.constant 0 : index
    %421 = vector.load %arg12[%c1_325, %c2_326, %c0_327, %c0_328] : memref<3x4x32x8xf32, #tpu.memory_space<vmem>>, vector<1x1x32x8xf32>
    %422 = vector.shape_cast %421 : vector<1x1x32x8xf32> to vector<32x8xf32>
    %cst_329 = arith.constant dense<0.000000e+00> : vector<8x8xf32>
    %423 = tpu.matmul %322, %422, %cst_329 {dimension_numbers = #tpu.dot_dimension_numbers<[1], [0], [0], [1], [0, 0, 1, 1], [], []>} : vector<8x32xf32>, vector<32x8xf32>, vector<8x8xf32> -> vector<8x8xf32>
    %c1_330 = arith.constant 1 : index
    %c2_331 = arith.constant 2 : index
    %c0_332 = arith.constant 0 : index
    %c0_333 = arith.constant 0 : index
    %424 = vector.load %arg13[%c1_330, %c2_331, %c0_332, %c0_333] : memref<3x4x1x8xf32, #tpu.memory_space<vmem>>, vector<1x1x1x8xf32>
    %425 = vector.shape_cast %424 : vector<1x1x1x8xf32> to vector<1x8xf32>
    %426 = vector.broadcast %425 : vector<1x8xf32> to vector<8x8xf32>
    %427 = arith.addf %423, %426 : vector<8x8xf32>
    "tpu.trace_start"() <{level = 10 : i32, message = "nd,md->nm"}> : () -> ()
    %cst_334 = arith.constant dense<0.000000e+00> : vector<8x8xf32>
    %428 = tpu.matmul %413, %420, %cst_334 {dimension_numbers = #tpu.dot_dimension_numbers<[1], [1], [0], [0], [0, 0, 1, 0], [], []>} : vector<8x8xf32>, vector<8x8xf32>, vector<8x8xf32> -> vector<8x8xf32>
    "tpu.trace_stop"() : () -> ()
    %429 = arith.addf %428, %323 : vector<8x8xf32>
    %cst_335 = arith.constant dense<0xFF800000> : vector<8xf32>
    %430 = vector.multi_reduction <maximumf>, %429, %cst_335 [1] : vector<8x8xf32> to vector<8xf32>
    %431 = vector.shape_cast %430 : vector<8xf32> to vector<8x1xf32>
    %432 = vector.broadcast %431 : vector<8x1xf32> to vector<8x8xf32>
    %433 = arith.subf %429, %432 : vector<8x8xf32>
    %434 = math.exp %433 : vector<8x8xf32>
    %cst_336 = arith.constant dense<0.000000e+00> : vector<8xf32>
    %435 = vector.multi_reduction <add>, %434, %cst_336 [1] : vector<8x8xf32> to vector<8xf32>
    %436 = vector.shape_cast %435 : vector<8xf32> to vector<8x1xf32>
    %437 = tpu.reciprocal %436 {approx = true} : vector<8x1xf32> -> vector<8x1xf32>
    %438 = vector.broadcast %437 : vector<8x1xf32> to vector<8x8xf32>
    %439 = arith.mulf %434, %438 : vector<8x8xf32>
    %cst_337 = arith.constant dense<0.000000e+00> : vector<8x8xf32>
    %440 = tpu.matmul %439, %427, %cst_337 {dimension_numbers = #tpu.dot_dimension_numbers<[1], [0], [0], [1], [0, 0, 1, 1], [], []>} : vector<8x8xf32>, vector<8x8xf32>, vector<8x8xf32> -> vector<8x8xf32>
    %c1_338 = arith.constant 1 : index
    %c2_339 = arith.constant 2 : index
    %c0_340 = arith.constant 0 : index
    %c0_341 = arith.constant 0 : index
    %441 = vector.load %arg14[%c1_338, %c2_339, %c0_340, %c0_341] : memref<3x4x8x32xf32, #tpu.memory_space<vmem>>, vector<1x1x8x32xf32>
    %442 = vector.shape_cast %441 : vector<1x1x8x32xf32> to vector<8x32xf32>
    %cst_342 = arith.constant dense<0.000000e+00> : vector<8x32xf32>
    %443 = tpu.matmul %440, %442, %cst_342 {dimension_numbers = #tpu.dot_dimension_numbers<[1], [0], [0], [1], [0, 0, 1, 1], [], []>} : vector<8x8xf32>, vector<8x32xf32>, vector<8x32xf32> -> vector<8x32xf32>
    %444 = arith.addf %404, %443 : vector<8x32xf32>
    %c1_343 = arith.constant 1 : index
    %c3_344 = arith.constant 3 : index
    %c0_345 = arith.constant 0 : index
    %c0_346 = arith.constant 0 : index
    %445 = vector.load %arg8[%c1_343, %c3_344, %c0_345, %c0_346] : memref<3x4x32x8xf32, #tpu.memory_space<vmem>>, vector<1x1x32x8xf32>
    %446 = vector.shape_cast %445 : vector<1x1x32x8xf32> to vector<32x8xf32>
    %cst_347 = arith.constant dense<0.000000e+00> : vector<8x8xf32>
    %447 = tpu.matmul %322, %446, %cst_347 {dimension_numbers = #tpu.dot_dimension_numbers<[1], [0], [0], [1], [0, 0, 1, 1], [], []>} : vector<8x32xf32>, vector<32x8xf32>, vector<8x8xf32> -> vector<8x8xf32>
    %c1_348 = arith.constant 1 : index
    %c3_349 = arith.constant 3 : index
    %c0_350 = arith.constant 0 : index
    %c0_351 = arith.constant 0 : index
    %448 = vector.load %arg9[%c1_348, %c3_349, %c0_350, %c0_351] : memref<3x4x1x8xf32, #tpu.memory_space<vmem>>, vector<1x1x1x8xf32>
    %449 = vector.shape_cast %448 : vector<1x1x1x8xf32> to vector<1x8xf32>
    %450 = vector.broadcast %449 : vector<1x8xf32> to vector<8x8xf32>
    %451 = arith.addf %447, %450 : vector<8x8xf32>
    %cst_352 = arith.constant 0.353553385 : f32
    %452 = vector.broadcast %cst_352 : f32 to vector<8x8xf32>
    %453 = arith.mulf %451, %452 : vector<8x8xf32>
    %c1_353 = arith.constant 1 : index
    %c3_354 = arith.constant 3 : index
    %c0_355 = arith.constant 0 : index
    %c0_356 = arith.constant 0 : index
    %454 = vector.load %arg10[%c1_353, %c3_354, %c0_355, %c0_356] : memref<3x4x32x8xf32, #tpu.memory_space<vmem>>, vector<1x1x32x8xf32>
    %455 = vector.shape_cast %454 : vector<1x1x32x8xf32> to vector<32x8xf32>
    %cst_357 = arith.constant dense<0.000000e+00> : vector<8x8xf32>
    %456 = tpu.matmul %322, %455, %cst_357 {dimension_numbers = #tpu.dot_dimension_numbers<[1], [0], [0], [1], [0, 0, 1, 1], [], []>} : vector<8x32xf32>, vector<32x8xf32>, vector<8x8xf32> -> vector<8x8xf32>
    %c1_358 = arith.constant 1 : index
    %c3_359 = arith.constant 3 : index
    %c0_360 = arith.constant 0 : index
    %c0_361 = arith.constant 0 : index
    %457 = vector.load %arg11[%c1_358, %c3_359, %c0_360, %c0_361] : memref<3x4x1x8xf32, #tpu.memory_space<vmem>>, vector<1x1x1x8xf32>
    %458 = vector.shape_cast %457 : vector<1x1x1x8xf32> to vector<1x8xf32>
    %459 = vector.broadcast %458 : vector<1x8xf32> to vector<8x8xf32>
    %460 = arith.addf %456, %459 : vector<8x8xf32>
    %c1_362 = arith.constant 1 : index
    %c3_363 = arith.constant 3 : index
    %c0_364 = arith.constant 0 : index
    %c0_365 = arith.constant 0 : index
    %461 = vector.load %arg12[%c1_362, %c3_363, %c0_364, %c0_365] : memref<3x4x32x8xf32, #tpu.memory_space<vmem>>, vector<1x1x32x8xf32>
    %462 = vector.shape_cast %461 : vector<1x1x32x8xf32> to vector<32x8xf32>
    %cst_366 = arith.constant dense<0.000000e+00> : vector<8x8xf32>
    %463 = tpu.matmul %322, %462, %cst_366 {dimension_numbers = #tpu.dot_dimension_numbers<[1], [0], [0], [1], [0, 0, 1, 1], [], []>} : vector<8x32xf32>, vector<32x8xf32>, vector<8x8xf32> -> vector<8x8xf32>
    %c1_367 = arith.constant 1 : index
    %c3_368 = arith.constant 3 : index
    %c0_369 = arith.constant 0 : index
    %c0_370 = arith.constant 0 : index
    %464 = vector.load %arg13[%c1_367, %c3_368, %c0_369, %c0_370] : memref<3x4x1x8xf32, #tpu.memory_space<vmem>>, vector<1x1x1x8xf32>
    %465 = vector.shape_cast %464 : vector<1x1x1x8xf32> to vector<1x8xf32>
    %466 = vector.broadcast %465 : vector<1x8xf32> to vector<8x8xf32>
    %467 = arith.addf %463, %466 : vector<8x8xf32>
    "tpu.trace_start"() <{level = 10 : i32, message = "nd,md->nm"}> : () -> ()
    %cst_371 = arith.constant dense<0.000000e+00> : vector<8x8xf32>
    %468 = tpu.matmul %453, %460, %cst_371 {dimension_numbers = #tpu.dot_dimension_numbers<[1], [1], [0], [0], [0, 0, 1, 0], [], []>} : vector<8x8xf32>, vector<8x8xf32>, vector<8x8xf32> -> vector<8x8xf32>
    "tpu.trace_stop"() : () -> ()
    %469 = arith.addf %468, %323 : vector<8x8xf32>
    %cst_372 = arith.constant dense<0xFF800000> : vector<8xf32>
    %470 = vector.multi_reduction <maximumf>, %469, %cst_372 [1] : vector<8x8xf32> to vector<8xf32>
    %471 = vector.shape_cast %470 : vector<8xf32> to vector<8x1xf32>
    %472 = vector.broadcast %471 : vector<8x1xf32> to vector<8x8xf32>
    %473 = arith.subf %469, %472 : vector<8x8xf32>
    %474 = math.exp %473 : vector<8x8xf32>
    %cst_373 = arith.constant dense<0.000000e+00> : vector<8xf32>
    %475 = vector.multi_reduction <add>, %474, %cst_373 [1] : vector<8x8xf32> to vector<8xf32>
    %476 = vector.shape_cast %475 : vector<8xf32> to vector<8x1xf32>
    %477 = tpu.reciprocal %476 {approx = true} : vector<8x1xf32> -> vector<8x1xf32>
    %478 = vector.broadcast %477 : vector<8x1xf32> to vector<8x8xf32>
    %479 = arith.mulf %474, %478 : vector<8x8xf32>
    %cst_374 = arith.constant dense<0.000000e+00> : vector<8x8xf32>
    %480 = tpu.matmul %479, %467, %cst_374 {dimension_numbers = #tpu.dot_dimension_numbers<[1], [0], [0], [1], [0, 0, 1, 1], [], []>} : vector<8x8xf32>, vector<8x8xf32>, vector<8x8xf32> -> vector<8x8xf32>
    %c1_375 = arith.constant 1 : index
    %c3_376 = arith.constant 3 : index
    %c0_377 = arith.constant 0 : index
    %c0_378 = arith.constant 0 : index
    %481 = vector.load %arg14[%c1_375, %c3_376, %c0_377, %c0_378] : memref<3x4x8x32xf32, #tpu.memory_space<vmem>>, vector<1x1x8x32xf32>
    %482 = vector.shape_cast %481 : vector<1x1x8x32xf32> to vector<8x32xf32>
    %cst_379 = arith.constant dense<0.000000e+00> : vector<8x32xf32>
    %483 = tpu.matmul %480, %482, %cst_379 {dimension_numbers = #tpu.dot_dimension_numbers<[1], [0], [0], [1], [0, 0, 1, 1], [], []>} : vector<8x8xf32>, vector<8x32xf32>, vector<8x32xf32> -> vector<8x32xf32>
    %484 = arith.addf %444, %483 : vector<8x32xf32>
    %c1_380 = arith.constant 1 : index
    %c0_381 = arith.constant 0 : index
    %c0_382 = arith.constant 0 : index
    %485 = vector.load %arg15[%c1_380, %c0_381, %c0_382] : memref<3x1x32xf32, #tpu.memory_space<vmem>>, vector<1x1x32xf32>
    %486 = vector.shape_cast %485 : vector<1x1x32xf32> to vector<1x32xf32>
    %487 = vector.broadcast %486 : vector<1x32xf32> to vector<8x32xf32>
    %488 = arith.addf %484, %487 : vector<8x32xf32>
    %489 = arith.addf %322, %488 : vector<8x32xf32>
    %c1_383 = arith.constant 1 : index
    %c0_384 = arith.constant 0 : index
    %c0_385 = arith.constant 0 : index
    %490 = vector.load %arg20[%c1_383, %c0_384, %c0_385] : memref<3x1x32xf32, #tpu.memory_space<vmem>>, vector<1x1x32xf32>
    %491 = vector.shape_cast %490 : vector<1x1x32xf32> to vector<1x32xf32>
    %c1_386 = arith.constant 1 : index
    %c0_387 = arith.constant 0 : index
    %c0_388 = arith.constant 0 : index
    %492 = vector.load %arg21[%c1_386, %c0_387, %c0_388] : memref<3x1x32xf32, #tpu.memory_space<vmem>>, vector<1x1x32xf32>
    %493 = vector.shape_cast %492 : vector<1x1x32xf32> to vector<1x32xf32>
    %cst_389 = arith.constant dense<0.000000e+00> : vector<8xf32>
    %494 = vector.multi_reduction <add>, %489, %cst_389 [1] : vector<8x32xf32> to vector<8xf32>
    %495 = vector.shape_cast %494 : vector<8xf32> to vector<8x1xf32>
    %cst_390 = arith.constant 3.200000e+01 : f32
    %496 = vector.broadcast %cst_390 : f32 to vector<8x1xf32>
    %497 = arith.divf %495, %496 : vector<8x1xf32>
    %498 = arith.mulf %489, %489 : vector<8x32xf32>
    %cst_391 = arith.constant dense<0.000000e+00> : vector<8xf32>
    %499 = vector.multi_reduction <add>, %498, %cst_391 [1] : vector<8x32xf32> to vector<8xf32>
    %500 = vector.shape_cast %499 : vector<8xf32> to vector<8x1xf32>
    %cst_392 = arith.constant 3.200000e+01 : f32
    %501 = vector.broadcast %cst_392 : f32 to vector<8x1xf32>
    %502 = arith.divf %500, %501 : vector<8x1xf32>
    %503 = arith.mulf %497, %497 : vector<8x1xf32>
    %504 = arith.subf %502, %503 : vector<8x1xf32>
    %505 = vector.broadcast %497 : vector<8x1xf32> to vector<8x32xf32>
    %506 = arith.subf %489, %505 : vector<8x32xf32>
    %cst_393 = arith.constant 9.99999974E-6 : f32
    %507 = vector.broadcast %cst_393 : f32 to vector<8x1xf32>
    %508 = arith.addf %504, %507 : vector<8x1xf32>
    %509 = math.rsqrt %508 : vector<8x1xf32>
    %510 = vector.broadcast %509 : vector<8x1xf32> to vector<8x32xf32>
    %511 = arith.mulf %506, %510 : vector<8x32xf32>
    %512 = vector.broadcast %491 : vector<1x32xf32> to vector<8x32xf32>
    %513 = arith.mulf %511, %512 : vector<8x32xf32>
    %514 = vector.broadcast %493 : vector<1x32xf32> to vector<8x32xf32>
    %515 = arith.addf %513, %514 : vector<8x32xf32>
    %c1_394 = arith.constant 1 : index
    %c0_395 = arith.constant 0 : index
    %c0_396 = arith.constant 0 : index
    %516 = vector.load %arg16[%c1_394, %c0_395, %c0_396] : memref<3x32x32xf32, #tpu.memory_space<vmem>>, vector<1x32x32xf32>
    %517 = vector.shape_cast %516 : vector<1x32x32xf32> to vector<32x32xf32>
    %cst_397 = arith.constant dense<0.000000e+00> : vector<8x32xf32>
    %518 = tpu.matmul %515, %517, %cst_397 {dimension_numbers = #tpu.dot_dimension_numbers<[1], [0], [0], [1], [0, 0, 1, 1], [], []>} : vector<8x32xf32>, vector<32x32xf32>, vector<8x32xf32> -> vector<8x32xf32>
    %c1_398 = arith.constant 1 : index
    %c0_399 = arith.constant 0 : index
    %c0_400 = arith.constant 0 : index
    %519 = vector.load %arg17[%c1_398, %c0_399, %c0_400] : memref<3x1x32xf32, #tpu.memory_space<vmem>>, vector<1x1x32xf32>
    %520 = vector.shape_cast %519 : vector<1x1x32xf32> to vector<1x32xf32>
    %521 = vector.broadcast %520 : vector<1x32xf32> to vector<8x32xf32>
    %522 = arith.addf %518, %521 : vector<8x32xf32>
    %523 = arith.mulf %522, %522 : vector<8x32xf32>
    %524 = arith.mulf %522, %523 : vector<8x32xf32>
    %cst_401 = arith.constant 4.471500e-02 : f32
    %525 = vector.broadcast %cst_401 : f32 to vector<8x32xf32>
    %526 = arith.mulf %525, %524 : vector<8x32xf32>
    %527 = arith.addf %522, %526 : vector<8x32xf32>
    %cst_402 = arith.constant 0.797884583 : f32
    %528 = vector.broadcast %cst_402 : f32 to vector<8x32xf32>
    %529 = arith.mulf %528, %527 : vector<8x32xf32>
    %530 = math.tanh %529 : vector<8x32xf32>
    %cst_403 = arith.constant 1.000000e+00 : f32
    %531 = vector.broadcast %cst_403 : f32 to vector<8x32xf32>
    %532 = arith.addf %531, %530 : vector<8x32xf32>
    %cst_404 = arith.constant 5.000000e-01 : f32
    %533 = vector.broadcast %cst_404 : f32 to vector<8x32xf32>
    %534 = arith.mulf %533, %532 : vector<8x32xf32>
    %535 = arith.mulf %522, %534 : vector<8x32xf32>
    %c1_405 = arith.constant 1 : index
    %c0_406 = arith.constant 0 : index
    %c0_407 = arith.constant 0 : index
    %536 = vector.load %arg18[%c1_405, %c0_406, %c0_407] : memref<3x32x32xf32, #tpu.memory_space<vmem>>, vector<1x32x32xf32>
    %537 = vector.shape_cast %536 : vector<1x32x32xf32> to vector<32x32xf32>
    %cst_408 = arith.constant dense<0.000000e+00> : vector<8x32xf32>
    %538 = tpu.matmul %535, %537, %cst_408 {dimension_numbers = #tpu.dot_dimension_numbers<[1], [0], [0], [1], [0, 0, 1, 1], [], []>} : vector<8x32xf32>, vector<32x32xf32>, vector<8x32xf32> -> vector<8x32xf32>
    %c1_409 = arith.constant 1 : index
    %c0_410 = arith.constant 0 : index
    %c0_411 = arith.constant 0 : index
    %539 = vector.load %arg19[%c1_409, %c0_410, %c0_411] : memref<3x1x32xf32, #tpu.memory_space<vmem>>, vector<1x1x32xf32>
    %540 = vector.shape_cast %539 : vector<1x1x32xf32> to vector<1x32xf32>
    %541 = vector.broadcast %540 : vector<1x32xf32> to vector<8x32xf32>
    %542 = arith.addf %538, %541 : vector<8x32xf32>
    %543 = arith.addf %515, %542 : vector<8x32xf32>
    %c1_412 = arith.constant 1 : index
    %c0_413 = arith.constant 0 : index
    %c0_414 = arith.constant 0 : index
    %544 = vector.load %arg22[%c1_412, %c0_413, %c0_414] : memref<3x1x32xf32, #tpu.memory_space<vmem>>, vector<1x1x32xf32>
    %545 = vector.shape_cast %544 : vector<1x1x32xf32> to vector<1x32xf32>
    %c1_415 = arith.constant 1 : index
    %c0_416 = arith.constant 0 : index
    %c0_417 = arith.constant 0 : index
    %546 = vector.load %arg23[%c1_415, %c0_416, %c0_417] : memref<3x1x32xf32, #tpu.memory_space<vmem>>, vector<1x1x32xf32>
    %547 = vector.shape_cast %546 : vector<1x1x32xf32> to vector<1x32xf32>
    %cst_418 = arith.constant dense<0.000000e+00> : vector<8xf32>
    %548 = vector.multi_reduction <add>, %543, %cst_418 [1] : vector<8x32xf32> to vector<8xf32>
    %549 = vector.shape_cast %548 : vector<8xf32> to vector<8x1xf32>
    %cst_419 = arith.constant 3.200000e+01 : f32
    %550 = vector.broadcast %cst_419 : f32 to vector<8x1xf32>
    %551 = arith.divf %549, %550 : vector<8x1xf32>
    %552 = arith.mulf %543, %543 : vector<8x32xf32>
    %cst_420 = arith.constant dense<0.000000e+00> : vector<8xf32>
    %553 = vector.multi_reduction <add>, %552, %cst_420 [1] : vector<8x32xf32> to vector<8xf32>
    %554 = vector.shape_cast %553 : vector<8xf32> to vector<8x1xf32>
    %cst_421 = arith.constant 3.200000e+01 : f32
    %555 = vector.broadcast %cst_421 : f32 to vector<8x1xf32>
    %556 = arith.divf %554, %555 : vector<8x1xf32>
    %557 = arith.mulf %551, %551 : vector<8x1xf32>
    %558 = arith.subf %556, %557 : vector<8x1xf32>
    %559 = vector.broadcast %551 : vector<8x1xf32> to vector<8x32xf32>
    %560 = arith.subf %543, %559 : vector<8x32xf32>
    %cst_422 = arith.constant 9.99999974E-6 : f32
    %561 = vector.broadcast %cst_422 : f32 to vector<8x1xf32>
    %562 = arith.addf %558, %561 : vector<8x1xf32>
    %563 = math.rsqrt %562 : vector<8x1xf32>
    %564 = vector.broadcast %563 : vector<8x1xf32> to vector<8x32xf32>
    %565 = arith.mulf %560, %564 : vector<8x32xf32>
    %566 = vector.broadcast %545 : vector<1x32xf32> to vector<8x32xf32>
    %567 = arith.mulf %565, %566 : vector<8x32xf32>
    %568 = vector.broadcast %547 : vector<1x32xf32> to vector<8x32xf32>
    %569 = arith.addf %567, %568 : vector<8x32xf32>
    %570 = vector.shape_cast %569 : vector<8x32xf32> to vector<2x4x32xf32>
    %c1_423 = arith.constant 1 : index
    %c0_424 = arith.constant 0 : index
    %c0_425 = arith.constant 0 : index
    %c0_426 = arith.constant 0 : index
    %571 = vector.load %arg24[%c1_423, %c0_424, %c0_425, %c0_426] : memref<2x3x32x32xf32, #tpu.memory_space<vmem>>, vector<1x1x32x32xf32>
    %572 = vector.shape_cast %571 : vector<1x1x32x32xf32> to vector<32x32xf32>
    %c1_427 = arith.constant 1 : index
    %c1_428 = arith.constant 1 : index
    %c0_429 = arith.constant 0 : index
    %c0_430 = arith.constant 0 : index
    %573 = vector.load %arg24[%c1_427, %c1_428, %c0_429, %c0_430] : memref<2x3x32x32xf32, #tpu.memory_space<vmem>>, vector<1x1x32x32xf32>
    %574 = vector.shape_cast %573 : vector<1x1x32x32xf32> to vector<32x32xf32>
    %c1_431 = arith.constant 1 : index
    %c2_432 = arith.constant 2 : index
    %c0_433 = arith.constant 0 : index
    %c0_434 = arith.constant 0 : index
    %575 = vector.load %arg24[%c1_431, %c2_432, %c0_433, %c0_434] : memref<2x3x32x32xf32, #tpu.memory_space<vmem>>, vector<1x1x32x32xf32>
    %576 = vector.shape_cast %575 : vector<1x1x32x32xf32> to vector<32x32xf32>
    %c1_435 = arith.constant 1 : index
    %c0_436 = arith.constant 0 : index
    %c0_437 = arith.constant 0 : index
    %577 = vector.load %arg25[%c1_435, %c0_436, %c0_437] : memref<2x1x32xf32, #tpu.memory_space<vmem>>, vector<1x1x32xf32>
    %578 = vector.shape_cast %577 : vector<1x1x32xf32> to vector<1x32xf32>
    %579 = vector.extract_strided_slice %570 {offsets = [0, 3, 0], sizes = [2, 1, 32], strides = [1, 1, 1]} : vector<2x4x32xf32> to vector<2x1x32xf32>
    %580 = vector.extract_strided_slice %570 {offsets = [0, 0, 0], sizes = [2, 3, 32], strides = [1, 1, 1]} : vector<2x4x32xf32> to vector<2x3x32xf32>
    %581 = tpu.concatenate %579, %580 in 1 : vector<2x1x32xf32>, vector<2x3x32xf32> -> vector<2x4x32xf32>
    %582 = vector.extract_strided_slice %570 {offsets = [0, 1, 0], sizes = [2, 3, 32], strides = [1, 1, 1]} : vector<2x4x32xf32> to vector<2x3x32xf32>
    %583 = vector.extract_strided_slice %570 {offsets = [0, 0, 0], sizes = [2, 1, 32], strides = [1, 1, 1]} : vector<2x4x32xf32> to vector<2x1x32xf32>
    %584 = tpu.concatenate %582, %583 in 1 : vector<2x3x32xf32>, vector<2x1x32xf32> -> vector<2x4x32xf32>
    %585 = vector.shape_cast %581 : vector<2x4x32xf32> to vector<8x32xf32>
    %cst_438 = arith.constant dense<0.000000e+00> : vector<8x32xf32>
    %586 = tpu.matmul %585, %572, %cst_438 {dimension_numbers = #tpu.dot_dimension_numbers<[1], [0], [0], [1], [0, 0, 1, 1], [], []>} : vector<8x32xf32>, vector<32x32xf32>, vector<8x32xf32> -> vector<8x32xf32>
    %587 = vector.shape_cast %570 : vector<2x4x32xf32> to vector<8x32xf32>
    %cst_439 = arith.constant dense<0.000000e+00> : vector<8x32xf32>
    %588 = tpu.matmul %587, %574, %cst_439 {dimension_numbers = #tpu.dot_dimension_numbers<[1], [0], [0], [1], [0, 0, 1, 1], [], []>} : vector<8x32xf32>, vector<32x32xf32>, vector<8x32xf32> -> vector<8x32xf32>
    %589 = arith.addf %586, %588 : vector<8x32xf32>
    %590 = vector.shape_cast %584 : vector<2x4x32xf32> to vector<8x32xf32>
    %cst_440 = arith.constant dense<0.000000e+00> : vector<8x32xf32>
    %591 = tpu.matmul %590, %576, %cst_440 {dimension_numbers = #tpu.dot_dimension_numbers<[1], [0], [0], [1], [0, 0, 1, 1], [], []>} : vector<8x32xf32>, vector<32x32xf32>, vector<8x32xf32> -> vector<8x32xf32>
    %592 = arith.addf %589, %591 : vector<8x32xf32>
    %593 = vector.broadcast %578 : vector<1x32xf32> to vector<8x32xf32>
    %594 = arith.addf %592, %593 : vector<8x32xf32>
    %cst_441 = arith.constant 0.999994993 : f32
    %595 = vector.broadcast %cst_441 : f32 to vector<8x32xf32>
    %596 = arith.mulf %594, %595 : vector<8x32xf32>
    %cst_442 = arith.constant 0.000000e+00 : f32
    %597 = vector.broadcast %cst_442 : f32 to vector<8x32xf32>
    %598 = arith.cmpf ogt, %596, %597 : vector<8x32xf32>
    %cst_443 = arith.constant 0.000000e+00 : f32
    %599 = vector.broadcast %cst_443 : f32 to vector<8x32xf32>
    %600 = arith.minimumf %596, %599 : vector<8x32xf32>
    %601 = math.exp %600 : vector<8x32xf32>
    %cst_444 = arith.constant 1.000000e+00 : f32
    %602 = vector.broadcast %cst_444 : f32 to vector<8x32xf32>
    %603 = arith.subf %601, %602 : vector<8x32xf32>
    %604 = arith.select %598, %596, %603 : vector<8x32xi1>, vector<8x32xf32>
    %605 = vector.shape_cast %604 : vector<8x32xf32> to vector<2x4x32xf32>
    %cst_445 = arith.constant -1.000000e+30 : f32
    %606 = vector.broadcast %cst_445 : f32 to vector<2x1x32xf32>
    %607 = tpu.concatenate %606, %605, %606 in 1 : vector<2x1x32xf32>, vector<2x4x32xf32>, vector<2x1x32xf32> -> vector<2x6x32xf32>
    %608 = vector.extract_strided_slice %607 {offsets = [0, 0, 0], sizes = [2, 4, 32], strides = [1, 1, 1]} : vector<2x6x32xf32> to vector<2x4x32xf32>
    %609 = vector.extract_strided_slice %607 {offsets = [0, 1, 0], sizes = [2, 4, 32], strides = [1, 1, 1]} : vector<2x6x32xf32> to vector<2x4x32xf32>
    %610 = arith.maximumf %608, %609 : vector<2x4x32xf32>
    %611 = vector.extract_strided_slice %607 {offsets = [0, 2, 0], sizes = [2, 4, 32], strides = [1, 1, 1]} : vector<2x6x32xf32> to vector<2x4x32xf32>
    %612 = arith.maximumf %610, %611 : vector<2x4x32xf32>
    %613 = vector.extract_strided_slice %612 {offsets = [0, 0, 0], sizes = [2, 1, 32], strides = [1, 1, 1]} : vector<2x4x32xf32> to vector<2x1x32xf32>
    %614 = vector.extract_strided_slice %612 {offsets = [0, 2, 0], sizes = [2, 1, 32], strides = [1, 1, 1]} : vector<2x4x32xf32> to vector<2x1x32xf32>
    %615 = tpu.concatenate %613, %614 in 1 : vector<2x1x32xf32>, vector<2x1x32xf32> -> vector<2x2x32xf32>
    %616 = vector.shape_cast %615 : vector<2x2x32xf32> to vector<4x32xf32>
    %c0_446 = arith.constant 0 : index
    %c0_447 = arith.constant 0 : index
    %617 = vector.load %arg5[%c0_446, %c0_447] : memref<4x4xf32, #tpu.memory_space<vmem>>, vector<4x4xf32>
    %cst_448 = arith.constant 0.000000e+00 : f32
    %618 = vector.broadcast %cst_448 : f32 to vector<4x32xf32>
    %c2_449 = arith.constant 2 : index
    %c0_450 = arith.constant 0 : index
    %c0_451 = arith.constant 0 : index
    %c0_452 = arith.constant 0 : index
    %619 = vector.load %arg8[%c2_449, %c0_450, %c0_451, %c0_452] : memref<3x4x32x8xf32, #tpu.memory_space<vmem>>, vector<1x1x32x8xf32>
    %620 = vector.shape_cast %619 : vector<1x1x32x8xf32> to vector<32x8xf32>
    %cst_453 = arith.constant dense<0.000000e+00> : vector<4x8xf32>
    %621 = tpu.matmul %616, %620, %cst_453 {dimension_numbers = #tpu.dot_dimension_numbers<[1], [0], [0], [1], [0, 0, 1, 1], [], []>} : vector<4x32xf32>, vector<32x8xf32>, vector<4x8xf32> -> vector<4x8xf32>
    %c2_454 = arith.constant 2 : index
    %c0_455 = arith.constant 0 : index
    %c0_456 = arith.constant 0 : index
    %c0_457 = arith.constant 0 : index
    %622 = vector.load %arg9[%c2_454, %c0_455, %c0_456, %c0_457] : memref<3x4x1x8xf32, #tpu.memory_space<vmem>>, vector<1x1x1x8xf32>
    %623 = vector.shape_cast %622 : vector<1x1x1x8xf32> to vector<1x8xf32>
    %624 = vector.broadcast %623 : vector<1x8xf32> to vector<4x8xf32>
    %625 = arith.addf %621, %624 : vector<4x8xf32>
    %cst_458 = arith.constant 0.353553385 : f32
    %626 = vector.broadcast %cst_458 : f32 to vector<4x8xf32>
    %627 = arith.mulf %625, %626 : vector<4x8xf32>
    %c2_459 = arith.constant 2 : index
    %c0_460 = arith.constant 0 : index
    %c0_461 = arith.constant 0 : index
    %c0_462 = arith.constant 0 : index
    %628 = vector.load %arg10[%c2_459, %c0_460, %c0_461, %c0_462] : memref<3x4x32x8xf32, #tpu.memory_space<vmem>>, vector<1x1x32x8xf32>
    %629 = vector.shape_cast %628 : vector<1x1x32x8xf32> to vector<32x8xf32>
    %cst_463 = arith.constant dense<0.000000e+00> : vector<4x8xf32>
    %630 = tpu.matmul %616, %629, %cst_463 {dimension_numbers = #tpu.dot_dimension_numbers<[1], [0], [0], [1], [0, 0, 1, 1], [], []>} : vector<4x32xf32>, vector<32x8xf32>, vector<4x8xf32> -> vector<4x8xf32>
    %c2_464 = arith.constant 2 : index
    %c0_465 = arith.constant 0 : index
    %c0_466 = arith.constant 0 : index
    %c0_467 = arith.constant 0 : index
    %631 = vector.load %arg11[%c2_464, %c0_465, %c0_466, %c0_467] : memref<3x4x1x8xf32, #tpu.memory_space<vmem>>, vector<1x1x1x8xf32>
    %632 = vector.shape_cast %631 : vector<1x1x1x8xf32> to vector<1x8xf32>
    %633 = vector.broadcast %632 : vector<1x8xf32> to vector<4x8xf32>
    %634 = arith.addf %630, %633 : vector<4x8xf32>
    %c2_468 = arith.constant 2 : index
    %c0_469 = arith.constant 0 : index
    %c0_470 = arith.constant 0 : index
    %c0_471 = arith.constant 0 : index
    %635 = vector.load %arg12[%c2_468, %c0_469, %c0_470, %c0_471] : memref<3x4x32x8xf32, #tpu.memory_space<vmem>>, vector<1x1x32x8xf32>
    %636 = vector.shape_cast %635 : vector<1x1x32x8xf32> to vector<32x8xf32>
    %cst_472 = arith.constant dense<0.000000e+00> : vector<4x8xf32>
    %637 = tpu.matmul %616, %636, %cst_472 {dimension_numbers = #tpu.dot_dimension_numbers<[1], [0], [0], [1], [0, 0, 1, 1], [], []>} : vector<4x32xf32>, vector<32x8xf32>, vector<4x8xf32> -> vector<4x8xf32>
    %c2_473 = arith.constant 2 : index
    %c0_474 = arith.constant 0 : index
    %c0_475 = arith.constant 0 : index
    %c0_476 = arith.constant 0 : index
    %638 = vector.load %arg13[%c2_473, %c0_474, %c0_475, %c0_476] : memref<3x4x1x8xf32, #tpu.memory_space<vmem>>, vector<1x1x1x8xf32>
    %639 = vector.shape_cast %638 : vector<1x1x1x8xf32> to vector<1x8xf32>
    %640 = vector.broadcast %639 : vector<1x8xf32> to vector<4x8xf32>
    %641 = arith.addf %637, %640 : vector<4x8xf32>
    "tpu.trace_start"() <{level = 10 : i32, message = "nd,md->nm"}> : () -> ()
    %cst_477 = arith.constant dense<0.000000e+00> : vector<4x4xf32>
    %642 = tpu.matmul %627, %634, %cst_477 {dimension_numbers = #tpu.dot_dimension_numbers<[1], [1], [0], [0], [0, 0, 1, 0], [], []>} : vector<4x8xf32>, vector<4x8xf32>, vector<4x4xf32> -> vector<4x4xf32>
    "tpu.trace_stop"() : () -> ()
    %643 = arith.addf %642, %617 : vector<4x4xf32>
    %cst_478 = arith.constant dense<0xFF800000> : vector<4xf32>
    %644 = vector.multi_reduction <maximumf>, %643, %cst_478 [1] : vector<4x4xf32> to vector<4xf32>
    %645 = vector.shape_cast %644 : vector<4xf32> to vector<4x1xf32>
    %646 = vector.broadcast %645 : vector<4x1xf32> to vector<4x4xf32>
    %647 = arith.subf %643, %646 : vector<4x4xf32>
    %648 = math.exp %647 : vector<4x4xf32>
    %cst_479 = arith.constant dense<0.000000e+00> : vector<4xf32>
    %649 = vector.multi_reduction <add>, %648, %cst_479 [1] : vector<4x4xf32> to vector<4xf32>
    %650 = vector.shape_cast %649 : vector<4xf32> to vector<4x1xf32>
    %651 = tpu.reciprocal %650 {approx = true} : vector<4x1xf32> -> vector<4x1xf32>
    %652 = vector.broadcast %651 : vector<4x1xf32> to vector<4x4xf32>
    %653 = arith.mulf %648, %652 : vector<4x4xf32>
    %cst_480 = arith.constant dense<0.000000e+00> : vector<4x8xf32>
    %654 = tpu.matmul %653, %641, %cst_480 {dimension_numbers = #tpu.dot_dimension_numbers<[1], [0], [0], [1], [0, 0, 1, 1], [], []>} : vector<4x4xf32>, vector<4x8xf32>, vector<4x8xf32> -> vector<4x8xf32>
    %c2_481 = arith.constant 2 : index
    %c0_482 = arith.constant 0 : index
    %c0_483 = arith.constant 0 : index
    %c0_484 = arith.constant 0 : index
    %655 = vector.load %arg14[%c2_481, %c0_482, %c0_483, %c0_484] : memref<3x4x8x32xf32, #tpu.memory_space<vmem>>, vector<1x1x8x32xf32>
    %656 = vector.shape_cast %655 : vector<1x1x8x32xf32> to vector<8x32xf32>
    %cst_485 = arith.constant dense<0.000000e+00> : vector<4x32xf32>
    %657 = tpu.matmul %654, %656, %cst_485 {dimension_numbers = #tpu.dot_dimension_numbers<[1], [0], [0], [1], [0, 0, 1, 1], [], []>} : vector<4x8xf32>, vector<8x32xf32>, vector<4x32xf32> -> vector<4x32xf32>
    %658 = arith.addf %618, %657 : vector<4x32xf32>
    %c2_486 = arith.constant 2 : index
    %c1_487 = arith.constant 1 : index
    %c0_488 = arith.constant 0 : index
    %c0_489 = arith.constant 0 : index
    %659 = vector.load %arg8[%c2_486, %c1_487, %c0_488, %c0_489] : memref<3x4x32x8xf32, #tpu.memory_space<vmem>>, vector<1x1x32x8xf32>
    %660 = vector.shape_cast %659 : vector<1x1x32x8xf32> to vector<32x8xf32>
    %cst_490 = arith.constant dense<0.000000e+00> : vector<4x8xf32>
    %661 = tpu.matmul %616, %660, %cst_490 {dimension_numbers = #tpu.dot_dimension_numbers<[1], [0], [0], [1], [0, 0, 1, 1], [], []>} : vector<4x32xf32>, vector<32x8xf32>, vector<4x8xf32> -> vector<4x8xf32>
    %c2_491 = arith.constant 2 : index
    %c1_492 = arith.constant 1 : index
    %c0_493 = arith.constant 0 : index
    %c0_494 = arith.constant 0 : index
    %662 = vector.load %arg9[%c2_491, %c1_492, %c0_493, %c0_494] : memref<3x4x1x8xf32, #tpu.memory_space<vmem>>, vector<1x1x1x8xf32>
    %663 = vector.shape_cast %662 : vector<1x1x1x8xf32> to vector<1x8xf32>
    %664 = vector.broadcast %663 : vector<1x8xf32> to vector<4x8xf32>
    %665 = arith.addf %661, %664 : vector<4x8xf32>
    %cst_495 = arith.constant 0.353553385 : f32
    %666 = vector.broadcast %cst_495 : f32 to vector<4x8xf32>
    %667 = arith.mulf %665, %666 : vector<4x8xf32>
    %c2_496 = arith.constant 2 : index
    %c1_497 = arith.constant 1 : index
    %c0_498 = arith.constant 0 : index
    %c0_499 = arith.constant 0 : index
    %668 = vector.load %arg10[%c2_496, %c1_497, %c0_498, %c0_499] : memref<3x4x32x8xf32, #tpu.memory_space<vmem>>, vector<1x1x32x8xf32>
    %669 = vector.shape_cast %668 : vector<1x1x32x8xf32> to vector<32x8xf32>
    %cst_500 = arith.constant dense<0.000000e+00> : vector<4x8xf32>
    %670 = tpu.matmul %616, %669, %cst_500 {dimension_numbers = #tpu.dot_dimension_numbers<[1], [0], [0], [1], [0, 0, 1, 1], [], []>} : vector<4x32xf32>, vector<32x8xf32>, vector<4x8xf32> -> vector<4x8xf32>
    %c2_501 = arith.constant 2 : index
    %c1_502 = arith.constant 1 : index
    %c0_503 = arith.constant 0 : index
    %c0_504 = arith.constant 0 : index
    %671 = vector.load %arg11[%c2_501, %c1_502, %c0_503, %c0_504] : memref<3x4x1x8xf32, #tpu.memory_space<vmem>>, vector<1x1x1x8xf32>
    %672 = vector.shape_cast %671 : vector<1x1x1x8xf32> to vector<1x8xf32>
    %673 = vector.broadcast %672 : vector<1x8xf32> to vector<4x8xf32>
    %674 = arith.addf %670, %673 : vector<4x8xf32>
    %c2_505 = arith.constant 2 : index
    %c1_506 = arith.constant 1 : index
    %c0_507 = arith.constant 0 : index
    %c0_508 = arith.constant 0 : index
    %675 = vector.load %arg12[%c2_505, %c1_506, %c0_507, %c0_508] : memref<3x4x32x8xf32, #tpu.memory_space<vmem>>, vector<1x1x32x8xf32>
    %676 = vector.shape_cast %675 : vector<1x1x32x8xf32> to vector<32x8xf32>
    %cst_509 = arith.constant dense<0.000000e+00> : vector<4x8xf32>
    %677 = tpu.matmul %616, %676, %cst_509 {dimension_numbers = #tpu.dot_dimension_numbers<[1], [0], [0], [1], [0, 0, 1, 1], [], []>} : vector<4x32xf32>, vector<32x8xf32>, vector<4x8xf32> -> vector<4x8xf32>
    %c2_510 = arith.constant 2 : index
    %c1_511 = arith.constant 1 : index
    %c0_512 = arith.constant 0 : index
    %c0_513 = arith.constant 0 : index
    %678 = vector.load %arg13[%c2_510, %c1_511, %c0_512, %c0_513] : memref<3x4x1x8xf32, #tpu.memory_space<vmem>>, vector<1x1x1x8xf32>
    %679 = vector.shape_cast %678 : vector<1x1x1x8xf32> to vector<1x8xf32>
    %680 = vector.broadcast %679 : vector<1x8xf32> to vector<4x8xf32>
    %681 = arith.addf %677, %680 : vector<4x8xf32>
    "tpu.trace_start"() <{level = 10 : i32, message = "nd,md->nm"}> : () -> ()
    %cst_514 = arith.constant dense<0.000000e+00> : vector<4x4xf32>
    %682 = tpu.matmul %667, %674, %cst_514 {dimension_numbers = #tpu.dot_dimension_numbers<[1], [1], [0], [0], [0, 0, 1, 0], [], []>} : vector<4x8xf32>, vector<4x8xf32>, vector<4x4xf32> -> vector<4x4xf32>
    "tpu.trace_stop"() : () -> ()
    %683 = arith.addf %682, %617 : vector<4x4xf32>
    %cst_515 = arith.constant dense<0xFF800000> : vector<4xf32>
    %684 = vector.multi_reduction <maximumf>, %683, %cst_515 [1] : vector<4x4xf32> to vector<4xf32>
    %685 = vector.shape_cast %684 : vector<4xf32> to vector<4x1xf32>
    %686 = vector.broadcast %685 : vector<4x1xf32> to vector<4x4xf32>
    %687 = arith.subf %683, %686 : vector<4x4xf32>
    %688 = math.exp %687 : vector<4x4xf32>
    %cst_516 = arith.constant dense<0.000000e+00> : vector<4xf32>
    %689 = vector.multi_reduction <add>, %688, %cst_516 [1] : vector<4x4xf32> to vector<4xf32>
    %690 = vector.shape_cast %689 : vector<4xf32> to vector<4x1xf32>
    %691 = tpu.reciprocal %690 {approx = true} : vector<4x1xf32> -> vector<4x1xf32>
    %692 = vector.broadcast %691 : vector<4x1xf32> to vector<4x4xf32>
    %693 = arith.mulf %688, %692 : vector<4x4xf32>
    %cst_517 = arith.constant dense<0.000000e+00> : vector<4x8xf32>
    %694 = tpu.matmul %693, %681, %cst_517 {dimension_numbers = #tpu.dot_dimension_numbers<[1], [0], [0], [1], [0, 0, 1, 1], [], []>} : vector<4x4xf32>, vector<4x8xf32>, vector<4x8xf32> -> vector<4x8xf32>
    %c2_518 = arith.constant 2 : index
    %c1_519 = arith.constant 1 : index
    %c0_520 = arith.constant 0 : index
    %c0_521 = arith.constant 0 : index
    %695 = vector.load %arg14[%c2_518, %c1_519, %c0_520, %c0_521] : memref<3x4x8x32xf32, #tpu.memory_space<vmem>>, vector<1x1x8x32xf32>
    %696 = vector.shape_cast %695 : vector<1x1x8x32xf32> to vector<8x32xf32>
    %cst_522 = arith.constant dense<0.000000e+00> : vector<4x32xf32>
    %697 = tpu.matmul %694, %696, %cst_522 {dimension_numbers = #tpu.dot_dimension_numbers<[1], [0], [0], [1], [0, 0, 1, 1], [], []>} : vector<4x8xf32>, vector<8x32xf32>, vector<4x32xf32> -> vector<4x32xf32>
    %698 = arith.addf %658, %697 : vector<4x32xf32>
    %c2_523 = arith.constant 2 : index
    %c2_524 = arith.constant 2 : index
    %c0_525 = arith.constant 0 : index
    %c0_526 = arith.constant 0 : index
    %699 = vector.load %arg8[%c2_523, %c2_524, %c0_525, %c0_526] : memref<3x4x32x8xf32, #tpu.memory_space<vmem>>, vector<1x1x32x8xf32>
    %700 = vector.shape_cast %699 : vector<1x1x32x8xf32> to vector<32x8xf32>
    %cst_527 = arith.constant dense<0.000000e+00> : vector<4x8xf32>
    %701 = tpu.matmul %616, %700, %cst_527 {dimension_numbers = #tpu.dot_dimension_numbers<[1], [0], [0], [1], [0, 0, 1, 1], [], []>} : vector<4x32xf32>, vector<32x8xf32>, vector<4x8xf32> -> vector<4x8xf32>
    %c2_528 = arith.constant 2 : index
    %c2_529 = arith.constant 2 : index
    %c0_530 = arith.constant 0 : index
    %c0_531 = arith.constant 0 : index
    %702 = vector.load %arg9[%c2_528, %c2_529, %c0_530, %c0_531] : memref<3x4x1x8xf32, #tpu.memory_space<vmem>>, vector<1x1x1x8xf32>
    %703 = vector.shape_cast %702 : vector<1x1x1x8xf32> to vector<1x8xf32>
    %704 = vector.broadcast %703 : vector<1x8xf32> to vector<4x8xf32>
    %705 = arith.addf %701, %704 : vector<4x8xf32>
    %cst_532 = arith.constant 0.353553385 : f32
    %706 = vector.broadcast %cst_532 : f32 to vector<4x8xf32>
    %707 = arith.mulf %705, %706 : vector<4x8xf32>
    %c2_533 = arith.constant 2 : index
    %c2_534 = arith.constant 2 : index
    %c0_535 = arith.constant 0 : index
    %c0_536 = arith.constant 0 : index
    %708 = vector.load %arg10[%c2_533, %c2_534, %c0_535, %c0_536] : memref<3x4x32x8xf32, #tpu.memory_space<vmem>>, vector<1x1x32x8xf32>
    %709 = vector.shape_cast %708 : vector<1x1x32x8xf32> to vector<32x8xf32>
    %cst_537 = arith.constant dense<0.000000e+00> : vector<4x8xf32>
    %710 = tpu.matmul %616, %709, %cst_537 {dimension_numbers = #tpu.dot_dimension_numbers<[1], [0], [0], [1], [0, 0, 1, 1], [], []>} : vector<4x32xf32>, vector<32x8xf32>, vector<4x8xf32> -> vector<4x8xf32>
    %c2_538 = arith.constant 2 : index
    %c2_539 = arith.constant 2 : index
    %c0_540 = arith.constant 0 : index
    %c0_541 = arith.constant 0 : index
    %711 = vector.load %arg11[%c2_538, %c2_539, %c0_540, %c0_541] : memref<3x4x1x8xf32, #tpu.memory_space<vmem>>, vector<1x1x1x8xf32>
    %712 = vector.shape_cast %711 : vector<1x1x1x8xf32> to vector<1x8xf32>
    %713 = vector.broadcast %712 : vector<1x8xf32> to vector<4x8xf32>
    %714 = arith.addf %710, %713 : vector<4x8xf32>
    %c2_542 = arith.constant 2 : index
    %c2_543 = arith.constant 2 : index
    %c0_544 = arith.constant 0 : index
    %c0_545 = arith.constant 0 : index
    %715 = vector.load %arg12[%c2_542, %c2_543, %c0_544, %c0_545] : memref<3x4x32x8xf32, #tpu.memory_space<vmem>>, vector<1x1x32x8xf32>
    %716 = vector.shape_cast %715 : vector<1x1x32x8xf32> to vector<32x8xf32>
    %cst_546 = arith.constant dense<0.000000e+00> : vector<4x8xf32>
    %717 = tpu.matmul %616, %716, %cst_546 {dimension_numbers = #tpu.dot_dimension_numbers<[1], [0], [0], [1], [0, 0, 1, 1], [], []>} : vector<4x32xf32>, vector<32x8xf32>, vector<4x8xf32> -> vector<4x8xf32>
    %c2_547 = arith.constant 2 : index
    %c2_548 = arith.constant 2 : index
    %c0_549 = arith.constant 0 : index
    %c0_550 = arith.constant 0 : index
    %718 = vector.load %arg13[%c2_547, %c2_548, %c0_549, %c0_550] : memref<3x4x1x8xf32, #tpu.memory_space<vmem>>, vector<1x1x1x8xf32>
    %719 = vector.shape_cast %718 : vector<1x1x1x8xf32> to vector<1x8xf32>
    %720 = vector.broadcast %719 : vector<1x8xf32> to vector<4x8xf32>
    %721 = arith.addf %717, %720 : vector<4x8xf32>
    "tpu.trace_start"() <{level = 10 : i32, message = "nd,md->nm"}> : () -> ()
    %cst_551 = arith.constant dense<0.000000e+00> : vector<4x4xf32>
    %722 = tpu.matmul %707, %714, %cst_551 {dimension_numbers = #tpu.dot_dimension_numbers<[1], [1], [0], [0], [0, 0, 1, 0], [], []>} : vector<4x8xf32>, vector<4x8xf32>, vector<4x4xf32> -> vector<4x4xf32>
    "tpu.trace_stop"() : () -> ()
    %723 = arith.addf %722, %617 : vector<4x4xf32>
    %cst_552 = arith.constant dense<0xFF800000> : vector<4xf32>
    %724 = vector.multi_reduction <maximumf>, %723, %cst_552 [1] : vector<4x4xf32> to vector<4xf32>
    %725 = vector.shape_cast %724 : vector<4xf32> to vector<4x1xf32>
    %726 = vector.broadcast %725 : vector<4x1xf32> to vector<4x4xf32>
    %727 = arith.subf %723, %726 : vector<4x4xf32>
    %728 = math.exp %727 : vector<4x4xf32>
    %cst_553 = arith.constant dense<0.000000e+00> : vector<4xf32>
    %729 = vector.multi_reduction <add>, %728, %cst_553 [1] : vector<4x4xf32> to vector<4xf32>
    %730 = vector.shape_cast %729 : vector<4xf32> to vector<4x1xf32>
    %731 = tpu.reciprocal %730 {approx = true} : vector<4x1xf32> -> vector<4x1xf32>
    %732 = vector.broadcast %731 : vector<4x1xf32> to vector<4x4xf32>
    %733 = arith.mulf %728, %732 : vector<4x4xf32>
    %cst_554 = arith.constant dense<0.000000e+00> : vector<4x8xf32>
    %734 = tpu.matmul %733, %721, %cst_554 {dimension_numbers = #tpu.dot_dimension_numbers<[1], [0], [0], [1], [0, 0, 1, 1], [], []>} : vector<4x4xf32>, vector<4x8xf32>, vector<4x8xf32> -> vector<4x8xf32>
    %c2_555 = arith.constant 2 : index
    %c2_556 = arith.constant 2 : index
    %c0_557 = arith.constant 0 : index
    %c0_558 = arith.constant 0 : index
    %735 = vector.load %arg14[%c2_555, %c2_556, %c0_557, %c0_558] : memref<3x4x8x32xf32, #tpu.memory_space<vmem>>, vector<1x1x8x32xf32>
    %736 = vector.shape_cast %735 : vector<1x1x8x32xf32> to vector<8x32xf32>
    %cst_559 = arith.constant dense<0.000000e+00> : vector<4x32xf32>
    %737 = tpu.matmul %734, %736, %cst_559 {dimension_numbers = #tpu.dot_dimension_numbers<[1], [0], [0], [1], [0, 0, 1, 1], [], []>} : vector<4x8xf32>, vector<8x32xf32>, vector<4x32xf32> -> vector<4x32xf32>
    %738 = arith.addf %698, %737 : vector<4x32xf32>
    %c2_560 = arith.constant 2 : index
    %c3_561 = arith.constant 3 : index
    %c0_562 = arith.constant 0 : index
    %c0_563 = arith.constant 0 : index
    %739 = vector.load %arg8[%c2_560, %c3_561, %c0_562, %c0_563] : memref<3x4x32x8xf32, #tpu.memory_space<vmem>>, vector<1x1x32x8xf32>
    %740 = vector.shape_cast %739 : vector<1x1x32x8xf32> to vector<32x8xf32>
    %cst_564 = arith.constant dense<0.000000e+00> : vector<4x8xf32>
    %741 = tpu.matmul %616, %740, %cst_564 {dimension_numbers = #tpu.dot_dimension_numbers<[1], [0], [0], [1], [0, 0, 1, 1], [], []>} : vector<4x32xf32>, vector<32x8xf32>, vector<4x8xf32> -> vector<4x8xf32>
    %c2_565 = arith.constant 2 : index
    %c3_566 = arith.constant 3 : index
    %c0_567 = arith.constant 0 : index
    %c0_568 = arith.constant 0 : index
    %742 = vector.load %arg9[%c2_565, %c3_566, %c0_567, %c0_568] : memref<3x4x1x8xf32, #tpu.memory_space<vmem>>, vector<1x1x1x8xf32>
    %743 = vector.shape_cast %742 : vector<1x1x1x8xf32> to vector<1x8xf32>
    %744 = vector.broadcast %743 : vector<1x8xf32> to vector<4x8xf32>
    %745 = arith.addf %741, %744 : vector<4x8xf32>
    %cst_569 = arith.constant 0.353553385 : f32
    %746 = vector.broadcast %cst_569 : f32 to vector<4x8xf32>
    %747 = arith.mulf %745, %746 : vector<4x8xf32>
    %c2_570 = arith.constant 2 : index
    %c3_571 = arith.constant 3 : index
    %c0_572 = arith.constant 0 : index
    %c0_573 = arith.constant 0 : index
    %748 = vector.load %arg10[%c2_570, %c3_571, %c0_572, %c0_573] : memref<3x4x32x8xf32, #tpu.memory_space<vmem>>, vector<1x1x32x8xf32>
    %749 = vector.shape_cast %748 : vector<1x1x32x8xf32> to vector<32x8xf32>
    %cst_574 = arith.constant dense<0.000000e+00> : vector<4x8xf32>
    %750 = tpu.matmul %616, %749, %cst_574 {dimension_numbers = #tpu.dot_dimension_numbers<[1], [0], [0], [1], [0, 0, 1, 1], [], []>} : vector<4x32xf32>, vector<32x8xf32>, vector<4x8xf32> -> vector<4x8xf32>
    %c2_575 = arith.constant 2 : index
    %c3_576 = arith.constant 3 : index
    %c0_577 = arith.constant 0 : index
    %c0_578 = arith.constant 0 : index
    %751 = vector.load %arg11[%c2_575, %c3_576, %c0_577, %c0_578] : memref<3x4x1x8xf32, #tpu.memory_space<vmem>>, vector<1x1x1x8xf32>
    %752 = vector.shape_cast %751 : vector<1x1x1x8xf32> to vector<1x8xf32>
    %753 = vector.broadcast %752 : vector<1x8xf32> to vector<4x8xf32>
    %754 = arith.addf %750, %753 : vector<4x8xf32>
    %c2_579 = arith.constant 2 : index
    %c3_580 = arith.constant 3 : index
    %c0_581 = arith.constant 0 : index
    %c0_582 = arith.constant 0 : index
    %755 = vector.load %arg12[%c2_579, %c3_580, %c0_581, %c0_582] : memref<3x4x32x8xf32, #tpu.memory_space<vmem>>, vector<1x1x32x8xf32>
    %756 = vector.shape_cast %755 : vector<1x1x32x8xf32> to vector<32x8xf32>
    %cst_583 = arith.constant dense<0.000000e+00> : vector<4x8xf32>
    %757 = tpu.matmul %616, %756, %cst_583 {dimension_numbers = #tpu.dot_dimension_numbers<[1], [0], [0], [1], [0, 0, 1, 1], [], []>} : vector<4x32xf32>, vector<32x8xf32>, vector<4x8xf32> -> vector<4x8xf32>
    %c2_584 = arith.constant 2 : index
    %c3_585 = arith.constant 3 : index
    %c0_586 = arith.constant 0 : index
    %c0_587 = arith.constant 0 : index
    %758 = vector.load %arg13[%c2_584, %c3_585, %c0_586, %c0_587] : memref<3x4x1x8xf32, #tpu.memory_space<vmem>>, vector<1x1x1x8xf32>
    %759 = vector.shape_cast %758 : vector<1x1x1x8xf32> to vector<1x8xf32>
    %760 = vector.broadcast %759 : vector<1x8xf32> to vector<4x8xf32>
    %761 = arith.addf %757, %760 : vector<4x8xf32>
    "tpu.trace_start"() <{level = 10 : i32, message = "nd,md->nm"}> : () -> ()
    %cst_588 = arith.constant dense<0.000000e+00> : vector<4x4xf32>
    %762 = tpu.matmul %747, %754, %cst_588 {dimension_numbers = #tpu.dot_dimension_numbers<[1], [1], [0], [0], [0, 0, 1, 0], [], []>} : vector<4x8xf32>, vector<4x8xf32>, vector<4x4xf32> -> vector<4x4xf32>
    "tpu.trace_stop"() : () -> ()
    %763 = arith.addf %762, %617 : vector<4x4xf32>
    %cst_589 = arith.constant dense<0xFF800000> : vector<4xf32>
    %764 = vector.multi_reduction <maximumf>, %763, %cst_589 [1] : vector<4x4xf32> to vector<4xf32>
    %765 = vector.shape_cast %764 : vector<4xf32> to vector<4x1xf32>
    %766 = vector.broadcast %765 : vector<4x1xf32> to vector<4x4xf32>
    %767 = arith.subf %763, %766 : vector<4x4xf32>
    %768 = math.exp %767 : vector<4x4xf32>
    %cst_590 = arith.constant dense<0.000000e+00> : vector<4xf32>
    %769 = vector.multi_reduction <add>, %768, %cst_590 [1] : vector<4x4xf32> to vector<4xf32>
    %770 = vector.shape_cast %769 : vector<4xf32> to vector<4x1xf32>
    %771 = tpu.reciprocal %770 {approx = true} : vector<4x1xf32> -> vector<4x1xf32>
    %772 = vector.broadcast %771 : vector<4x1xf32> to vector<4x4xf32>
    %773 = arith.mulf %768, %772 : vector<4x4xf32>
    %cst_591 = arith.constant dense<0.000000e+00> : vector<4x8xf32>
    %774 = tpu.matmul %773, %761, %cst_591 {dimension_numbers = #tpu.dot_dimension_numbers<[1], [0], [0], [1], [0, 0, 1, 1], [], []>} : vector<4x4xf32>, vector<4x8xf32>, vector<4x8xf32> -> vector<4x8xf32>
    %c2_592 = arith.constant 2 : index
    %c3_593 = arith.constant 3 : index
    %c0_594 = arith.constant 0 : index
    %c0_595 = arith.constant 0 : index
    %775 = vector.load %arg14[%c2_592, %c3_593, %c0_594, %c0_595] : memref<3x4x8x32xf32, #tpu.memory_space<vmem>>, vector<1x1x8x32xf32>
    %776 = vector.shape_cast %775 : vector<1x1x8x32xf32> to vector<8x32xf32>
    %cst_596 = arith.constant dense<0.000000e+00> : vector<4x32xf32>
    %777 = tpu.matmul %774, %776, %cst_596 {dimension_numbers = #tpu.dot_dimension_numbers<[1], [0], [0], [1], [0, 0, 1, 1], [], []>} : vector<4x8xf32>, vector<8x32xf32>, vector<4x32xf32> -> vector<4x32xf32>
    %778 = arith.addf %738, %777 : vector<4x32xf32>
    %c2_597 = arith.constant 2 : index
    %c0_598 = arith.constant 0 : index
    %c0_599 = arith.constant 0 : index
    %779 = vector.load %arg15[%c2_597, %c0_598, %c0_599] : memref<3x1x32xf32, #tpu.memory_space<vmem>>, vector<1x1x32xf32>
    %780 = vector.shape_cast %779 : vector<1x1x32xf32> to vector<1x32xf32>
    %781 = vector.broadcast %780 : vector<1x32xf32> to vector<4x32xf32>
    %782 = arith.addf %778, %781 : vector<4x32xf32>
    %783 = arith.addf %616, %782 : vector<4x32xf32>
    %c2_600 = arith.constant 2 : index
    %c0_601 = arith.constant 0 : index
    %c0_602 = arith.constant 0 : index
    %784 = vector.load %arg20[%c2_600, %c0_601, %c0_602] : memref<3x1x32xf32, #tpu.memory_space<vmem>>, vector<1x1x32xf32>
    %785 = vector.shape_cast %784 : vector<1x1x32xf32> to vector<1x32xf32>
    %c2_603 = arith.constant 2 : index
    %c0_604 = arith.constant 0 : index
    %c0_605 = arith.constant 0 : index
    %786 = vector.load %arg21[%c2_603, %c0_604, %c0_605] : memref<3x1x32xf32, #tpu.memory_space<vmem>>, vector<1x1x32xf32>
    %787 = vector.shape_cast %786 : vector<1x1x32xf32> to vector<1x32xf32>
    %cst_606 = arith.constant dense<0.000000e+00> : vector<4xf32>
    %788 = vector.multi_reduction <add>, %783, %cst_606 [1] : vector<4x32xf32> to vector<4xf32>
    %789 = vector.shape_cast %788 : vector<4xf32> to vector<4x1xf32>
    %cst_607 = arith.constant 3.200000e+01 : f32
    %790 = vector.broadcast %cst_607 : f32 to vector<4x1xf32>
    %791 = arith.divf %789, %790 : vector<4x1xf32>
    %792 = arith.mulf %783, %783 : vector<4x32xf32>
    %cst_608 = arith.constant dense<0.000000e+00> : vector<4xf32>
    %793 = vector.multi_reduction <add>, %792, %cst_608 [1] : vector<4x32xf32> to vector<4xf32>
    %794 = vector.shape_cast %793 : vector<4xf32> to vector<4x1xf32>
    %cst_609 = arith.constant 3.200000e+01 : f32
    %795 = vector.broadcast %cst_609 : f32 to vector<4x1xf32>
    %796 = arith.divf %794, %795 : vector<4x1xf32>
    %797 = arith.mulf %791, %791 : vector<4x1xf32>
    %798 = arith.subf %796, %797 : vector<4x1xf32>
    %799 = vector.broadcast %791 : vector<4x1xf32> to vector<4x32xf32>
    %800 = arith.subf %783, %799 : vector<4x32xf32>
    %cst_610 = arith.constant 9.99999974E-6 : f32
    %801 = vector.broadcast %cst_610 : f32 to vector<4x1xf32>
    %802 = arith.addf %798, %801 : vector<4x1xf32>
    %803 = math.rsqrt %802 : vector<4x1xf32>
    %804 = vector.broadcast %803 : vector<4x1xf32> to vector<4x32xf32>
    %805 = arith.mulf %800, %804 : vector<4x32xf32>
    %806 = vector.broadcast %785 : vector<1x32xf32> to vector<4x32xf32>
    %807 = arith.mulf %805, %806 : vector<4x32xf32>
    %808 = vector.broadcast %787 : vector<1x32xf32> to vector<4x32xf32>
    %809 = arith.addf %807, %808 : vector<4x32xf32>
    %c2_611 = arith.constant 2 : index
    %c0_612 = arith.constant 0 : index
    %c0_613 = arith.constant 0 : index
    %810 = vector.load %arg16[%c2_611, %c0_612, %c0_613] : memref<3x32x32xf32, #tpu.memory_space<vmem>>, vector<1x32x32xf32>
    %811 = vector.shape_cast %810 : vector<1x32x32xf32> to vector<32x32xf32>
    %cst_614 = arith.constant dense<0.000000e+00> : vector<4x32xf32>
    %812 = tpu.matmul %809, %811, %cst_614 {dimension_numbers = #tpu.dot_dimension_numbers<[1], [0], [0], [1], [0, 0, 1, 1], [], []>} : vector<4x32xf32>, vector<32x32xf32>, vector<4x32xf32> -> vector<4x32xf32>
    %c2_615 = arith.constant 2 : index
    %c0_616 = arith.constant 0 : index
    %c0_617 = arith.constant 0 : index
    %813 = vector.load %arg17[%c2_615, %c0_616, %c0_617] : memref<3x1x32xf32, #tpu.memory_space<vmem>>, vector<1x1x32xf32>
    %814 = vector.shape_cast %813 : vector<1x1x32xf32> to vector<1x32xf32>
    %815 = vector.broadcast %814 : vector<1x32xf32> to vector<4x32xf32>
    %816 = arith.addf %812, %815 : vector<4x32xf32>
    %817 = arith.mulf %816, %816 : vector<4x32xf32>
    %818 = arith.mulf %816, %817 : vector<4x32xf32>
    %cst_618 = arith.constant 4.471500e-02 : f32
    %819 = vector.broadcast %cst_618 : f32 to vector<4x32xf32>
    %820 = arith.mulf %819, %818 : vector<4x32xf32>
    %821 = arith.addf %816, %820 : vector<4x32xf32>
    %cst_619 = arith.constant 0.797884583 : f32
    %822 = vector.broadcast %cst_619 : f32 to vector<4x32xf32>
    %823 = arith.mulf %822, %821 : vector<4x32xf32>
    %824 = math.tanh %823 : vector<4x32xf32>
    %cst_620 = arith.constant 1.000000e+00 : f32
    %825 = vector.broadcast %cst_620 : f32 to vector<4x32xf32>
    %826 = arith.addf %825, %824 : vector<4x32xf32>
    %cst_621 = arith.constant 5.000000e-01 : f32
    %827 = vector.broadcast %cst_621 : f32 to vector<4x32xf32>
    %828 = arith.mulf %827, %826 : vector<4x32xf32>
    %829 = arith.mulf %816, %828 : vector<4x32xf32>
    %c2_622 = arith.constant 2 : index
    %c0_623 = arith.constant 0 : index
    %c0_624 = arith.constant 0 : index
    %830 = vector.load %arg18[%c2_622, %c0_623, %c0_624] : memref<3x32x32xf32, #tpu.memory_space<vmem>>, vector<1x32x32xf32>
    %831 = vector.shape_cast %830 : vector<1x32x32xf32> to vector<32x32xf32>
    %cst_625 = arith.constant dense<0.000000e+00> : vector<4x32xf32>
    %832 = tpu.matmul %829, %831, %cst_625 {dimension_numbers = #tpu.dot_dimension_numbers<[1], [0], [0], [1], [0, 0, 1, 1], [], []>} : vector<4x32xf32>, vector<32x32xf32>, vector<4x32xf32> -> vector<4x32xf32>
    %c2_626 = arith.constant 2 : index
    %c0_627 = arith.constant 0 : index
    %c0_628 = arith.constant 0 : index
    %833 = vector.load %arg19[%c2_626, %c0_627, %c0_628] : memref<3x1x32xf32, #tpu.memory_space<vmem>>, vector<1x1x32xf32>
    %834 = vector.shape_cast %833 : vector<1x1x32xf32> to vector<1x32xf32>
    %835 = vector.broadcast %834 : vector<1x32xf32> to vector<4x32xf32>
    %836 = arith.addf %832, %835 : vector<4x32xf32>
    %837 = arith.addf %809, %836 : vector<4x32xf32>
    %c2_629 = arith.constant 2 : index
    %c0_630 = arith.constant 0 : index
    %c0_631 = arith.constant 0 : index
    %838 = vector.load %arg22[%c2_629, %c0_630, %c0_631] : memref<3x1x32xf32, #tpu.memory_space<vmem>>, vector<1x1x32xf32>
    %839 = vector.shape_cast %838 : vector<1x1x32xf32> to vector<1x32xf32>
    %c2_632 = arith.constant 2 : index
    %c0_633 = arith.constant 0 : index
    %c0_634 = arith.constant 0 : index
    %840 = vector.load %arg23[%c2_632, %c0_633, %c0_634] : memref<3x1x32xf32, #tpu.memory_space<vmem>>, vector<1x1x32xf32>
    %841 = vector.shape_cast %840 : vector<1x1x32xf32> to vector<1x32xf32>
    %cst_635 = arith.constant dense<0.000000e+00> : vector<4xf32>
    %842 = vector.multi_reduction <add>, %837, %cst_635 [1] : vector<4x32xf32> to vector<4xf32>
    %843 = vector.shape_cast %842 : vector<4xf32> to vector<4x1xf32>
    %cst_636 = arith.constant 3.200000e+01 : f32
    %844 = vector.broadcast %cst_636 : f32 to vector<4x1xf32>
    %845 = arith.divf %843, %844 : vector<4x1xf32>
    %846 = arith.mulf %837, %837 : vector<4x32xf32>
    %cst_637 = arith.constant dense<0.000000e+00> : vector<4xf32>
    %847 = vector.multi_reduction <add>, %846, %cst_637 [1] : vector<4x32xf32> to vector<4xf32>
    %848 = vector.shape_cast %847 : vector<4xf32> to vector<4x1xf32>
    %cst_638 = arith.constant 3.200000e+01 : f32
    %849 = vector.broadcast %cst_638 : f32 to vector<4x1xf32>
    %850 = arith.divf %848, %849 : vector<4x1xf32>
    %851 = arith.mulf %845, %845 : vector<4x1xf32>
    %852 = arith.subf %850, %851 : vector<4x1xf32>
    %853 = vector.broadcast %845 : vector<4x1xf32> to vector<4x32xf32>
    %854 = arith.subf %837, %853 : vector<4x32xf32>
    %cst_639 = arith.constant 9.99999974E-6 : f32
    %855 = vector.broadcast %cst_639 : f32 to vector<4x1xf32>
    %856 = arith.addf %852, %855 : vector<4x1xf32>
    %857 = math.rsqrt %856 : vector<4x1xf32>
    %858 = vector.broadcast %857 : vector<4x1xf32> to vector<4x32xf32>
    %859 = arith.mulf %854, %858 : vector<4x32xf32>
    %860 = vector.broadcast %839 : vector<1x32xf32> to vector<4x32xf32>
    %861 = arith.mulf %859, %860 : vector<4x32xf32>
    %862 = vector.broadcast %841 : vector<1x32xf32> to vector<4x32xf32>
    %863 = arith.addf %861, %862 : vector<4x32xf32>
    %c0_640 = arith.constant 0 : index
    %c0_641 = arith.constant 0 : index
    %864 = vector.load %arg26[%c0_640, %c0_641] : memref<1x32xf32, #tpu.memory_space<vmem>>, vector<1x32xf32>
    %c0_642 = arith.constant 0 : index
    %c0_643 = arith.constant 0 : index
    %865 = vector.load %arg27[%c0_642, %c0_643] : memref<1x32xf32, #tpu.memory_space<vmem>>, vector<1x32xf32>
    %cst_644 = arith.constant dense<0.000000e+00> : vector<4xf32>
    %866 = vector.multi_reduction <add>, %863, %cst_644 [1] : vector<4x32xf32> to vector<4xf32>
    %867 = vector.shape_cast %866 : vector<4xf32> to vector<4x1xf32>
    %cst_645 = arith.constant 3.200000e+01 : f32
    %868 = vector.broadcast %cst_645 : f32 to vector<4x1xf32>
    %869 = arith.divf %867, %868 : vector<4x1xf32>
    %870 = arith.mulf %863, %863 : vector<4x32xf32>
    %cst_646 = arith.constant dense<0.000000e+00> : vector<4xf32>
    %871 = vector.multi_reduction <add>, %870, %cst_646 [1] : vector<4x32xf32> to vector<4xf32>
    %872 = vector.shape_cast %871 : vector<4xf32> to vector<4x1xf32>
    %cst_647 = arith.constant 3.200000e+01 : f32
    %873 = vector.broadcast %cst_647 : f32 to vector<4x1xf32>
    %874 = arith.divf %872, %873 : vector<4x1xf32>
    %875 = arith.mulf %869, %869 : vector<4x1xf32>
    %876 = arith.subf %874, %875 : vector<4x1xf32>
    %877 = vector.broadcast %869 : vector<4x1xf32> to vector<4x32xf32>
    %878 = arith.subf %863, %877 : vector<4x32xf32>
    %cst_648 = arith.constant 9.99999974E-6 : f32
    %879 = vector.broadcast %cst_648 : f32 to vector<4x1xf32>
    %880 = arith.addf %876, %879 : vector<4x1xf32>
    %881 = math.rsqrt %880 : vector<4x1xf32>
    %882 = vector.broadcast %881 : vector<4x1xf32> to vector<4x32xf32>
    %883 = arith.mulf %878, %882 : vector<4x32xf32>
    %884 = vector.broadcast %864 : vector<1x32xf32> to vector<4x32xf32>
    %885 = arith.mulf %883, %884 : vector<4x32xf32>
    %886 = vector.broadcast %865 : vector<1x32xf32> to vector<4x32xf32>
    %887 = arith.addf %885, %886 : vector<4x32xf32>
    %888 = vector.shape_cast %0 : vector<2x8x16xf32> to vector<16x16xf32>
    %c0_649 = arith.constant 0 : index
    %c0_650 = arith.constant 0 : index
    %889 = vector.load %arg1[%c0_649, %c0_650] : memref<6x16xf32, #tpu.memory_space<vmem>>, vector<6x16xf32>
    %890 = tpu.concatenate %888, %889 in 0 : vector<16x16xf32>, vector<6x16xf32> -> vector<22x16xf32>
    %c0_651 = arith.constant 0 : index
    %c0_652 = arith.constant 0 : index
    %891 = vector.load %arg28[%c0_651, %c0_652] : memref<16x64xf32, #tpu.memory_space<vmem>>, vector<16x64xf32>
    %cst_653 = arith.constant dense<0.000000e+00> : vector<22x64xf32>
    %892 = tpu.matmul %890, %891, %cst_653 {dimension_numbers = #tpu.dot_dimension_numbers<[1], [0], [0], [1], [0, 0, 1, 1], [], []>} : vector<22x16xf32>, vector<16x64xf32>, vector<22x64xf32> -> vector<22x64xf32>
    %c0_654 = arith.constant 0 : index
    %c0_655 = arith.constant 0 : index
    %893 = vector.load %arg29[%c0_654, %c0_655] : memref<1x64xf32, #tpu.memory_space<vmem>>, vector<1x64xf32>
    %894 = vector.broadcast %893 : vector<1x64xf32> to vector<22x64xf32>
    %895 = arith.addf %892, %894 : vector<22x64xf32>
    %cst_656 = arith.constant 0.000000e+00 : f32
    %896 = vector.broadcast %cst_656 : f32 to vector<22x64xf32>
    %897 = arith.maximumf %895, %896 : vector<22x64xf32>
    %c0_657 = arith.constant 0 : index
    %c0_658 = arith.constant 0 : index
    %898 = vector.load %arg30[%c0_657, %c0_658] : memref<64x32xf32, #tpu.memory_space<vmem>>, vector<64x32xf32>
    %cst_659 = arith.constant dense<0.000000e+00> : vector<22x32xf32>
    %899 = tpu.matmul %897, %898, %cst_659 {dimension_numbers = #tpu.dot_dimension_numbers<[1], [0], [0], [1], [0, 0, 1, 1], [], []>} : vector<22x64xf32>, vector<64x32xf32>, vector<22x32xf32> -> vector<22x32xf32>
    %c0_660 = arith.constant 0 : index
    %c0_661 = arith.constant 0 : index
    %900 = vector.load %arg31[%c0_660, %c0_661] : memref<1x32xf32, #tpu.memory_space<vmem>>, vector<1x32xf32>
    %901 = vector.broadcast %900 : vector<1x32xf32> to vector<22x32xf32>
    %902 = arith.addf %899, %901 : vector<22x32xf32>
    %cst_662 = arith.constant 0.000000e+00 : f32
    %903 = vector.broadcast %cst_662 : f32 to vector<22x32xf32>
    %904 = arith.maximumf %902, %903 : vector<22x32xf32>
    %c0_663 = arith.constant 0 : index
    %c0_664 = arith.constant 0 : index
    %905 = vector.load %arg2[%c0_663, %c0_664] : memref<6x6xf32, #tpu.memory_space<vmem>>, vector<6x6xf32>
    %c0_665 = arith.constant 0 : index
    %c0_666 = arith.constant 0 : index
    %906 = vector.load %arg32[%c0_665, %c0_666] : memref<16x24xf32, #tpu.memory_space<vmem>>, vector<16x24xf32>
    %cst_667 = arith.constant dense<0.000000e+00> : vector<6x24xf32>
    %907 = tpu.matmul %889, %906, %cst_667 {dimension_numbers = #tpu.dot_dimension_numbers<[1], [0], [0], [1], [0, 0, 1, 1], [], []>} : vector<6x16xf32>, vector<16x24xf32>, vector<6x24xf32> -> vector<6x24xf32>
    %cst_668 = arith.constant dense<0.000000e+00> : vector<6x24xf32>
    %908 = tpu.matmul %905, %907, %cst_668 {dimension_numbers = #tpu.dot_dimension_numbers<[1], [0], [0], [1], [0, 0, 1, 1], [], []>} : vector<6x6xf32>, vector<6x24xf32>, vector<6x24xf32> -> vector<6x24xf32>
    %c0_669 = arith.constant 0 : index
    %c0_670 = arith.constant 0 : index
    %909 = vector.load %arg33[%c0_669, %c0_670] : memref<1x24xf32, #tpu.memory_space<vmem>>, vector<1x24xf32>
    %910 = vector.broadcast %909 : vector<1x24xf32> to vector<6x24xf32>
    %911 = arith.addf %908, %910 : vector<6x24xf32>
    %cst_671 = arith.constant 0.000000e+00 : f32
    %912 = vector.broadcast %cst_671 : f32 to vector<6x24xf32>
    %913 = arith.maximumf %911, %912 : vector<6x24xf32>
    %c0_672 = arith.constant 0 : index
    %c0_673 = arith.constant 0 : index
    %914 = vector.load %arg34[%c0_672, %c0_673] : memref<24x32xf32, #tpu.memory_space<vmem>>, vector<24x32xf32>
    %cst_674 = arith.constant dense<0.000000e+00> : vector<6x32xf32>
    %915 = tpu.matmul %913, %914, %cst_674 {dimension_numbers = #tpu.dot_dimension_numbers<[1], [0], [0], [1], [0, 0, 1, 1], [], []>} : vector<6x24xf32>, vector<24x32xf32>, vector<6x32xf32> -> vector<6x32xf32>
    %cst_675 = arith.constant dense<0.000000e+00> : vector<6x32xf32>
    %916 = tpu.matmul %905, %915, %cst_675 {dimension_numbers = #tpu.dot_dimension_numbers<[1], [0], [0], [1], [0, 0, 1, 1], [], []>} : vector<6x6xf32>, vector<6x32xf32>, vector<6x32xf32> -> vector<6x32xf32>
    %c0_676 = arith.constant 0 : index
    %c0_677 = arith.constant 0 : index
    %917 = vector.load %arg35[%c0_676, %c0_677] : memref<1x32xf32, #tpu.memory_space<vmem>>, vector<1x32xf32>
    %918 = vector.broadcast %917 : vector<1x32xf32> to vector<6x32xf32>
    %919 = arith.addf %916, %918 : vector<6x32xf32>
    %c0_678 = arith.constant 0 : index
    %c0_679 = arith.constant 0 : index
    %920 = vector.load %arg36[%c0_678, %c0_679] : memref<16x2xf32, #tpu.memory_space<vmem>>, vector<16x2xf32>
    %c0_680 = arith.constant 0 : index
    %c0_681 = arith.constant 0 : index
    %921 = vector.load %arg37[%c0_680, %c0_681] : memref<1x2xf32, #tpu.memory_space<vmem>>, vector<1x2xf32>
    %922 = vector.extract_strided_slice %920 {offsets = [0, 0], sizes = [16, 1], strides = [1, 1]} : vector<16x2xf32> to vector<16x1xf32>
    %923 = vector.extract_strided_slice %920 {offsets = [0, 1], sizes = [16, 1], strides = [1, 1]} : vector<16x2xf32> to vector<16x1xf32>
    %924 = arith.subf %922, %923 : vector<16x1xf32>
    %cst_682 = arith.constant dense<0.000000e+00> : vector<22x1xf32>
    %925 = tpu.matmul %890, %924, %cst_682 {dimension_numbers = #tpu.dot_dimension_numbers<[1], [0], [0], [1], [0, 0, 1, 1], [], []>} : vector<22x16xf32>, vector<16x1xf32>, vector<22x1xf32> -> vector<22x1xf32>
    %926 = vector.extract_strided_slice %921 {offsets = [0, 0], sizes = [1, 1], strides = [1, 1]} : vector<1x2xf32> to vector<1x1xf32>
    %927 = vector.extract_strided_slice %921 {offsets = [0, 1], sizes = [1, 1], strides = [1, 1]} : vector<1x2xf32> to vector<1x1xf32>
    %928 = arith.subf %926, %927 : vector<1x1xf32>
    %929 = vector.broadcast %928 : vector<1x1xf32> to vector<22x1xf32>
    %930 = arith.addf %925, %929 : vector<22x1xf32>
    %cst_683 = arith.constant 0.000000e+00 : f32
    %931 = vector.broadcast %cst_683 : f32 to vector<22x1xf32>
    %932 = arith.subf %931, %930 : vector<22x1xf32>
    %933 = math.exp %932 : vector<22x1xf32>
    %cst_684 = arith.constant 1.000000e+00 : f32
    %934 = vector.broadcast %cst_684 : f32 to vector<22x1xf32>
    %935 = arith.addf %934, %933 : vector<22x1xf32>
    %cst_685 = arith.constant 1.000000e+00 : f32
    %936 = vector.broadcast %cst_685 : f32 to vector<22x1xf32>
    %937 = arith.divf %936, %935 : vector<22x1xf32>
    %cst_686 = arith.constant 1.000000e+00 : f32
    %938 = vector.broadcast %cst_686 : f32 to vector<22x1xf32>
    %939 = arith.subf %938, %937 : vector<22x1xf32>
    %940 = vector.extract_strided_slice %937 {offsets = [0, 0], sizes = [4, 1], strides = [1, 1]} : vector<22x1xf32> to vector<4x1xf32>
    %941 = vector.broadcast %940 : vector<4x1xf32> to vector<4x32xf32>
    %942 = arith.mulf %887, %941 : vector<4x32xf32>
    %943 = vector.extract_strided_slice %904 {offsets = [0, 0], sizes = [4, 32], strides = [1, 1]} : vector<22x32xf32> to vector<4x32xf32>
    %944 = vector.extract_strided_slice %939 {offsets = [0, 0], sizes = [4, 1], strides = [1, 1]} : vector<22x1xf32> to vector<4x1xf32>
    %945 = vector.broadcast %944 : vector<4x1xf32> to vector<4x32xf32>
    %946 = arith.mulf %943, %945 : vector<4x32xf32>
    %947 = arith.addf %942, %946 : vector<4x32xf32>
    %c0_687 = arith.constant 0 : index
    %c0_688 = arith.constant 0 : index
    %948 = vector.load %arg38[%c0_687, %c0_688] : memref<4x32xf32, #tpu.memory_space<vmem>>, vector<4x32xf32>
    tpu.vector_store %arg38[%c0_687, %c0_688], %947 {strides = array<i32>} : memref<4x32xf32, #tpu.memory_space<vmem>>, vector<4x32xf32>,
    %949 = vector.extract_strided_slice %937 {offsets = [16, 0], sizes = [6, 1], strides = [1, 1]} : vector<22x1xf32> to vector<6x1xf32>
    %950 = vector.broadcast %949 : vector<6x1xf32> to vector<6x32xf32>
    %951 = arith.mulf %919, %950 : vector<6x32xf32>
    %952 = vector.extract_strided_slice %904 {offsets = [16, 0], sizes = [6, 32], strides = [1, 1]} : vector<22x32xf32> to vector<6x32xf32>
    %953 = vector.extract_strided_slice %939 {offsets = [16, 0], sizes = [6, 1], strides = [1, 1]} : vector<22x1xf32> to vector<6x1xf32>
    %954 = vector.broadcast %953 : vector<6x1xf32> to vector<6x32xf32>
    %955 = arith.mulf %952, %954 : vector<6x32xf32>
    %956 = arith.addf %951, %955 : vector<6x32xf32>
    %c0_689 = arith.constant 0 : index
    %c0_690 = arith.constant 0 : index
    %957 = vector.load %arg39[%c0_689, %c0_690] : memref<6x32xf32, #tpu.memory_space<vmem>>, vector<6x32xf32>
    tpu.vector_store %arg39[%c0_689, %c0_690], %956 {strides = array<i32>} : memref<6x32xf32, #tpu.memory_space<vmem>>, vector<6x32xf32>,
    return
  }
}

</mosaic_0001>

<bundles_post_ra>
// kernel: eq.24
= control target key start
LH: loop header
LB: loop body
LE: loop exit
PB: predicated region body
PF: predicated region fallthrough
CT: control target
= control target key end

     0   :  { %vm7_vm0 = vcmask 64512   ;;  %vm13_vm1 = vcmask 130112   ;;  %s39_s0 = inlined_call_operand.vmem [shape: s32[2,8], index: 0, kind: input, shape index: {}]   ;;  %s40_s1 = inlined_call_operand.vmem [shape: s32[16], index: 1, kind: output, shape index: {}]  }
   0x1   :  { %v4_v0 = vld [vmem:[%s39_s0] sm:$0x3]  ;;  %s22_s0 = smov 8  }
   0x2   :  { %5 = vst [vmem:[#allocation1] sm:$0x3] %v4_v0 }
   0x9   :  { %v10_v1 = vld [vmem:[#allocation1 + $0x1] sm:$0x1]   ;;  %v6_v2 = vld [vmem:[#allocation1] sm:$0x1]  }
   0xa   :  { %11 = vrot.lane.b32.xlu0 %v10_v1, %s22_s0  ;;  %8 = vst.msk [vmem:[#allocation0] sm:$0x1] %vm7_vm0, %v6_v2  }
  0x7c   :  { %v12_v3 = vpop.permute.xlu0 %11  }
  0x7d   :  { %14 = vst.msk [vmem:[#allocation0] sm:$0x1] %vm13_vm1, %v12_v3  }
  0x84   :  { %v17_v4 = vld [vmem:[#allocation0] sm:$0x1] }
  0x85   :  { %20 = vst [vmem:[%s40_s1] sm:$0x1] %v17_v4 }

// kernel: eq.31
= control target key start
LH: loop header
LB: loop body
LE: loop exit
PB: predicated region body
PF: predicated region fallthrough
CT: control target
= control target key end

     0   :  { %vm7_vm0 = vcmask 31744   ;;  %vm13_vm1 = vcmask 64544   ;;  %s39_s0 = inlined_call_operand.vmem [shape: s32[2,4], index: 0, kind: input, shape index: {}]   ;;  %s40_s1 = inlined_call_operand.vmem [shape: s32[8], index: 1, kind: output, shape index: {}]  }
   0x1   :  { %v4_v0 = vld [vmem:[%s39_s0] sm:$0x3]  ;;  %s22_s0 = smov 4  }
   0x2   :  { %5 = vst [vmem:[#allocation1] sm:$0x3] %v4_v0 }
   0x9   :  { %v10_v1 = vld [vmem:[#allocation1 + $0x1] sm:$0x1]   ;;  %v6_v2 = vld [vmem:[#allocation1] sm:$0x1]  }
   0xa   :  { %11 = vrot.lane.b32.xlu0 %v10_v1, %s22_s0  ;;  %8 = vst.msk [vmem:[#allocation0] sm:$0x1] %vm7_vm0, %v6_v2  }
  0x7c   :  { %v12_v3 = vpop.permute.xlu0 %11  }
  0x7d   :  { %14 = vst.msk [vmem:[#allocation0] sm:$0x1] %vm13_vm1, %v12_v3  }
  0x84   :  { %v17_v4 = vld [vmem:[#allocation0] sm:$0x1] }
  0x85   :  { %20 = vst [vmem:[%s40_s1] sm:$0x1] %v17_v4 }

// kernel: eq.38
= control target key start
LH: loop header
LB: loop body
LE: loop exit
PB: predicated region body
PF: predicated region fallthrough
CT: control target
= control target key end

     0   :  { %vm7_vm0 = vcmask 15360   ;;  %vm13_vm1 = vcmask 31760   ;;  %s39_s0 = inlined_call_operand.vmem [shape: s32[2,2], index: 0, kind: input, shape index: {}]   ;;  %s40_s1 = inlined_call_operand.vmem [shape: s32[4], index: 1, kind: output, shape index: {}]  }
   0x1   :  { %v4_v0 = vld [vmem:[%s39_s0] sm:$0x3]  ;;  %s22_s0 = smov 2  }
   0x2   :  { %5 = vst [vmem:[#allocation1] sm:$0x3] %v4_v0 }
   0x9   :  { %v10_v1 = vld [vmem:[#allocation1 + $0x1] sm:$0x1]   ;;  %v6_v2 = vld [vmem:[#allocation1] sm:$0x1]  }
   0xa   :  { %11 = vrot.lane.b32.xlu0 %v10_v1, %s22_s0  ;;  %8 = vst.msk [vmem:[#allocation0] sm:$0x1] %vm7_vm0, %v6_v2  }
  0x7c   :  { %v12_v3 = vpop.permute.xlu0 %11  }
  0x7d   :  { %14 = vst.msk [vmem:[#allocation0] sm:$0x1] %vm13_vm1, %v12_v3  }
  0x84   :  { %v17_v4 = vld [vmem:[#allocation0] sm:$0x1] }
  0x85   :  { %20 = vst [vmem:[%s40_s1] sm:$0x1] %v17_v4 }

// kernel: extraction_network_forward.1
= control target key start
LH: loop header
LB: loop body
LE: loop exit
PB: predicated region body
PF: predicated region fallthrough
CT: control target
= control target key end

     0   :  { %s5004_s6 = smov 1   ;;  %s5005_s10 = smov 2   ;;  %s6064_s0 = inlined_call_operand.smem [shape: u32[40], index: -1, kind: input, shape index: {}] }
   0x1   :  { %s5060_s5 = sld [smem:[%s6064_s0]]   ;;  %s5006_s14 = smov 3  }
   0x2   :  { %s5065_s9 = sld [smem:[%s6064_s0 + %s5004_s6]]   ;;  %s5007_s18 = smov 4  }
   0x3   :  { %s5070_s13 = sld [smem:[%s6064_s0 + %s5005_s10]]   ;;  %s5008_s22 = smov 5  }
   0x4   :  { %s5075_s17 = sld [smem:[%s6064_s0 + %s5006_s14]]   ;;  %s5009_s26 = smov 6  }
   0x5   :  { %s5080_s21 = sld [smem:[%s6064_s0 + %s5007_s18]]   ;;  %s5010_s30 = smov 7  }
   0x6   :  { %s5085_s25 = sld [smem:[%s6064_s0 + %s5008_s22]]   ;;  %s5011_s4 = smov 8  }
   0x7   :  { %s5090_s29 = sld [smem:[%s6064_s0 + %s5009_s26]]   ;;  %s5012_s10 = smov 9  }
   0x8   :  { %6077 = sst [smem:[#allocation8_spill]] %s5065_s9  ;;  %s5013_s15 = smov 10  }
   0x9   :  { %6078 = sst [smem:[#allocation9_spill]] %s5070_s13  ;;  %s5014_s20 = smov 11  }
   0xa   :  { %s5095_s3 = sld [smem:[%s6064_s0 + %s5010_s30]]   ;;  %s5015_s26 = smov 12  }
   0xb   :  { %6079 = sst [smem:[#allocation10_spill]] %s5080_s21  ;;  %s5016_s1 = smov 13  }
   0xc   :  { %6080 = sst [smem:[#allocation11_spill]] %s5085_s25  ;;  %s5017_s7 = smov 14  }
   0xd   :  { %s5100_s8 = sld [smem:[%s6064_s0 + %s5011_s4]]   ;;  %s5019_s22 = smov 16  }
   0xe   :  { %s5105_s14 = sld [smem:[%s6064_s0 + %s5012_s10]]   ;;  %s5020_s28 = smov 17  }
   0xf   :  { %s5110_s19 = sld [smem:[%s6064_s0 + %s5013_s15]]   ;;  %s5018_s15 = smov 15  }
  0x10   :  { %s5115_s24 = sld [smem:[%s6064_s0 + %s5014_s20]]  }
  0x11   :  { %s5120_s30 = sld [smem:[%s6064_s0 + %s5015_s26]]  }
  0x12   :  { %s5125_s6 = sld [smem:[%s6064_s0 + %s5016_s1]]  }
  0x13   :  { %s5130_s12 = sld [smem:[%s6064_s0 + %s5017_s7]]   ;;  %s5021_s7 = smov 18  }
  0x14   :  { %s5135_s20 = sld [smem:[%s6064_s0 + %s5018_s15]]   ;;  %s5022_s15 = smov 19  }
  0x15   :  { %s5140_s27 = sld [smem:[%s6064_s0 + %s5019_s22]]   ;;  %s5023_s22 = smov 20  }
  0x16   :  { %s5145_s4 = sld [smem:[%s6064_s0 + %s5020_s28]]   ;;  %s5024_s28 = smov 21  }
  0x17   :  { %s5150_s13 = sld [smem:[%s6064_s0 + %s5021_s7]]   ;;  %s5025_s7 = smov 22  }
  0x18   :  { %s5155_s9 = sld [smem:[%s6064_s0 + %s5022_s15]]   ;;  %s5026_s15 = smov 23  }
  0x19   :  { %s5160_s25 = sld [smem:[%s6064_s0 + %s5023_s22]]   ;;  %s5027_s22 = smov 24  }
  0x1a   :  { %s5165_s21 = sld [smem:[%s6064_s0 + %s5024_s28]]   ;;  %s5028_s28 = smov 25  }
  0x1c   :  { %6081 = sst [smem:[#allocation12_spill]] %s5145_s4 }
  0x1d   :  { %6082 = sst [smem:[#allocation13_spill]] %s5150_s13 }
  0x1e   :  { %6083 = sst [smem:[#allocation14_spill]] %s5155_s9 }
  0x1f   :  { %s5170_s4 = sld [smem:[%s6064_s0 + %s5025_s7]]   ;;  %s5029_s7 = smov 26  }
  0x20   :  { %6084 = sst [smem:[#allocation15_spill]] %s5165_s21 }
  0x21   :  { %s5175_s9 = sld [smem:[%s6064_s0 + %s5026_s15]]   ;;  %s5030_s15 = smov 27  }
  0x22   :  { %s5180_s13 = sld [smem:[%s6064_s0 + %s5027_s22]]   ;;  %s5031_s22 = smov 28  }
  0x23   :  { %s5185_s21 = sld [smem:[%s6064_s0 + %s5028_s28]]   ;;  %s5032_s28 = smov 29  }
  0x25   :  { %6085 = sst [smem:[#allocation16_spill]] %s5170_s4 }
  0x26   :  { %s5190_s4 = sld [smem:[%s6064_s0 + %s5029_s7]]   ;;  %s5033_s7 = smov 30  }
  0x27   :  { %6086 = sst [smem:[#allocation17_spill]] %s5175_s9 }
  0x28   :  { %6087 = sst [smem:[#allocation18_spill]] %s5180_s13 }
  0x29   :  { %6088 = sst [smem:[#allocation19_spill]] %s5185_s21 }
  0x2a   :  { %s5195_s9 = sld [smem:[%s6064_s0 + %s5030_s15]]   ;;  %s5034_s15 = smov 31  }
  0x2b   :  { %s5200_s13 = sld [smem:[%s6064_s0 + %s5031_s22]]   ;;  %s5035_s22 = smov 32  }
  0x2c   :  { %6089 = sst [smem:[#allocation20_spill]] %s5190_s4 }
  0x2d   :  { %s5205_s21 = sld [smem:[%s6064_s0 + %s5032_s28]]   ;;  %s5036_s28 = smov 33  }
  0x2e   :  { %s5210_s4 = sld [smem:[%s6064_s0 + %s5033_s7]]   ;;  %s5037_s7 = smov 34  }
  0x30   :  { %6090 = sst [smem:[#allocation21_spill]] %s5195_s9 }
  0x31   :  { %6091 = sst [smem:[#allocation22_spill]] %s5200_s13 }
  0x32   :  { %s5215_s9 = sld [smem:[%s6064_s0 + %s5034_s15]]   ;;  %s5038_s15 = smov 35  }
  0x33   :  { %6092 = sst [smem:[#allocation23_spill]] %s5205_s21 }
  0x34   :  { %6093 = sst [smem:[#allocation24_spill]] %s5210_s4 }
  0x35   :  { %s5220_s13 = sld [smem:[%s6064_s0 + %s5035_s22]]   ;;  %s5039_s22 = smov 36  }
  0x36   :  { %s5225_s21 = sld [smem:[%s6064_s0 + %s5036_s28]]   ;;  %s5040_s28 = smov 37  }
  0x37   :  { %s5230_s4 = sld [smem:[%s6064_s0 + %s5037_s7]]   ;;  %s5041_s7 = smov 38  }
  0x38   :  { %6094 = sst [smem:[#allocation25_spill]] %s5215_s9 }
  0x39   :  { %s5235_s9 = sld [smem:[%s6064_s0 + %s5038_s15]]   ;;  %s5042_s15 = smov 39  }
  0x3b   :  { %6095 = sst [smem:[#allocation26_spill]] %s5220_s13 }
  0x3c   :  { %6096 = sst [smem:[#allocation27_spill]] %s5225_s21 }
  0x3d   :  { %6097 = sst [smem:[#allocation28_spill]] %s5230_s4 }
  0x3e   :  { %s5240_s13 = sld [smem:[%s6064_s0 + %s5039_s22]]  }
  0x3f   :  { %6098 = sst [smem:[#allocation29_spill]] %s5235_s9 }
  0x40   :  { %s5245_s21 = sld [smem:[%s6064_s0 + %s5040_s28]]  }
  0x41   :  { %s5250_s4 = sld [smem:[%s6064_s0 + %s5041_s7]]  }
  0x42   :  { %s5255_s9 = sld [smem:[%s6064_s0 + %s5042_s15]]  }
  0x43   :  { %85 = vsyncpa [#allocation3], 0  ;;  %v166_v0 = vld [vmem:[%s5095_s3 + $0x8] sm:$0xff]  ;;  %v165_v1 = vld [vmem:[%s5095_s3] sm:$0xff]  ;;  %vm189_vm0 = vcmask 130048  }
  0x44   :  { %v163_v2 = vld [vmem:[%s5060_s5] sm:$0xff]  ;;  %237 = vmatpush.msra.mxu2 %v166_v0  ;;  %v4339_v4 = vld [vmem:[%s5095_s3 + $0x18] sm:$0xff]  ;;  %v4338_v5 = vld [vmem:[%s5095_s3 + $0x10] sm:$0xff] }
  0x45   :  { %v175_v3 = vrot.slane %v163_v2, 7  ;;  %v164_v6 = vld [vmem:[%s5060_s5 + $0x8] sm:$0xff]  ;;  %208 = vmatpush.msra.mxu0 %v4339_v4  ;;  %4726 = vmatpush.msra.mxu3 %v4339_v4  ;;  %v182_v9 = vrot.slane %v163_v2, 1  ;;  %v4340_v10 = vld [vmem:[%s5095_s3 + $0x20] sm:$0xff] }
  0x46   :  { %v176_v7 = vrot.slane %v164_v6, 7  ;;  %v4341_v8 = vld [vmem:[%s5095_s3 + $0x28] sm:$0xff]  ;;  %238 = vmatpush.msra.mxu2 %v165_v1  ;;  %v183_v11 = vrot.slane %v164_v6, 1 }
  0x47   :  { %4344 = vmatmul.msk.f32.vlgmr.msra.gmra.mxu2 %vm189_vm0, %v175_v3  ;;  %209 = vmatpush.msra.mxu0 %v4338_v5 }
  0x48   :  { %4342 = vmatmul.msk.f32.vlgmr.msra.gmra.mxu0 %vm189_vm0, %v163_v2  ;;  %4727 = vmatpush.msra.mxu3 %v4338_v5 }
  0x49   :  { %4343 = vmatmul.msk.f32.vlgmr.msra.gmra.mxu3 %vm189_vm0, %v164_v6  ;;  %266 = vmatpush.msrb.mxu2 %v4341_v8 }
  0x4b   :  { %267 = vmatpush.msrb.mxu2 %v4340_v10 }
  0x4f   :  { %4345 = vmatmul.msk.f32.gmra.mxu2 %vm189_vm0, %v176_v7 }
  0x57   :  { %4346 = vmatmul.msk.f32.vlgmr.msrb.gmra.mxu2 %vm189_vm0, %v182_v9 }
  0x58   :  { %86 = vsyncpa [#allocation5], 0  ;;  %v285_v12 = vld [vmem:[%s5100_s8 + $0x18] sm:$0xff]  ;;  %v284_v15 = vld [vmem:[%s5100_s8 + $0x10] sm:$0xff]  ;;  %vm290_vm1 = vcmask 261120   ;;  %vm384_vm2 = vcmask 64512  }
  0x59   :  { %v325_v13 = vld [vmem:[%s5110_s19 + $0x18] sm:$0xff]  ;;  %309 = vmatpush.msrb.mxu3 %v285_v12  ;;  %v324_v16 = vld [vmem:[%s5110_s19 + $0x10] sm:$0xff]  ;;  %v283_v18 = vld [vmem:[%s5100_s8 + $0x8] sm:$0xff]  ;;  %s6099_s0 = sld [smem:[#allocation15_spill]]  ;;  %s5050_s7 = smov [#allocation4]  }
  0x5a   :  { %v356_v14 = vld [vmem:[%s5120_s30 + $0x18] sm:$0xff]  ;;  %342 = vmatpush.msrb.mxu0 %v325_v13  ;;  %v355_v17 = vld [vmem:[%s5120_s30 + $0x10] sm:$0xff]  ;;  %v323_v19 = vld [vmem:[%s5110_s19 + $0x8] sm:$0xff]  ;;  %s6102_s3 = sld [smem:[#allocation14_spill]]  ;;  %s6050_s10 = sshll.u32 %s5050_s7, 4  ;;  %s4284_s10 = int_to_ptr.vmem [resolvable:$true] %s6050_s10 }
  0x5b   :  { %373 = vmatpush.msra.mxu1 %v356_v14  ;;  %310 = vmatpush.msrb.mxu3 %v284_v15  ;;  %v354_v20 = vld [vmem:[%s5120_s30 + $0x8] sm:$0xff]  ;;  %v282_v21 = vld [vmem:[%s5100_s8] sm:$0xff]  ;;  %v4363_v24 = vld [vmem:[%s5100_s8 + $0x38] sm:$0xff]  ;;  %s6103_s22 = sld [smem:[#allocation18_spill]]  ;;  %s4285_s11 = sshll.u32 %s5255_s9, 4  ;;  %s4286_s11 = int_to_ptr.hbm [resolvable:$true] %s4285_s11 }
  0x5c   :  { %343 = vmatpush.msrb.mxu0 %v324_v16  ;;  %v322_v22 = vld [vmem:[%s5110_s19] sm:$0xff]  ;;  %v4370_v25 = vld [vmem:[%s5110_s19 + $0x38] sm:$0xff]  ;;  %v4362_v26 = vld [vmem:[%s5100_s8 + $0x30] sm:$0xff]  ;;  %s6104_s23 = sld [smem:[#allocation16_spill]]  ;;  %s4964_s15 = sshra.s32 %s4286_s11, 4  ;;  %s4965_s15 = int_to_ptr.hbm [resolvable:$true] %s4964_s15 }
  0x5d   :  { %374 = vmatpush.msra.mxu1 %v355_v17  ;;  %311 = vmatpush.msrb.mxu3 %v283_v18  ;;  %v353_v23 = vld [vmem:[%s5120_s30] sm:$0xff]  ;;  %v4369_v27 = vld [vmem:[%s5110_s19 + $0x30] sm:$0xff]  ;;  %v4361_v29 = vld [vmem:[%s5100_s8 + $0x28] sm:$0xff]  ;;  %s6105_s26 = sld [smem:[#allocation17_spill]]  ;;  %s4966_s16 = scalar_lea.hbm %s4965_s15, 8 }
  0x5e   :  { %344 = vmatpush.msrb.mxu0 %v323_v19  ;;  %v4368_v30 = vld [vmem:[%s5110_s19 + $0x28] sm:$0xff]  ;;  %v4360_v31 = vld [vmem:[%s5100_s8 + $0x20] sm:$0xff]  ;;  %v4377_v58 = vld [vmem:[%s5120_s30 + $0x38] sm:$0xff]  ;;  %s6106_s28 = sld [smem:[#allocation19_spill]]  ;;  %p4967_p0 = scmp.ne.s32.totalorder %s4965_s15, %s4966_s16 }
  0x5f   :  { %4347 = vmatmul.msk.f32.gmra.mxu2 %vm189_vm0, %v183_v11  ;;  %375 = vmatpush.msra.mxu1 %v354_v20  ;;  %v4367_v32 = vld [vmem:[%s5110_s19 + $0x20] sm:$0xff]  ;;  %v4376_v60 = vld [vmem:[%s5120_s30 + $0x30] sm:$0xff]  ;;  %v4375_v63 = vld [vmem:[%s5120_s30 + $0x28] sm:$0xff]  ;;  %s6107_s1 = sld [smem:[#allocation10_spill]]  ;;  %s4968_s18 = scalar_lea.hbm %s5255_s9, 8 }
  0x60   :  { %312 = vmatpush.msrb.mxu3 %v282_v21  ;;  %345 = vmatpush.msrb.mxu0 %v322_v22  ;;  %v277_v37 = vld [vmem:[%s5090_s29] sm:$0xff]  ;;  %v5340_v11 = vld [vmem:[%s5075_s17 + $0x8] sm:$0xff]  ;;  %s6101_s29 = sld [smem:[#allocation12_spill]]  ;;  %p4969_p1 = scmp.lt.s32.totalorder %s4965_s15, %s5255_s9 }
  0x61   :  { %376 = vmatpush.msra.mxu1 %v353_v23  ;;  %v4779_v47 = vld [vmem:[%s5115_s24] ss:$0 sm:$0xff]  ;;  %v4783_v3 = vld [vmem:[%s5115_s24 + $0x1] ss:$0 sm:$0xff]  ;;  %s6108_s2 = sld [smem:[#allocation11_spill]]  ;;  %p4970_p2 = scmp.lt.s32.totalorder %s4968_s18, %s4966_s16 }
  0x62   :  { %494 = vmatpush.msra.mxu0 %v4363_v24  ;;  %v4780_v49 = vld [vmem:[%s5125_s6] ss:$0 sm:$0xff]  ;;  %v4784_v16 = vld [vmem:[%s5125_s6 + $0x1] ss:$0 sm:$0xff] }
  0x63   :  { %529 = vmatpush.msrb.mxu1 %v4370_v25  ;;  %v4781_v50 = vld [vmem:[%s5105_s14] ss:$0 sm:$0xff]  ;;  %p4971_p3 = por %p4970_p2, %p4969_p1 }
  0x64   :  { %495 = vmatpush.msra.mxu0 %v4362_v26  ;;  %v4374_v1 = vld [vmem:[%s5120_s30 + $0x20] sm:$0xff] }
  0x65   :  { %530 = vmatpush.msrb.mxu1 %v4369_v27  ;;  %v5335_v7 = vld [vmem:[%s5075_s17] sm:$0xff]  ;;  %s6100_s17 = sld [smem:[#allocation13_spill]]  ;;  %p4972_p4 = pnand %p4971_p3, %p4967_p0 }
  0x66   :  { %496 = vmatpush.msra.mxu0 %v4361_v29 }
  0x67   :  { %531 = vmatpush.msrb.mxu1 %v4368_v30 }
  0x68   :  { %497 = vmatpush.msra.mxu0 %v4360_v31 }
  0x69   :  { %532 = vmatpush.msrb.mxu1 %v4367_v32 }
  0xc5   :  { %v211_v34 = vpop.f32.mrf.mxu0 }
  0xca   :  { %v240_v28 = vpop.f32.mrf.mxu2 }
  0xcb   :  { %v241_v35 = vadd.f32 %v240_v28, %v211_v34  ;;  %v4395_v34 = vld [vmem:[%s5100_s8 + $0x58] sm:$0xff] }
  0xcc   :  { %v214_v40 = vpop.f32.mrf.mxu3 }
  0xd2   :  { %v243_v33 = vpop.f32.mrf.mxu2 }
  0xd3   :  { %v244_v41 = vadd.f32 %v243_v33, %v214_v40 }
  0xda   :  { %v269_v36 = vpop.f32.mrf.mxu2 }
  0xdb   :  { %v275_v38 = vadd.f32 %v269_v36, %v241_v35  ;;  %v4394_v35 = vld [vmem:[%s5100_s8 + $0x50] sm:$0xff]  ;;  %v4393_v36 = vld [vmem:[%s5100_s8 + $0x48] sm:$0xff] }
  0xdd   :  { %v5292_v39 = vadd.f32 %v277_v37, %v275_v38 }
  0xdf   :  { %4348 = vmatmul.msk.f32.vlgmr.msrb.gmra.mxu3 %vm290_vm1, %v5292_v39  ;;  %4350 = vmatmul.msk.f32.vlgmr.msrb.gmra.mxu0 %vm290_vm1, %v5292_v39 }
  0xe0   :  { %4352 = vmatmul.msk.f32.vlgmr.msra.gmra.mxu1 %vm290_vm1, %v5292_v39 }
  0xe2   :  { %v272_v42 = vpop.f32.mrf.mxu2 }
  0xe3   :  { %v276_v43 = vadd.f32 %v272_v42, %v244_v41  ;;  %v4782_v41 = vld [vmem:[%s5105_s14 + $0x1] ss:$0 sm:$0xff] }
  0xe5   :  { %v5300_v44 = vadd.f32 %v277_v37, %v276_v43  ;;  %v4392_v37 = vld [vmem:[%s5100_s8 + $0x40] sm:$0xff] }
  0xe7   :  { %4349 = vmatmul.msk.f32.gmra.mxu3 %vm290_vm1, %v5300_v44  ;;  %4351 = vmatmul.msk.f32.gmra.mxu0 %vm290_vm1, %v5300_v44 }
  0xe8   :  { %4353 = vmatmul.msk.f32.gmra.mxu1 %vm290_vm1, %v5300_v44 }
  0xef   :  { %4365 = vmatmul.msk.f32.vlgmr.msra.gmra.mxu0 %vm290_vm1, %v5292_v39 }
  0xf0   :  { %4372 = vmatmul.msk.f32.vlgmr.msrb.gmra.mxu1 %vm290_vm1, %v5292_v39 }
  0xf7   :  { %4366 = vmatmul.msk.f32.gmra.mxu0 %vm290_vm1, %v5300_v44 }
  0xf8   :  { %4373 = vmatmul.msk.f32.gmra.mxu1 %vm290_vm1, %v5300_v44 }
 0x15c   :  { %v347_v45 = vpop.f32.mrf.mxu0 }
 0x15d   :  { %v378_v46 = vpop.f32.mrf.mxu1  ;;  %v348_v57 = vadd.f32 %v4779_v47, %v347_v45 }
 0x15e   :  { %v379_v55 = vadd.f32 %v4780_v49, %v378_v46 }
 0x162   :  { %v314_v48 = vpop.f32.mrf.mxu3 }
 0x163   :  { %v315_v56 = vadd.f32 %v4781_v50, %v314_v48 }
 0x164   :  { %v350_v51 = vpop.f32.mrf.mxu0 }
 0x165   :  { %v351_v52 = vadd.f32 %v4779_v47, %v350_v51  ;;  %v381_v53 = vpop.f32.mrf.mxu1  ;;  %v320_v59 = vmul.f32 0.35355338, %v315_v56 }
 0x166   :  { %v382_v54 = vadd.f32 %v4780_v49, %v381_v53  ;;  %v471_v49 = vld [vmem:[%s5130_s12] sm:$0xff] }
 0x167   :  { %4354 = vmatpush.xpose.msk.msra.mxu2 %vm384_vm2, %v351_v52 }
 0x168   :  { %462 = vmatpush.msra.mxu3 %v382_v54 }
 0x16a   :  { %463 = vmatpush.msra.mxu3 %v379_v55  ;;  %v317_v61 = vpop.f32.mrf.mxu3 }
 0x16b   :  { %4355 = vmatpush.xpose.msk.msra.mxu2 %vm384_vm2, %v348_v57  ;;  %v318_v0 = vadd.f32 %v4781_v50, %v317_v61 }
 0x16c   :  { %v499_v40 = vpop.f32.mrf.mxu0 }
 0x16d   :  { %v534_v62 = vpop.f32.mrf.mxu1  ;;  %v321_v2 = vmul.f32 0.35355338, %v318_v0  ;;  %v500_v43 = vadd.f32 %v4782_v41, %v499_v40  ;;  %v4430_v40 = vld [vmem:[%s5110_s19 + $0x68] sm:$0xff] }
 0x16e   :  { %4356 = vmatmul.msk.f32.vlgmr.msra.gmra.mxu2 %vm384_vm2, %v320_v59  ;;  %v535_v6 = vadd.f32 %v4783_v3, %v534_v62 }
 0x16f   :  { %562 = vmatpush.msrb.mxu2 %v4377_v58  ;;  %v505_v45 = vmul.f32 0.35355338, %v500_v43 }
 0x171   :  { %563 = vmatpush.msrb.mxu2 %v4376_v60 }
 0x173   :  { %564 = vmatpush.msrb.mxu2 %v4375_v63 }
 0x174   :  { %v502_v46 = vpop.f32.mrf.mxu0 }
 0x175   :  { %565 = vmatpush.msrb.mxu2 %v4374_v1  ;;  %v537_v4 = vpop.f32.mrf.mxu1  ;;  %v503_v47 = vadd.f32 %v4782_v41, %v502_v46 }
 0x176   :  { %v538_v5 = vadd.f32 %v4783_v3, %v537_v4  ;;  %4357 = vmatmul.msk.f32.gmra.mxu2 %vm384_vm2, %v321_v2  ;;  %v4402_v4 = vld [vmem:[%s5110_s19 + $0x58] sm:$0xff] }
 0x177   :  { %v506_v48 = vmul.f32 0.35355338, %v503_v47  ;;  %711 = vmatpush.msra.mxu2 %v471_v49  ;;  %v4787_v49 = vld [vmem:[%s5125_s6 + $0x2] ss:$0 sm:$0xff] }
 0x178   :  { %4381 = vmatpush.xpose.msk.msrb.mxu3 %vm384_vm2, %v538_v5  ;;  %v4401_v5 = vld [vmem:[%s5110_s19 + $0x50] sm:$0xff] }
 0x17c   :  { %4382 = vmatpush.xpose.msk.msrb.mxu3 %vm384_vm2, %v535_v6  ;;  %v4400_v6 = vld [vmem:[%s5110_s19 + $0x48] sm:$0xff] }
 0x17e   :  { %4379 = vmatmul.msk.f32.vlgmr.msrb.gmra.mxu2 %vm290_vm1, %v5292_v39 }
 0x186   :  { %4380 = vmatmul.msk.f32.gmra.mxu2 %vm290_vm1, %v5300_v44 }
 0x1f1   :  { %v414_v8 = vpop.f32.mrf.mxu2 }
 0x1f2   :  { %v415_v9 = vadd.f32 %v414_v8, %v5335_v7  ;;  %v4399_v8 = vld [vmem:[%s5110_s19 + $0x40] sm:$0xff] }
 0x1f4   :  { %v420_v10 = vsel %vm189_vm0, %v415_v9, -inf }
 0x1f5   :  { %421 = vmax.xlane.f32.xlu0 %v420_v10 }
 0x1f9   :  { %v417_v12 = vpop.f32.mrf.mxu2 }
 0x1fa   :  { %v418_v13 = vadd.f32 %v417_v12, %v5340_v11 }
 0x1fc   :  { %v423_v14 = vsel %vm189_vm0, %v418_v13, -inf }
 0x1fd   :  { %424 = vmax.xlane.f32.xlu0 %v423_v14 }
 0x201   :  { %v567_v15 = vpop.f32.mrf.mxu2 }
 0x202   :  { %v568_v19 = vadd.f32 %v4784_v16, %v567_v15 }
 0x209   :  { %v570_v17 = vpop.f32.mrf.mxu2 }
 0x20a   :  { %v571_v18 = vadd.f32 %v4784_v16, %v570_v17  ;;  %v4387_v16 = vld [vmem:[%s5130_s12 + $0x8] sm:$0xff]  ;;  %v4409_v17 = vld [vmem:[%s5120_s30 + $0x58] sm:$0xff] }
 0x20b   :  { %682 = vmatpush.msra.mxu1 %v4387_v16  ;;  %v4437_v16 = vld [vmem:[%s5120_s30 + $0x68] sm:$0xff] }
 0x20c   :  { %650 = vmatpush.msrb.mxu0 %v571_v18  ;;  %v4408_v18 = vld [vmem:[%s5120_s30 + $0x50] sm:$0xff] }
 0x20d   :  { %809 = vmatpush.msrb.mxu1 %v4409_v17  ;;  %v4436_v17 = vld [vmem:[%s5120_s30 + $0x60] sm:$0xff] }
 0x20e   :  { %651 = vmatpush.msrb.mxu0 %v568_v19  ;;  %v4407_v19 = vld [vmem:[%s5120_s30 + $0x48] sm:$0xff] }
 0x20f   :  { %810 = vmatpush.msrb.mxu1 %v4408_v18 }
 0x210   :  { %776 = vmatpush.msra.mxu0 %v4402_v4 }
 0x211   :  { %811 = vmatpush.msrb.mxu1 %v4407_v19 }
 0x212   :  { %777 = vmatpush.msra.mxu0 %v4401_v5 }
 0x214   :  { %778 = vmatpush.msra.mxu0 %v4400_v6 }
 0x216   :  { %779 = vmatpush.msra.mxu0 %v4399_v8 }
 0x268   :  { %v422_v20 = vpop.xlane.xlu0 %421 }
 0x269   :  { %v426_v21 = vsub.f32 %v415_v9, %v422_v20  ;;  %v4406_v20 = vld [vmem:[%s5120_s30 + $0x40] sm:$0xff] }
 0x26a   :  { %812 = vmatpush.msrb.mxu1 %v4406_v20 }
 0x26b   :  { %v428_v22 = vmul.f32 1.442695, %v426_v21  ;;  %v4425_v21 = vld [vmem:[%s5100_s8 + $0x78] sm:$0xff] }
 0x26d   :  { %4844 = vpow2.f32 %v428_v22 }
 0x270   :  { %v425_v23 = vpop.xlane.xlu0 %424 }
 0x271   :  { %v427_v24 = vsub.f32 %v418_v13, %v425_v23  ;;  %v4424_v23 = vld [vmem:[%s5100_s8 + $0x70] sm:$0xff] }
 0x273   :  { %v4845_v25 = vpop.eup %4844  ;;  %v430_v26 = vmul.f32 1.442695, %v427_v24  ;;  %v4423_v24 = vld [vmem:[%s5100_s8 + $0x68] sm:$0xff] }
 0x274   :  { %v432_v27 = vsel %vm189_vm0, %v4845_v25, 0.0 }
 0x275   :  { %4846 = vpow2.f32 %v430_v26  ;;  %433 = vadd.xlane.f32.xlu1 %v432_v27 }
 0x27b   :  { %v4847_v28 = vpop.eup %4846 }
 0x27c   :  { %v435_v29 = vsel %vm189_vm0, %v4847_v28, 0.0 }
 0x27d   :  { %436 = vadd.xlane.f32.xlu1 %v435_v29  ;;  %v4786_v29 = vld [vmem:[%s5115_s24 + $0x2] ss:$0 sm:$0xff] }
 0x2e8   :  { %v434_v30 = vpop.xlane.xlu1 %433 }
 0x2e9   :  { %4848 = vrcp.f32 %v434_v30  ;;  %v4785_v30 = vld [vmem:[%s5105_s14 + $0x2] ss:$0 sm:$0xff] }
 0x2ef   :  { %v4849_v31 = vpop.eup %4848 }
 0x2f0   :  { %v440_v32 = vmul.f32 %v4849_v31, %v4845_v25  ;;  %v437_v33 = vpop.xlane.xlu1 %436  ;;  %v4422_v25 = vld [vmem:[%s5100_s8 + $0x60] sm:$0xff] }
 0x2f1   :  { %4850 = vrcp.f32 %v437_v33 }
 0x2f2   :  { %4358 = vmatmul.msk.f32.vlgmr.msra.gmra.mxu3 %vm189_vm0, %v440_v32 }
 0x2f3   :  { %741 = vmatpush.msra.mxu3 %v4395_v34 }
 0x2f5   :  { %742 = vmatpush.msra.mxu3 %v4394_v35  ;;  %v4432_v35 = vld [vmem:[%s5110_s19 + $0x78] sm:$0xff] }
 0x2f7   :  { %v4851_v38 = vpop.eup %4850  ;;  %743 = vmatpush.msra.mxu3 %v4393_v36 }
 0x2f8   :  { %v441_v42 = vmul.f32 %v4851_v38, %v4847_v28 }
 0x2f9   :  { %744 = vmatpush.msra.mxu3 %v4392_v37  ;;  %v4431_v37 = vld [vmem:[%s5110_s19 + $0x70] sm:$0xff] }
 0x2fa   :  { %4359 = vmatmul.msk.f32.gmra.mxu3 %vm189_vm0, %v441_v42  ;;  %v4429_v42 = vld [vmem:[%s5110_s19 + $0x60] sm:$0xff] }
 0x302   :  { %4383 = vmatmul.msk.f32.vlgmr.msrb.gmra.mxu3 %vm384_vm2, %v505_v45 }
 0x30a   :  { %4384 = vmatmul.msk.f32.gmra.mxu3 %vm384_vm2, %v506_v48 }
 0x312   :  { %4397 = vmatmul.msk.f32.vlgmr.msra.gmra.mxu3 %vm290_vm1, %v5292_v39 }
 0x31a   :  { %4398 = vmatmul.msk.f32.gmra.mxu3 %vm290_vm1, %v5300_v44 }
 0x375   :  { %v465_v50 = vpop.f32.mrf.mxu3 }
 0x376   :  { %4390 = vmatmul.msk.f32.vlgmr.msra.gmra.mxu2 %vm384_vm2, %v465_v50 }
 0x37d   :  { %v468_v51 = vpop.f32.mrf.mxu3 }
 0x37e   :  { %4391 = vmatmul.msk.f32.gmra.mxu2 %vm384_vm2, %v468_v51 }
 0x385   :  { %v602_v52 = vpop.f32.mrf.mxu3 }
 0x386   :  { %v603_v53 = vadd.f32 %v602_v52, %v5335_v7 }
 0x388   :  { %v608_v54 = vsel %vm189_vm0, %v603_v53, -inf }
 0x389   :  { %609 = vmax.xlane.f32.xlu2 %v608_v54  ;;  %v4419_v54 = vld [vmem:[%s5130_s12 + $0x10] sm:$0xff] }
 0x38d   :  { %v605_v55 = vpop.f32.mrf.mxu3 }
 0x38e   :  { %v606_v56 = vadd.f32 %v605_v55, %v5340_v11 }
 0x390   :  { %v611_v57 = vsel %vm189_vm0, %v606_v56, -inf }
 0x391   :  { %612 = vmax.xlane.f32.xlu2 %v611_v57 }
 0x395   :  { %v746_v28 = vpop.f32.mrf.mxu3 }
 0x396   :  { %v747_v33 = vadd.f32 %v4785_v30, %v746_v28 }
 0x398   :  { %v752_v36 = vmul.f32 0.35355338, %v747_v33 }
 0x39d   :  { %v749_v38 = vpop.f32.mrf.mxu3 }
 0x39e   :  { %v750_v41 = vadd.f32 %v4785_v30, %v749_v38 }
 0x3a0   :  { %v753_v43 = vmul.f32 0.35355338, %v750_v41 }
 0x3f9   :  { %v5416_v48 = vpop.f32.mrf.mxu2 }
 0x3fc   :  { %v610_v58 = vpop.xlane.xlu2 %609 }
 0x3fd   :  { %v614_v59 = vsub.f32 %v603_v53, %v610_v58 }
 0x3ff   :  { %v616_v60 = vmul.f32 1.442695, %v614_v59 }
 0x401   :  { %4852 = vpow2.f32 %v616_v60  ;;  %v5419_v53 = vpop.f32.mrf.mxu2 }
 0x404   :  { %v613_v61 = vpop.xlane.xlu2 %612 }
 0x405   :  { %v615_v62 = vsub.f32 %v606_v56, %v613_v61 }
 0x407   :  { %v4853_v63 = vpop.eup %4852  ;;  %v618_v0 = vmul.f32 1.442695, %v615_v62  ;;  %v4789_v62 = vld [vmem:[%s5115_s24 + $0x3] ss:$0 sm:$0xff] }
 0x408   :  { %v620_v1 = vsel %vm189_vm0, %v4853_v63, 0.0 }
 0x409   :  { %4854 = vpow2.f32 %v618_v0  ;;  %621 = vadd.xlane.f32.xlu0 %v620_v1 }
 0x40f   :  { %v4855_v2 = vpop.eup %4854 }
 0x410   :  { %v623_v3 = vsel %vm189_vm0, %v4855_v2, 0.0 }
 0x411   :  { %624 = vadd.xlane.f32.xlu1 %v623_v3 }
 0x47c   :  { %v622_v9 = vpop.xlane.xlu0 %621 }
 0x47d   :  { %4856 = vrcp.f32 %v622_v9 }
 0x483   :  { %v4857_v10 = vpop.eup %4856 }
 0x484   :  { %v628_v12 = vmul.f32 %v4857_v10, %v4853_v63  ;;  %v625_v13 = vpop.xlane.xlu1 %624 }
 0x485   :  { %4858 = vrcp.f32 %v625_v13 }
 0x486   :  { %4385 = vmatmul.msk.f32.vlgmr.msrb.gmra.mxu0 %vm189_vm0, %v628_v12 }
 0x487   :  { %929 = vmatpush.msrb.mxu0 %v4419_v54 }
 0x48b   :  { %v4859_v14 = vpop.eup %4858 }
 0x48c   :  { %v629_v15 = vmul.f32 %v4859_v14, %v4855_v2  ;;  %v4439_v14 = vld [vmem:[%s5120_s30 + $0x78] sm:$0xff] }
 0x48e   :  { %4386 = vmatmul.msk.f32.gmra.mxu0 %vm189_vm0, %v629_v15  ;;  %v4438_v15 = vld [vmem:[%s5120_s30 + $0x70] sm:$0xff] }
 0x496   :  { %4404 = vmatmul.msk.f32.vlgmr.msra.gmra.mxu0 %vm290_vm1, %v5292_v39 }
 0x49e   :  { %4405 = vmatmul.msk.f32.gmra.mxu0 %vm290_vm1, %v5300_v44 }
 0x503   :  { %v653_v22 = vpop.f32.mrf.mxu0 }
 0x504   :  { %4388 = vmatmul.msk.f32.vlgmr.msra.gmra.mxu1 %vm384_vm2, %v653_v22 }
 0x505   :  { %961 = vmatpush.msra.mxu1 %v4425_v21 }
 0x507   :  { %962 = vmatpush.msra.mxu1 %v4424_v23 }
 0x509   :  { %963 = vmatpush.msra.mxu1 %v4423_v24 }
 0x50b   :  { %v656_v26 = vpop.f32.mrf.mxu0  ;;  %964 = vmatpush.msra.mxu1 %v4422_v25 }
 0x50c   :  { %4389 = vmatmul.msk.f32.gmra.mxu1 %vm384_vm2, %v656_v26  ;;  %v4788_v26 = vld [vmem:[%s5105_s14 + $0x3] ss:$0 sm:$0xff] }
 0x513   :  { %v781_v27 = vpop.f32.mrf.mxu0 }
 0x514   :  { %4411 = vmatmul.msk.f32.vlgmr.msrb.gmra.mxu1 %vm290_vm1, %v5292_v39  ;;  %v782_v34 = vadd.f32 %v4786_v29, %v781_v27 }
 0x51b   :  { %v784_v31 = vpop.f32.mrf.mxu0 }
 0x51c   :  { %v785_v32 = vadd.f32 %v4786_v29, %v784_v31  ;;  %4412 = vmatmul.msk.f32.gmra.mxu1 %vm290_vm1, %v5300_v44 }
 0x51e   :  { %4413 = vmatpush.xpose.msk.msrb.mxu2 %vm384_vm2, %v785_v32 }
 0x522   :  { %4414 = vmatpush.xpose.msk.msrb.mxu2 %vm384_vm2, %v782_v34  ;;  %v4790_v34 = vld [vmem:[%s5125_s6 + $0x3] ss:$0 sm:$0xff] }
 0x524   :  { %4427 = vmatmul.msk.f32.vlgmr.msra.gmra.mxu1 %vm290_vm1, %v5292_v39 }
 0x525   :  { %4415 = vmatmul.msk.f32.vlgmr.msrb.gmra.mxu2 %vm384_vm2, %v752_v36 }
 0x526   :  { %996 = vmatpush.msra.mxu2 %v4432_v35 }
 0x528   :  { %997 = vmatpush.msra.mxu2 %v4431_v37 }
 0x52a   :  { %998 = vmatpush.msra.mxu2 %v4430_v40 }
 0x52c   :  { %999 = vmatpush.msra.mxu2 %v4429_v42  ;;  %4428 = vmatmul.msk.f32.gmra.mxu1 %vm290_vm1, %v5300_v44 }
 0x52d   :  { %4416 = vmatmul.msk.f32.gmra.mxu2 %vm384_vm2, %v753_v43 }
 0x535   :  { %4434 = vmatmul.msk.f32.vlgmr.msra.gmra.mxu2 %vm290_vm1, %v5292_v39 }
 0x53d   :  { %4435 = vmatmul.msk.f32.gmra.mxu2 %vm290_vm1, %v5300_v44 }
 0x581   :  { %v5412_v45 = vpop.f32.mrf.mxu1 }
 0x589   :  { %v5414_v46 = vpop.f32.mrf.mxu1 }
 0x591   :  { %v814_v47 = vpop.f32.mrf.mxu1 }
 0x592   :  { %v815_v52 = vadd.f32 %v4787_v49, %v814_v47 }
 0x599   :  { %v817_v50 = vpop.f32.mrf.mxu1 }
 0x59a   :  { %v818_v51 = vadd.f32 %v4787_v49, %v817_v50 }
 0x59c   :  { %897 = vmatpush.msrb.mxu3 %v818_v51 }
 0x59e   :  { %898 = vmatpush.msrb.mxu3 %v815_v52 }
 0x5a0   :  { %1029 = vmatpush.msra.mxu3 %v4439_v14 }
 0x5a1   :  { %v966_v25 = vpop.f32.mrf.mxu1 }
 0x5a2   :  { %1030 = vmatpush.msra.mxu3 %v4438_v15  ;;  %v967_v28 = vadd.f32 %v4788_v26, %v966_v25 }
 0x5a4   :  { %1031 = vmatpush.msra.mxu3 %v4437_v16  ;;  %v972_v29 = vmul.f32 0.35355338, %v967_v28 }
 0x5a6   :  { %1032 = vmatpush.msra.mxu3 %v4436_v17 }
 0x5a8   :  { %v849_v55 = vpop.f32.mrf.mxu2 }
 0x5a9   :  { %v850_v56 = vadd.f32 %v849_v55, %v5335_v7  ;;  %v969_v30 = vpop.f32.mrf.mxu1 }
 0x5aa   :  { %v970_v32 = vadd.f32 %v4788_v26, %v969_v30  ;;  %v1237_v26 = vld [vmem:[%s5140_s27 + $0x18] sm:$0xff] }
 0x5ab   :  { %v855_v57 = vsel %vm189_vm0, %v850_v56, -inf }
 0x5ac   :  { %856 = vmax.xlane.f32.xlu2 %v855_v57  ;;  %v973_v33 = vmul.f32 0.35355338, %v970_v32 }
 0x5b0   :  { %v852_v58 = vpop.f32.mrf.mxu2 }
 0x5b1   :  { %v853_v59 = vadd.f32 %v852_v58, %v5340_v11 }
 0x5b3   :  { %v858_v60 = vsel %vm189_vm0, %v853_v59, -inf }
 0x5b4   :  { %859 = vmax.xlane.f32.xlu0 %v858_v60 }
 0x5b8   :  { %v1001_v61 = vpop.f32.mrf.mxu2 }
 0x5b9   :  { %v1002_v1 = vadd.f32 %v4789_v62, %v1001_v61 }
 0x5c0   :  { %v1004_v63 = vpop.f32.mrf.mxu2 }
 0x5c1   :  { %v1005_v0 = vadd.f32 %v4789_v62, %v1004_v63 }
 0x5c3   :  { %4443 = vmatpush.xpose.msk.msra.mxu0 %vm384_vm2, %v1005_v0 }
 0x5c7   :  { %4444 = vmatpush.xpose.msk.msra.mxu0 %vm384_vm2, %v1002_v1 }
 0x61f   :  { %v857_v2 = vpop.xlane.xlu2 %856 }
 0x620   :  { %v861_v3 = vsub.f32 %v850_v56, %v857_v2 }
 0x622   :  { %v863_v4 = vmul.f32 1.442695, %v861_v3 }
 0x624   :  { %4860 = vpow2.f32 %v863_v4 }
 0x627   :  { %v860_v5 = vpop.xlane.xlu0 %859 }
 0x628   :  { %v862_v6 = vsub.f32 %v853_v59, %v860_v5  ;;  %v714_v5 = vadd.f32 %v5416_v48, %v5412_v45 }
 0x62a   :  { %v4861_v8 = vpop.eup %4860  ;;  %v865_v9 = vmul.f32 1.442695, %v862_v6 }
 0x62b   :  { %v867_v10 = vsel %vm189_vm0, %v4861_v8, 0.0 }
 0x62c   :  { %4862 = vpow2.f32 %v865_v9  ;;  %868 = vadd.xlane.f32.xlu1 %v867_v10 }
 0x632   :  { %v4863_v12 = vpop.eup %4862 }
 0x633   :  { %v870_v13 = vsel %vm189_vm0, %v4863_v12, 0.0 }
 0x634   :  { %871 = vadd.xlane.f32.xlu2 %v870_v13  ;;  %v717_v13 = vadd.f32 %v5419_v53, %v5414_v46 }
 0x69f   :  { %v869_v18 = vpop.xlane.xlu1 %868 }
 0x6a0   :  { %4864 = vrcp.f32 %v869_v18 }
 0x6a6   :  { %v4865_v19 = vpop.eup %4864 }
 0x6a7   :  { %v875_v20 = vmul.f32 %v4865_v19, %v4861_v8  ;;  %v872_v21 = vpop.xlane.xlu2 %871  ;;  %v4791_v8 = vld [vmem:[%s5135_s20] ss:$0 sm:$0xff] }
 0x6a8   :  { %4866 = vrcp.f32 %v872_v21  ;;  %v5043_v21 = vmov 32.0  }
 0x6a9   :  { %4417 = vmatmul.msk.f32.vlgmr.msrb.gmra.mxu3 %vm189_vm0, %v875_v20 }
 0x6aa   :  { %1260 = vmatpush.msrb.mxu3 %v1237_v26 }
 0x6ae   :  { %v4867_v22 = vpop.eup %4866 }
 0x6af   :  { %v876_v23 = vmul.f32 %v4867_v22, %v4863_v12 }
 0x6b1   :  { %4418 = vmatmul.msk.f32.gmra.mxu3 %vm189_vm0, %v876_v23 }
 0x6b9   :  { %4441 = vmatmul.msk.f32.vlgmr.msra.gmra.mxu3 %vm290_vm1, %v5292_v39 }
 0x6c1   :  { %4442 = vmatmul.msk.f32.gmra.mxu3 %vm290_vm1, %v5300_v44 }
 0x72c   :  { %v900_v24 = vpop.f32.mrf.mxu3 }
 0x72d   :  { %4420 = vmatmul.msk.f32.vlgmr.msrb.gmra.mxu0 %vm384_vm2, %v900_v24 }
 0x734   :  { %v903_v27 = vpop.f32.mrf.mxu3 }
 0x735   :  { %4421 = vmatmul.msk.f32.gmra.mxu0 %vm384_vm2, %v903_v27  ;;  %v1236_v27 = vld [vmem:[%s5140_s27 + $0x10] sm:$0xff] }
 0x736   :  { %1261 = vmatpush.msrb.mxu3 %v1236_v27 }
 0x73c   :  { %v1034_v31 = vpop.f32.mrf.mxu3 }
 0x73d   :  { %4445 = vmatmul.msk.f32.vlgmr.msra.gmra.mxu0 %vm384_vm2, %v972_v29  ;;  %v1035_v37 = vadd.f32 %v4790_v34, %v1034_v31  ;;  %v1235_v29 = vld [vmem:[%s5140_s27 + $0x8] sm:$0xff]  ;;  %v1234_v31 = vld [vmem:[%s5140_s27] sm:$0xff] }
 0x73e   :  { %1262 = vmatpush.msrb.mxu3 %v1235_v29 }
 0x740   :  { %1263 = vmatpush.msrb.mxu3 %v1234_v31 }
 0x744   :  { %v1037_v35 = vpop.f32.mrf.mxu3 }
 0x745   :  { %v1038_v36 = vadd.f32 %v4790_v34, %v1037_v35  ;;  %4446 = vmatmul.msk.f32.gmra.mxu0 %vm384_vm2, %v973_v33 }
 0x747   :  { %1117 = vmatpush.msrb.mxu1 %v1038_v36 }
 0x749   :  { %1118 = vmatpush.msrb.mxu1 %v1035_v37 }
 0x7aa   :  { %v931_v38 = vpop.f32.mrf.mxu0 }
 0x7ab   :  { %v937_v6 = vadd.f32 %v931_v38, %v714_v5 }
 0x7b2   :  { %v934_v40 = vpop.f32.mrf.mxu0 }
 0x7b3   :  { %v938_v15 = vadd.f32 %v934_v40, %v717_v13  ;;  %v1290_v13 = vld [vmem:[%s6100_s17 + $0x8] sm:$0xff] }
 0x7ba   :  { %v1069_v41 = vpop.f32.mrf.mxu0 }
 0x7bb   :  { %v1070_v42 = vadd.f32 %v1069_v41, %v5335_v7 }
 0x7bd   :  { %v1075_v43 = vsel %vm189_vm0, %v1070_v42, -inf }
 0x7be   :  { %1076 = vmax.xlane.f32.xlu0 %v1075_v43 }
 0x7c2   :  { %v1072_v47 = vpop.f32.mrf.mxu0 }
 0x7c3   :  { %v1073_v49 = vadd.f32 %v1072_v47, %v5340_v11  ;;  %v4449_v11 = vld [vmem:[%s5130_s12 + $0x18] sm:$0xff] }
 0x7c4   :  { %1149 = vmatpush.msrb.mxu2 %v4449_v11 }
 0x7c5   :  { %v1078_v50 = vsel %vm189_vm0, %v1073_v49, -inf }
 0x7c6   :  { %1079 = vmax.xlane.f32.xlu1 %v1078_v50 }
 0x831   :  { %v1077_v51 = vpop.xlane.xlu0 %1076 }
 0x832   :  { %v1081_v52 = vsub.f32 %v1070_v42, %v1077_v51 }
 0x834   :  { %v1083_v54 = vmul.f32 1.442695, %v1081_v52 }
 0x836   :  { %4868 = vpow2.f32 %v1083_v54 }
 0x839   :  { %v1080_v55 = vpop.xlane.xlu1 %1079 }
 0x83a   :  { %v1082_v56 = vsub.f32 %v1073_v49, %v1080_v55 }
 0x83c   :  { %v4869_v57 = vpop.eup %4868  ;;  %v1085_v58 = vmul.f32 1.442695, %v1082_v56 }
 0x83d   :  { %v1087_v7 = vsel %vm189_vm0, %v4869_v57, 0.0 }
 0x83e   :  { %4870 = vpow2.f32 %v1085_v58  ;;  %1088 = vadd.xlane.f32.xlu2 %v1087_v7 }
 0x844   :  { %v4871_v59 = vpop.eup %4870 }
 0x845   :  { %v1090_v60 = vsel %vm189_vm0, %v4871_v59, 0.0 }
 0x846   :  { %1091 = vadd.xlane.f32.xlu0 %v1090_v60 }
 0x8b1   :  { %v1089_v61 = vpop.xlane.xlu2 %1088 }
 0x8b2   :  { %4872 = vrcp.f32 %v1089_v61 }
 0x8b8   :  { %v4873_v62 = vpop.eup %4872 }
 0x8b9   :  { %v1095_v63 = vmul.f32 %v4873_v62, %v4869_v57  ;;  %v1092_v0 = vpop.xlane.xlu0 %1091  ;;  %v4793_v62 = vld [vmem:[%s6099_s0] ss:$0 sm:$0xff] }
 0x8ba   :  { %4874 = vrcp.f32 %v1092_v0 }
 0x8bb   :  { %4447 = vmatmul.msk.f32.vlgmr.msrb.gmra.mxu1 %vm189_vm0, %v1095_v63  ;;  %4876 = vrcp.f32 %v5043_v21 }
 0x8c0   :  { %v4875_v1 = vpop.eup %4874 }
 0x8c1   :  { %v1096_v2 = vmul.f32 %v4875_v1, %v4871_v59  ;;  %v4877_v22 = vpop.eup %4876  ;;  %v4792_v59 = vld [vmem:[%s5160_s25] ss:$0 sm:$0xff] }
 0x8c2   :  { %v1176_v23 = vmul.f32 32.0, %v4877_v22  ;;  %vm1180_vm3 = vweird.f32 %v4877_v22 }
 0x8c3   :  { %4448 = vmatmul.msk.f32.gmra.mxu1 %vm189_vm0, %v1096_v2 }
 0x8c4   :  { %v1177_v24 = vsub.f32 1.0, %v1176_v23 }
 0x938   :  { %v1120_v3 = vpop.f32.mrf.mxu1 }
 0x939   :  { %4450 = vmatmul.msk.f32.vlgmr.msrb.gmra.mxu2 %vm384_vm2, %v1120_v3 }
 0x940   :  { %v1123_v4 = vpop.f32.mrf.mxu1 }
 0x941   :  { %4451 = vmatmul.msk.f32.gmra.mxu2 %vm384_vm2, %v1123_v4 }
 0x9bc   :  { %v1151_v9 = vpop.f32.mrf.mxu2 }
 0x9bd   :  { %v1157_v10 = vadd.f32 %v1151_v9, %v937_v6 }
 0x9bf   :  { %v1163_v12 = vadd.f32 %v4791_v8, %v1157_v10  ;;  %v1292_v10 = vld [vmem:[%s6100_s17 + $0x18] sm:$0xff] }
 0x9c0   :  { %1315 = vmatpush.msrb.mxu0 %v1292_v10 }
 0x9c1   :  { %v5464_v14 = vadd.f32 %v1163_v12, %v5292_v39  ;;  %v1291_v12 = vld [vmem:[%s6100_s17 + $0x10] sm:$0xff] }
 0x9c2   :  { %1316 = vmatpush.msrb.mxu0 %v1291_v12 }
 0x9c3   :  { %v1169_v16 = vsel %vm290_vm1, %v5464_v14, 0.0  ;;  %v1184_v17 = vmul.f32 %v5464_v14, %v5464_v14 }
 0x9c4   :  { %1170 = vadd.xlane.f32.xlu1 %v1169_v16  ;;  %v1154_v45 = vpop.f32.mrf.mxu2  ;;  %1317 = vmatpush.msrb.mxu0 %v1290_v13 }
 0x9c5   :  { %v1158_v48 = vadd.f32 %v1154_v45, %v938_v15  ;;  %v1186_v18 = vsel %vm290_vm1, %v1184_v17, 0.0  ;;  %v4794_v15 = vld [vmem:[%s6101_s29] ss:$0 sm:$0xff] }
 0x9c6   :  { %1187 = vadd.xlane.f32.xlu2 %v1186_v18 }
 0x9c7   :  { %v1164_v19 = vadd.f32 %v4791_v8, %v1158_v48 }
 0x9c9   :  { %v5472_v46 = vadd.f32 %v1164_v19, %v5300_v44  ;;  %v1178_v44 = vmul.f32 %v4877_v22, %v1177_v24 }
 0x9cb   :  { %v1172_v39 = vsel %vm290_vm1, %v5472_v46, 0.0  ;;  %v1185_v53 = vmul.f32 %v5472_v46, %v5472_v46  ;;  %v1179_v25 = vadd.f32 %v4877_v22, %v1178_v44 }
 0x9cc   :  { %1173 = vadd.xlane.f32.xlu0 %v1172_v39 }
 0x9cd   :  { %v1189_v20 = vsel %vm290_vm1, %v1185_v53, 0.0  ;;  %v5481_v28 = vsel %vm1180_vm3, %v4877_v22, %v1179_v25 }
 0x9ce   :  { %1190 = vadd.xlane.f32.xlu1 %v1189_v20 }
 0xa37   :  { %v1171_v30 = vpop.xlane.xlu1 %1170 }
 0xa38   :  { %v1182_v32 = vmul.f32 %v5481_v28, %v1171_v30 }
 0xa39   :  { %v1188_v33 = vpop.xlane.xlu2 %1187 }
 0xa3a   :  { %v1194_v34 = vmul.f32 %v1182_v32, %v1182_v32  ;;  %v1192_v35 = vmul.f32 %v1188_v33, %v5481_v28  ;;  %v1198_v7 = vsub.f32 %v5464_v14, %v1182_v32  ;;  %v1289_v14 = vld [vmem:[%s6100_s17] sm:$0xff] }
 0xa3b   :  { %1318 = vmatpush.msrb.mxu0 %v1289_v14  ;;  %v4795_v33 = vld [vmem:[%s6102_s3] ss:$0 sm:$0xff] }
 0xa3c   :  { %v1196_v36 = vsub.f32 %v1192_v35, %v1194_v34 }
 0xa3e   :  { %v1200_v37 = vadd.f32 1e-05, %v1196_v36 }
 0xa3f   :  { %v1174_v38 = vpop.xlane.xlu0 %1173 }
 0xa40   :  { %4878 = vrsqrt.f32 %v1200_v37  ;;  %v1183_v40 = vmul.f32 %v5481_v28, %v1174_v38  ;;  %vm1208_vm5 = vweird.f32 %v1200_v37 }
 0xa41   :  { %v1191_v41 = vpop.xlane.xlu1 %1190 }
 0xa42   :  { %v1195_v42 = vmul.f32 %v1183_v40, %v1183_v40  ;;  %v1193_v43 = vmul.f32 %v1191_v41, %v5481_v28  ;;  %v1199_v4 = vsub.f32 %v5472_v46, %v1183_v40 }
 0xa44   :  { %v1197_v47 = vsub.f32 %v1193_v43, %v1195_v42 }
 0xa46   :  { %v4879_v49 = vpop.eup %4878  ;;  %v1201_v50 = vadd.f32 1e-05, %v1197_v47 }
 0xa47   :  { %v1203_v51 = vmul.f32 %v4879_v49, %v1200_v37  ;;  %vm1209_vm4 = vweird.f32 %v4879_v49 }
 0xa48   :  { %4880 = vrsqrt.f32 %v1201_v50  ;;  %vm1210_vm6 = vmor %vm1208_vm5, %vm1209_vm4  ;;  %vm1218_vm8 = vweird.f32 %v1201_v50  ;;  %vm179_vm4 = vcmask 1040384   ;;  %vm186_vm5 = vcmask 1046528  }
 0xa49   :  { %v1204_v52 = vmul.f32 %v4879_v49, %v1203_v51  ;;  %v4459_v51 = vld [vmem:[%s6103_s22 + $0x38] sm:$0xff] }
 0xa4a   :  { %1433 = vmatpush.msra.mxu1 %v4459_v51 }
 0xa4b   :  { %v1205_v54 = vmul.f32 0.5, %v1204_v52  ;;  %v4458_v52 = vld [vmem:[%s6103_s22 + $0x30] sm:$0xff] }
 0xa4c   :  { %1434 = vmatpush.msra.mxu1 %v4458_v52 }
 0xa4d   :  { %v1206_v55 = vsub.f32 1.5, %v1205_v54  ;;  %v1391_v54 = vld [vmem:[%s6103_s22 + $0x18] sm:$0xff] }
 0xa4e   :  { %v4881_v56 = vpop.eup %4880  ;;  %1462 = vmatpush.msra.mxu2 %v1391_v54 }
 0xa4f   :  { %v1207_v57 = vmul.f32 %v4879_v49, %v1206_v55  ;;  %v1213_v58 = vmul.f32 %v4881_v56, %v1201_v50  ;;  %vm1219_vm7 = vweird.f32 %v4881_v56  ;;  %v4463_v55 = vld [vmem:[%s6103_s22 + $0x58] sm:$0xff] }
 0xa50   :  { %vm1220_vm9 = vmor %vm1218_vm8, %vm1219_vm7  ;;  %1491 = vmatpush.msra.mxu3 %v4463_v55  ;;  %vm1574_vm8 = vcmask 1041408  }
 0xa51   :  { %v1211_v60 = vsel %vm1210_vm6, %v4879_v49, %v1207_v57  ;;  %v1214_v11 = vmul.f32 %v4881_v56, %v1213_v58  ;;  %v1390_v57 = vld [vmem:[%s6103_s22 + $0x10] sm:$0xff]  ;;  %vm1547_vm6 = vcmask 1045504  }
 0xa52   :  { %v1222_v61 = vmul.f32 %v1211_v60, %v1198_v7  ;;  %v4462_v58 = vld [vmem:[%s6103_s22 + $0x50] sm:$0xff]  ;;  %1463 = vmatpush.msra.mxu2 %v1390_v57  ;;  %v1389_v60 = vld [vmem:[%s6103_s22 + $0x8] sm:$0xff] }
 0xa53   :  { %v1215_v63 = vmul.f32 0.5, %v1214_v11  ;;  %1492 = vmatpush.msra.mxu3 %v4462_v58  ;;  %v4461_v11 = vld [vmem:[%s6103_s22 + $0x48] sm:$0xff] }
 0xa54   :  { %v1227_v0 = vmul.f32 %v4792_v59, %v1222_v61  ;;  %1464 = vmatpush.msra.mxu2 %v1389_v60 }
 0xa55   :  { %v1216_v1 = vsub.f32 1.5, %v1215_v63  ;;  %v4460_v63 = vld [vmem:[%s6103_s22 + $0x40] sm:$0xff]  ;;  %1493 = vmatpush.msra.mxu3 %v4461_v11 }
 0xa56   :  { %v1232_v2 = vadd.f32 %v4793_v62, %v1227_v0 }
 0xa57   :  { %v1217_v3 = vmul.f32 %v4881_v56, %v1216_v1  ;;  %1494 = vmatpush.msra.mxu3 %v4460_v63 }
 0xa58   :  { %4452 = vmatmul.msk.f32.vlgmr.msrb.gmra.mxu3 %vm290_vm1, %v1232_v2 }
 0xa59   :  { %v1221_v5 = vsel %vm1220_vm9, %v4881_v56, %v1217_v3  ;;  %v4457_v56 = vld [vmem:[%s6103_s22 + $0x28] sm:$0xff]  ;;  %vm1577_vm9 = vcmask 1042432  }
 0xa5a   :  { %v1223_v6 = vmul.f32 %v1221_v5, %v1199_v4  ;;  %1435 = vmatpush.msra.mxu1 %v4457_v56 }
 0xa5c   :  { %v1228_v8 = vmul.f32 %v4792_v59, %v1223_v6  ;;  %v4456_v59 = vld [vmem:[%s6103_s22 + $0x20] sm:$0xff] }
 0xa5d   :  { %1436 = vmatpush.msra.mxu1 %v4456_v59 }
 0xa5e   :  { %v1233_v9 = vadd.f32 %v4793_v62, %v1228_v8  ;;  %v1388_v62 = vld [vmem:[%s6103_s22] sm:$0xff] }
 0xa5f   :  { %1465 = vmatpush.msra.mxu2 %v1388_v62 }
 0xa60   :  { %4453 = vmatmul.msk.f32.gmra.mxu3 %vm290_vm1, %v1233_v9 }
 0xadb   :  { %v1265_v16 = vpop.f32.mrf.mxu3 }
 0xadc   :  { %v1266_v17 = vadd.f32 %v4794_v15, %v1265_v16 }
 0xade   :  { %v1271_v45 = vmul.f32 %v1266_v17, %v1266_v17 }
 0xae0   :  { %v1273_v48 = vmul.f32 %v1271_v45, %v1266_v17 }
 0xae2   :  { %v1275_v18 = vmul.f32 0.044715, %v1273_v48 }
 0xae3   :  { %v1268_v19 = vpop.f32.mrf.mxu3 }
 0xae4   :  { %v1277_v46 = vadd.f32 %v1275_v18, %v1266_v17  ;;  %v1269_v39 = vadd.f32 %v4794_v15, %v1268_v19 }
 0xae6   :  { %v1279_v53 = vmul.f32 0.7978846, %v1277_v46  ;;  %v1272_v20 = vmul.f32 %v1269_v39, %v1269_v39 }
 0xae8   :  { %4882 = vtanh.f32 %v1279_v53  ;;  %v1274_v21 = vmul.f32 %v1272_v20, %v1269_v39 }
 0xaea   :  { %v1276_v22 = vmul.f32 0.044715, %v1274_v21 }
 0xaec   :  { %v1278_v23 = vadd.f32 %v1276_v22, %v1269_v39  ;;  %v4797_v22 = vld [vmem:[%s6105_s26] ss:$0 sm:$0xff] }
 0xaee   :  { %v4883_v24 = vpop.eup %4882  ;;  %v1280_v44 = vmul.f32 0.7978846, %v1278_v23 }
 0xaef   :  { %v1283_v25 = vadd.f32 1.0, %v4883_v24 }
 0xaf0   :  { %4884 = vtanh.f32 %v1280_v44 }
 0xaf1   :  { %v1285_v26 = vmul.f32 0.5, %v1283_v25 }
 0xaf3   :  { %v1287_v27 = vmul.f32 %v1285_v26, %v1266_v17 }
 0xaf5   :  { %4454 = vmatmul.msk.f32.vlgmr.msrb.gmra.mxu0 %vm290_vm1, %v1287_v27 }
 0xaf6   :  { %v4885_v29 = vpop.eup %4884 }
 0xaf7   :  { %v1284_v30 = vadd.f32 1.0, %v4885_v29 }
 0xaf9   :  { %v1286_v31 = vmul.f32 0.5, %v1284_v30 }
 0xafb   :  { %v1288_v32 = vmul.f32 %v1286_v31, %v1269_v39  ;;  %v4796_v39 = vld [vmem:[%s6104_s23] ss:$0 sm:$0xff] }
 0xafd   :  { %4455 = vmatmul.msk.f32.gmra.mxu0 %vm290_vm1, %v1288_v32 }
 0xb72   :  { %v1320_v34 = vpop.f32.mrf.mxu0 }
 0xb73   :  { %v1321_v35 = vadd.f32 %v4795_v33, %v1320_v34 }
 0xb75   :  { %v5503_v36 = vadd.f32 %v1321_v35, %v1232_v2 }
 0xb77   :  { %v1330_v37 = vsel %vm290_vm1, %v5503_v36, 0.0  ;;  %v1338_v38 = vmul.f32 %v5503_v36, %v5503_v36 }
 0xb78   :  { %1331 = vadd.xlane.f32.xlu2 %v1330_v37 }
 0xb79   :  { %v1340_v40 = vsel %vm290_vm1, %v1338_v38, 0.0 }
 0xb7a   :  { %1341 = vadd.xlane.f32.xlu0 %v1340_v40  ;;  %v1323_v41 = vpop.f32.mrf.mxu0 }
 0xb7b   :  { %v1324_v42 = vadd.f32 %v4795_v33, %v1323_v41 }
 0xb7d   :  { %v5510_v43 = vadd.f32 %v1324_v42, %v1233_v9  ;;  %v4798_v42 = vld [vmem:[%s6106_s28] ss:$0 sm:$0xff] }
 0xb7f   :  { %v1333_v47 = vsel %vm290_vm1, %v5510_v43, 0.0  ;;  %v1339_v49 = vmul.f32 %v5510_v43, %v5510_v43 }
 0xb80   :  { %1334 = vadd.xlane.f32.xlu1 %v1333_v47 }
 0xb81   :  { %v1343_v50 = vsel %vm290_vm1, %v1339_v49, 0.0 }
 0xb82   :  { %1344 = vadd.xlane.f32.xlu2 %v1343_v50 }
 0xbeb   :  { %v1332_v7 = vpop.xlane.xlu2 %1331 }
 0xbec   :  { %v1336_v61 = vmul.f32 %v1332_v7, %v5481_v28 }
 0xbed   :  { %v1342_v0 = vpop.xlane.xlu0 %1341 }
 0xbee   :  { %v1348_v1 = vmul.f32 %v1336_v61, %v1336_v61  ;;  %v1346_v2 = vmul.f32 %v1342_v0, %v5481_v28  ;;  %v1352_v46 = vsub.f32 %v5503_v36, %v1336_v61 }
 0xbf0   :  { %v1350_v3 = vsub.f32 %v1346_v2, %v1348_v1 }
 0xbf2   :  { %v1354_v4 = vadd.f32 1e-05, %v1350_v3 }
 0xbf3   :  { %v1335_v5 = vpop.xlane.xlu1 %1334 }
 0xbf4   :  { %4886 = vrsqrt.f32 %v1354_v4  ;;  %v1337_v6 = vmul.f32 %v1335_v5, %v5481_v28  ;;  %vm1362_vm11 = vweird.f32 %v1354_v4 }
 0xbf5   :  { %v1345_v8 = vpop.xlane.xlu2 %1344 }
 0xbf6   :  { %v1349_v9 = vmul.f32 %v1337_v6, %v1337_v6  ;;  %v1347_v10 = vmul.f32 %v1345_v8, %v5481_v28  ;;  %v1353_v27 = vsub.f32 %v5510_v43, %v1337_v6  ;;  %v4475_v6 = vld [vmem:[%s5100_s8 + $0x98] sm:$0xff] }
 0xbf7   :  { %1611 = vmatpush.msra.mxu0 %v4475_v6  ;;  %v4800_v6 = vld [vmem:[%s5115_s24 + $0x4] ss:$0 sm:$0xff] }
 0xbf8   :  { %v1351_v12 = vsub.f32 %v1347_v10, %v1349_v9 }
 0xbfa   :  { %v4887_v13 = vpop.eup %4886  ;;  %v1355_v14 = vadd.f32 1e-05, %v1351_v12  ;;  %v4474_v12 = vld [vmem:[%s5100_s8 + $0x90] sm:$0xff] }
 0xbfb   :  { %v1357_v15 = vmul.f32 %v4887_v13, %v1354_v4  ;;  %vm1363_vm10 = vweird.f32 %v4887_v13  ;;  %1612 = vmatpush.msra.mxu0 %v4474_v12  ;;  %v4509_v12 = vld [vmem:[%s5120_s30 + $0xb8] sm:$0xff] }
 0xbfc   :  { %4888 = vrsqrt.f32 %v1355_v14  ;;  %vm1364_vm12 = vmor %vm1362_vm11, %vm1363_vm10  ;;  %vm1372_vm14 = vweird.f32 %v1355_v14 }
 0xbfd   :  { %v1358_v16 = vmul.f32 %v4887_v13, %v1357_v15 }
 0xbff   :  { %v1359_v17 = vmul.f32 0.5, %v1358_v16  ;;  %v4473_v16 = vld [vmem:[%s5100_s8 + $0x88] sm:$0xff] }
 0xc00   :  { %1613 = vmatpush.msra.mxu0 %v4473_v16  ;;  %v4506_v16 = vld [vmem:[%s5120_s30 + $0xa0] sm:$0xff] }
 0xc01   :  { %v1360_v45 = vsub.f32 1.5, %v1359_v17 }
 0xc02   :  { %v4889_v48 = vpop.eup %4888 }
 0xc03   :  { %v1361_v18 = vmul.f32 %v4887_v13, %v1360_v45  ;;  %v1367_v19 = vmul.f32 %v4889_v48, %v1355_v14  ;;  %vm1373_vm13 = vweird.f32 %v4889_v48 }
 0xc04   :  { %vm1374_vm15 = vmor %vm1372_vm14, %vm1373_vm13 }
 0xc05   :  { %v1365_v53 = vsel %vm1364_vm12, %v4887_v13, %v1361_v18  ;;  %v1368_v20 = vmul.f32 %v4889_v48, %v1367_v19 }
 0xc06   :  { %v1376_v21 = vmul.f32 %v1365_v53, %v1352_v46 }
 0xc07   :  { %v1369_v23 = vmul.f32 0.5, %v1368_v20 }
 0xc08   :  { %v1381_v24 = vmul.f32 %v4796_v39, %v1376_v21  ;;  %v4481_v21 = vld [vmem:[%s5110_s19 + $0x98] sm:$0xff] }
 0xc09   :  { %v1370_v44 = vsub.f32 1.5, %v1369_v23  ;;  %1648 = vmatpush.msrb.mxu1 %v4481_v21 }
 0xc0a   :  { %v1386_v25 = vadd.f32 %v4797_v22, %v1381_v24 }
 0xc0b   :  { %v1371_v26 = vmul.f32 %v4889_v48, %v1370_v44 }
 0xc0c   :  { %4464 = vmatmul.msk.f32.vlgmr.msra.gmra.mxu1 %vm290_vm1, %v1386_v25  ;;  %v1405_v29 = vrot.slane %v1386_v25, 7  ;;  %v1411_v30 = vrot.slane %v1386_v25, 1 }
 0xc0d   :  { %v1375_v31 = vsel %vm1374_vm15, %v4889_v48, %v1371_v26  ;;  %v4472_v48 = vld [vmem:[%s5100_s8 + $0x80] sm:$0xff]  ;;  %v4480_v26 = vld [vmem:[%s5110_s19 + $0x90] sm:$0xff] }
 0xc0e   :  { %4466 = vmatmul.msk.f32.vlgmr.msra.gmra.mxu2 %vm290_vm1, %v1405_v29  ;;  %4468 = vmatmul.msk.f32.vlgmr.msra.gmra.mxu3 %vm290_vm1, %v1411_v30  ;;  %v1377_v32 = vmul.f32 %v1375_v31, %v1353_v27  ;;  %v4479_v31 = vld [vmem:[%s5110_s19 + $0x88] sm:$0xff] }
 0xc0f   :  { %1614 = vmatpush.msra.mxu0 %v4472_v48  ;;  %1649 = vmatpush.msrb.mxu1 %v4480_v26 }
 0xc10   :  { %v1382_v33 = vmul.f32 %v4796_v39, %v1377_v32 }
 0xc11   :  { %1650 = vmatpush.msrb.mxu1 %v4479_v31 }
 0xc12   :  { %v1387_v34 = vadd.f32 %v4797_v22, %v1382_v33 }
 0xc14   :  { %4465 = vmatmul.msk.f32.gmra.mxu1 %vm290_vm1, %v1387_v34  ;;  %v1406_v35 = vrot.slane %v1387_v34, 7  ;;  %v1412_v36 = vrot.slane %v1387_v34, 1  ;;  %v4478_v34 = vld [vmem:[%s5110_s19 + $0x80] sm:$0xff] }
 0xc15   :  { %1651 = vmatpush.msrb.mxu1 %v4478_v34 }
 0xc16   :  { %4467 = vmatmul.msk.f32.gmra.mxu2 %vm290_vm1, %v1406_v35  ;;  %4469 = vmatmul.msk.f32.gmra.mxu3 %vm290_vm1, %v1412_v36 }
 0xc89   :  { %v1438_v37 = vpop.f32.mrf.mxu1 }
 0xc91   :  { %v1467_v38 = vpop.f32.mrf.mxu2  ;;  %v1496_v41 = vpop.f32.mrf.mxu3 }
 0xc92   :  { %v1468_v40 = vadd.f32 %v1467_v38, %v1438_v37  ;;  %v1441_v50 = vpop.f32.mrf.mxu1  ;;  %v4487_v37 = vld [vmem:[%s5120_s30 + $0x98] sm:$0xff] }
 0xc93   :  { %1684 = vmatpush.msrb.mxu2 %v4487_v37  ;;  %v4520_v37 = vld [vmem:[%s5100_s8 + $0xd0] sm:$0xff] }
 0xc94   :  { %v1502_v43 = vadd.f32 %v1496_v41, %v1468_v40  ;;  %v4486_v41 = vld [vmem:[%s5120_s30 + $0x90] sm:$0xff] }
 0xc95   :  { %1685 = vmatpush.msrb.mxu2 %v4486_v41  ;;  %v4518_v41 = vld [vmem:[%s5100_s8 + $0xc0] sm:$0xff] }
 0xc96   :  { %v1507_v47 = vadd.f32 %v4798_v42, %v1502_v43 }
 0xc98   :  { %v1509_v49 = vmul.f32 0.999995, %v1507_v47  ;;  %v4485_v47 = vld [vmem:[%s5120_s30 + $0x88] sm:$0xff] }
 0xc99   :  { %v1470_v51 = vpop.f32.mrf.mxu2  ;;  %v1499_v55 = vpop.f32.mrf.mxu3  ;;  %1686 = vmatpush.msrb.mxu2 %v4485_v47  ;;  %v4493_v47 = vld [vmem:[%s5130_s12 + $0x20] sm:$0xff] }
 0xc9a   :  { %v1513_v52 = vmin.f32 %v1509_v49, 0.0  ;;  %v1471_v54 = vadd.f32 %v1470_v51, %v1441_v50  ;;  %vm1511_vm3 = vcmp.gt.f32.partialorder %v1509_v49, 0.0  ;;  %v4497_v50 = vld [vmem:[%s5100_s8 + $0xb8] sm:$0xff]  ;;  %v4496_v51 = vld [vmem:[%s5100_s8 + $0xb0] sm:$0xff] }
 0xc9b   :  { %1782 = vmatpush.msra.mxu1 %v4497_v50 }
 0xc9c   :  { %v1515_v56 = vmul.f32 1.442695, %v1513_v52  ;;  %v1503_v57 = vadd.f32 %v1499_v55, %v1471_v54  ;;  %v4495_v54 = vld [vmem:[%s5100_s8 + $0xa8] sm:$0xff]  ;;  %v4494_v55 = vld [vmem:[%s5100_s8 + $0xa0] sm:$0xff] }
 0xc9d   :  { %1783 = vmatpush.msra.mxu1 %v4496_v51 }
 0xc9e   :  { %4890 = vpow2.f32 %v1515_v56  ;;  %v1508_v58 = vadd.f32 %v4798_v42, %v1503_v57  ;;  %v4503_v56 = vld [vmem:[%s5110_s19 + $0xb8] sm:$0xff]  ;;  %v4502_v57 = vld [vmem:[%s5110_s19 + $0xb0] sm:$0xff] }
 0xc9f   :  { %1784 = vmatpush.msra.mxu1 %v4495_v54 }
 0xca0   :  { %v1510_v7 = vmul.f32 0.999995, %v1508_v58  ;;  %v4501_v58 = vld [vmem:[%s5110_s19 + $0xa8] sm:$0xff] }
 0xca1   :  { %1785 = vmatpush.msra.mxu1 %v4494_v55 }
 0xca2   :  { %v1514_v59 = vmin.f32 %v1510_v7, 0.0  ;;  %vm1512_vm7 = vcmp.gt.f32.partialorder %v1510_v7, 0.0 }
 0xca4   :  { %v4891_v60 = vpop.eup %4890  ;;  %v1517_v11 = vmul.f32 1.442695, %v1514_v59  ;;  %v4500_v59 = vld [vmem:[%s5110_s19 + $0xa0] sm:$0xff] }
 0xca5   :  { %v4470_v61 = vadd.f32 -1.0, %v4891_v60 }
 0xca6   :  { %4892 = vpow2.f32 %v1517_v11 }
 0xca7   :  { %v1521_v62 = vsel %vm1511_vm3, %v1509_v49, %v4470_v61  ;;  %v4484_v49 = vld [vmem:[%s5120_s30 + $0x80] sm:$0xff] }
 0xca8   :  { %v1525_v63 = vrot.slane %v1521_v62, 7  ;;  %1687 = vmatpush.msrb.mxu2 %v4484_v49 }
 0xcaa   :  { %v1529_v0 = vsel %vm179_vm4, -1e+30, %v1525_v63  ;;  %v1531_v1 = vsel %vm179_vm4, %v1525_v63, -1e+30  ;;  %1819 = vmatpush.msra.mxu2 %v4503_v56 }
 0xcab   :  { %v1537_v2 = vrot.slane %v1529_v0, 1  ;;  %v1538_v3 = vrot.slane %v1531_v1, 1  ;;  %v1548_v4 = vrot.slane %v1529_v0, 2  ;;  %v1549_v5 = vrot.slane %v1531_v1, 2 }
 0xcac   :  { %v4893_v8 = vpop.eup %4892  ;;  %1820 = vmatpush.msra.mxu2 %v4502_v57 }
 0xcad   :  { %v1539_v9 = vsel %vm186_vm5, %v1537_v2, %v1538_v3  ;;  %v4471_v10 = vadd.f32 -1.0, %v4893_v8  ;;  %v1550_v14 = vsel %vm1547_vm6, %v1548_v4, %v1549_v5  ;;  %v4799_v4 = vld [vmem:[%s5105_s14 + $0x4] ss:$0 sm:$0xff] }
 0xcae   :  { %v1545_v13 = vmax.f32 %v1529_v0, %v1539_v9  ;;  %1821 = vmatpush.msra.mxu2 %v4501_v58 }
 0xcaf   :  { %v1522_v15 = vsel %vm1512_vm7, %v1510_v7, %v4471_v10  ;;  %vm2938_vm7 = vcmask 27648  }
 0xcb0   :  { %v1556_v17 = vmax.f32 %v1545_v13, %v1550_v14  ;;  %v1526_v45 = vrot.slane %v1522_v15, 7  ;;  %1822 = vmatpush.msra.mxu2 %v4500_v59  ;;  %v4508_v14 = vld [vmem:[%s5120_s30 + $0xb0] sm:$0xff]  ;;  %v4507_v15 = vld [vmem:[%s5120_s30 + $0xa8] sm:$0xff] }
 0xcb1   :  { %v4526_v59 = vld [vmem:[%s5110_s19 + $0xd0] sm:$0xff] }
 0xcb2   :  { %v1560_v18 = vrot.slane %v1556_v17, 1  ;;  %v1564_v19 = vrot.slane %v1556_v17, 2  ;;  %v1530_v46 = vsel %vm179_vm4, -1e+30, %v1526_v45  ;;  %v1568_v39 = vrot.slane %v1556_v17, 3 }
 0xcb3   :  { %v1532_v53 = vsel %vm179_vm4, %v1526_v45, -1e+30  ;;  %v1540_v20 = vrot.slane %v1530_v46, 1  ;;  %v1551_v24 = vrot.slane %v1530_v46, 2 }
 0xcb4   :  { %v1572_v22 = vsel %vm179_vm4, %v1556_v17, %v1560_v18  ;;  %v1541_v23 = vrot.slane %v1532_v53, 1  ;;  %v1552_v44 = vrot.slane %v1532_v53, 2  ;;  %v4801_v17 = vld [vmem:[%s5125_s6 + $0x4] ss:$0 sm:$0xff]  ;;  %v4803_v18 = vld [vmem:[%s5115_s24 + $0x5] ss:$0 sm:$0xff] }
 0xcb5   :  { %v1575_v25 = vsel %vm1574_vm8, %v1572_v22, %v1564_v19  ;;  %v4804_v22 = vld [vmem:[%s5125_s6 + $0x5] ss:$0 sm:$0xff] }
 0xcb6   :  { %v5559_v27 = vsel %vm1577_vm9, %v1575_v25, %v1568_v39  ;;  %v1542_v29 = vsel %vm186_vm5, %v1540_v20, %v1541_v23  ;;  %v1553_v32 = vsel %vm1547_vm6, %v1551_v24, %v1552_v44  ;;  %v5634_v39 = vld [vmem:[%s6107_s1] sm:$0xff]  ;;  %vm2775_vm5 = vcmask 1044480  }
 0xcb7   :  { %1593 = vst [vmem:[#allocation1] ss:$2 sm:$0xff] %v5559_v27  ;;  %v1546_v30 = vmax.f32 %v1530_v46, %v1542_v29 }
 0xcb9   :  { %v1557_v33 = vmax.f32 %v1546_v30, %v1553_v32 }
 0xcbb   :  { %v1561_v35 = vrot.slane %v1557_v33, 1  ;;  %v1565_v36 = vrot.slane %v1557_v33, 2  ;;  %v1569_v38 = vrot.slane %v1557_v33, 3 }
 0xcbd   :  { %v1573_v40 = vsel %vm179_vm4, %v1557_v33, %v1561_v35  ;;  %v4802_v33 = vld [vmem:[%s5105_s14 + $0x5] ss:$0 sm:$0xff]  ;;  %v4521_v35 = vld [vmem:[%s5100_s8 + $0xd8] sm:$0xff] }
 0xcbe   :  { %v1576_v42 = vsel %vm1574_vm8, %v1573_v40, %v1565_v36  ;;  %v4519_v40 = vld [vmem:[%s5100_s8 + $0xc8] sm:$0xff]  ;;  %vm2950_vm8 = vcmask 31744  }
 0xcbf   :  { %v5571_v43 = vsel %vm1577_vm9, %v1576_v42, %v1569_v38 }
 0xcc0   :  { %1595 = vst [vmem:[#allocation1 + $0x1] ss:$2 sm:$0xff] %v5571_v43 }
 0xcc7   :  { %v1596_v52 = vld.sshfl [vmem:[#allocation1] sm:$0xff pattern:$0x75316420] }
 0xcc8   :  { %1630 = vst [vmem:[#allocation1] ss:$2 sm:$0xff] %v5559_v27  ;;  %4477 = vmatmul.msk.f32.vlgmr.msra.gmra.mxu0 %vm290_vm1, %v1596_v52 }
 0xcc9   :  { %1632 = vst [vmem:[#allocation1 + $0x1] ss:$2 sm:$0xff] %v5571_v43 }
 0xcd0   :  { %v1633_v7 = vld.sshfl [vmem:[#allocation1] sm:$0xff pattern:$0x75316420] }
 0xcd1   :  { %1666 = vst [vmem:[#allocation1] ss:$2 sm:$0xff] %v5559_v27  ;;  %4483 = vmatmul.msk.f32.vlgmr.msrb.gmra.mxu1 %vm290_vm1, %v1633_v7  ;;  %v4527_v7 = vld [vmem:[%s5110_s19 + $0xd8] sm:$0xff] }
 0xcd2   :  { %1668 = vst [vmem:[#allocation1 + $0x1] ss:$2 sm:$0xff] %v5571_v43 }
 0xcd9   :  { %v1669_v60 = vld.sshfl [vmem:[#allocation1] sm:$0xff pattern:$0x75316420] }
 0xcda   :  { %1764 = vst [vmem:[#allocation1] ss:$2 sm:$0xff] %v5559_v27  ;;  %4489 = vmatmul.msk.f32.vlgmr.msrb.gmra.mxu2 %vm290_vm1, %v1669_v60  ;;  %v4525_v60 = vld [vmem:[%s5110_s19 + $0xc8] sm:$0xff] }
 0xcdb   :  { %1766 = vst [vmem:[#allocation1 + $0x1] ss:$2 sm:$0xff] %v5571_v43 }
 0xce2   :  { %v1767_v11 = vld.sshfl [vmem:[#allocation1] sm:$0xff pattern:$0x75316420] }
 0xce3   :  { %1801 = vst [vmem:[#allocation1] ss:$2 sm:$0xff] %v5559_v27  ;;  %4499 = vmatmul.msk.f32.vlgmr.msra.gmra.mxu1 %vm290_vm1, %v1767_v11  ;;  %v4524_v11 = vld [vmem:[%s5110_s19 + $0xc0] sm:$0xff] }
 0xce4   :  { %1803 = vst [vmem:[#allocation1 + $0x1] ss:$2 sm:$0xff] %v5571_v43 }
 0xceb   :  { %v1804_v61 = vld.sshfl [vmem:[#allocation1] sm:$0xff pattern:$0x75316420] }
 0xcec   :  { %1837 = vst [vmem:[#allocation1] ss:$2 sm:$0xff] %v5559_v27  ;;  %4505 = vmatmul.msk.f32.vlgmr.msra.gmra.mxu2 %vm290_vm1, %v1804_v61 }
 0xced   :  { %1839 = vst [vmem:[#allocation1 + $0x1] ss:$2 sm:$0xff] %v5571_v43 }
 0xcf4   :  { %v1840_v62 = vld.sshfl [vmem:[#allocation1] sm:$0xff pattern:$0x75316420] }
 0xcf5   :  { %1981 = vst [vmem:[#allocation1] ss:$2 sm:$0xff] %v5559_v27 }
 0xcf6   :  { %1983 = vst [vmem:[#allocation1 + $0x1] ss:$2 sm:$0xff] %v5571_v43 }
 0xcfd   :  { %v5601_v63 = vld.sshfl [vmem:[#allocation1] sm:$0xff pattern:$0x75316420] }
 0xcfe   :  { %2018 = vst [vmem:[#allocation1] ss:$2 sm:$0xff] %v5559_v27 }
 0xcff   :  { %2020 = vst [vmem:[#allocation1 + $0x1] ss:$2 sm:$0xff] %v5571_v43 }
 0xd06   :  { %v5605_v0 = vld.sshfl [vmem:[#allocation1] sm:$0xff pattern:$0x75316420] }
 0xd07   :  { %2054 = vst [vmem:[#allocation1] ss:$2 sm:$0xff] %v5559_v27 }
 0xd08   :  { %2056 = vst [vmem:[#allocation1 + $0x1] ss:$2 sm:$0xff] %v5571_v43 }
 0xd0f   :  { %v5609_v1 = vld.sshfl [vmem:[#allocation1] sm:$0xff pattern:$0x75316420] }
 0xd10   :  { %2176 = vst [vmem:[#allocation1] ss:$2 sm:$0xff] %v5559_v27 }
 0xd11   :  { %2178 = vst [vmem:[#allocation1 + $0x1] ss:$2 sm:$0xff] %v5571_v43 }
 0xd18   :  { %v5613_v2 = vld.sshfl [vmem:[#allocation1] sm:$0xff pattern:$0x75316420] }
 0xd19   :  { %2213 = vst [vmem:[#allocation1] ss:$2 sm:$0xff] %v5559_v27 }
 0xd1a   :  { %2215 = vst [vmem:[#allocation1 + $0x1] ss:$2 sm:$0xff] %v5571_v43 }
 0xd21   :  { %v5617_v3 = vld.sshfl [vmem:[#allocation1] sm:$0xff pattern:$0x75316420] }
 0xd22   :  { %2249 = vst [vmem:[#allocation1] ss:$2 sm:$0xff] %v5559_v27 }
 0xd23   :  { %2251 = vst [vmem:[#allocation1 + $0x1] ss:$2 sm:$0xff] %v5571_v43 }
 0xd45   :  { %v1616_v5 = vpop.f32.mrf.mxu0 }
 0xd46   :  { %v1617_v8 = vadd.f32 %v4799_v4, %v1616_v5  ;;  %v4515_v4 = vld [vmem:[%s5130_s12 + $0x28] sm:$0xff]  ;;  %v4533_v5 = vld [vmem:[%s5120_s30 + $0xd8] sm:$0xff] }
 0xd47   :  { %1943 = vmatpush.msrb.mxu2 %v4515_v4 }
 0xd48   :  { %v1619_v13 = vmul.f32 0.35355338, %v1617_v8  ;;  %v4531_v8 = vld [vmem:[%s5120_s30 + $0xc8] sm:$0xff] }
 0xd49   :  { %2072 = vmatpush.msra.mxu2 %v4533_v5 }
 0xd4e   :  { %v1653_v9 = vpop.f32.mrf.mxu1 }
 0xd4f   :  { %v1654_v10 = vadd.f32 %v4800_v6, %v1653_v9  ;;  %v4532_v6 = vld [vmem:[%s5120_s30 + $0xd0] sm:$0xff]  ;;  %v4530_v9 = vld [vmem:[%s5120_s30 + $0xc0] sm:$0xff] }
 0xd50   :  { %2073 = vmatpush.msra.mxu2 %v4532_v6 }
 0xd51   :  { %4490 = vmatpush.xpose.msk.msrb.mxu3 %vm384_vm2, %v1654_v10  ;;  %v4544_v10 = vld [vmem:[%s5100_s8 + $0xf8] sm:$0xff] }
 0xd52   :  { %2074 = vmatpush.msra.mxu2 %v4531_v8 }
 0xd54   :  { %4491 = vmatmul.msk.f32.vlgmr.msrb.gmra.mxu3 %vm384_vm2, %v1619_v13  ;;  %2075 = vmatpush.msra.mxu2 %v4530_v9  ;;  %v4542_v13 = vld [vmem:[%s5100_s8 + $0xe8] sm:$0xff] }
 0xd55   :  { %1855 = vmatpush.msra.mxu3 %v4509_v12 }
 0xd57   :  { %1856 = vmatpush.msra.mxu3 %v4508_v14  ;;  %v4805_v14 = vld [vmem:[%s5105_s14 + $0x6] ss:$0 sm:$0xff] }
 0xd59   :  { %1857 = vmatpush.msra.mxu3 %v4507_v15 }
 0xd5b   :  { %1858 = vmatpush.msra.mxu3 %v4506_v16  ;;  %v4806_v16 = vld [vmem:[%s5115_s24 + $0x6] ss:$0 sm:$0xff] }
 0xd5c   :  { %4511 = vmatmul.msk.f32.vlgmr.msra.gmra.mxu3 %vm290_vm1, %v1840_v62 }
 0xd5d   :  { %v1689_v45 = vpop.f32.mrf.mxu2  ;;  %1966 = vmatpush.msrb.mxu3 %v4493_v47 }
 0xd5e   :  { %v1690_v48 = vadd.f32 %v4801_v17, %v1689_v45  ;;  %v4541_v17 = vld [vmem:[%s5100_s8 + $0xe0] sm:$0xff] }
 0xd60   :  { %1747 = vmatpush.msrb.mxu0 %v1690_v48  ;;  %v1787_v36 = vpop.f32.mrf.mxu1 }
 0xd61   :  { %v1788_v38 = vadd.f32 %v4802_v33, %v1787_v36 }
 0xd63   :  { %v1790_v42 = vmul.f32 0.35355338, %v1788_v38  ;;  %v4556_v38 = vld [vmem:[%s5120_s30 + $0xf8] sm:$0xff] }
 0xd6f   :  { %v1824_v19 = vpop.f32.mrf.mxu2 }
 0xd70   :  { %v1825_v46 = vadd.f32 %v4803_v18, %v1824_v19  ;;  %v4550_v19 = vld [vmem:[%s5110_s19 + $0xf8] sm:$0xff] }
 0xd72   :  { %4512 = vmatpush.xpose.msk.msra.mxu0 %vm384_vm2, %v1825_v46 }
 0xdd7   :  { %v1715_v53 = vpop.f32.mrf.mxu3 }
 0xdd8   :  { %v1716_v20 = vadd.f32 %v1715_v53, %v5634_v39  ;;  %v4549_v53 = vld [vmem:[%s5110_s19 + $0xf0] sm:$0xff] }
 0xdda   :  { %v1718_v21 = vsel %vm384_vm2, %v1716_v20, -inf }
 0xddb   :  { %1719 = vmax.xlane.f32.xlu0 %v1718_v21  ;;  %v4547_v21 = vld [vmem:[%s5110_s19 + $0xe0] sm:$0xff] }
 0xddf   :  { %v1860_v23 = vpop.f32.mrf.mxu3 }
 0xde0   :  { %v1861_v24 = vadd.f32 %v4804_v22, %v1860_v23 }
 0xde2   :  { %1918 = vmatpush.msrb.mxu1 %v1861_v24 }
 0xde4   :  { %2036 = vmatpush.msra.mxu1 %v4527_v7 }
 0xde6   :  { %2037 = vmatpush.msra.mxu1 %v4526_v59 }
 0xde8   :  { %2038 = vmatpush.msra.mxu1 %v4525_v60 }
 0xdea   :  { %2039 = vmatpush.msra.mxu1 %v4524_v11 }
 0xe4e   :  { %v1720_v44 = vpop.xlane.xlu0 %1719 }
 0xe4f   :  { %v1721_v25 = vsub.f32 %v1716_v20, %v1720_v44  ;;  %v4548_v20 = vld [vmem:[%s5110_s19 + $0xe8] sm:$0xff]  ;;  %v4807_v44 = vld [vmem:[%s5125_s6 + $0x6] ss:$0 sm:$0xff] }
 0xe51   :  { %v1722_v26 = vmul.f32 1.442695, %v1721_v25 }
 0xe53   :  { %4894 = vpow2.f32 %v1722_v26 }
 0xe59   :  { %v4895_v29 = vpop.eup %4894 }
 0xe5a   :  { %v1724_v30 = vsel %vm384_vm2, %v4895_v29, 0.0 }
 0xe5b   :  { %1725 = vadd.xlane.f32.xlu1 %v1724_v30 }
 0xece   :  { %v1726_v31 = vpop.xlane.xlu1 %1725 }
 0xecf   :  { %4896 = vrcp.f32 %v1726_v31  ;;  %v4809_v31 = vld [vmem:[%s5115_s24 + $0x7] ss:$0 sm:$0xff] }
 0xed5   :  { %v4897_v32 = vpop.eup %4896 }
 0xed6   :  { %v1728_v34 = vmul.f32 %v4897_v32, %v4895_v29 }
 0xed8   :  { %4492 = vmatmul.msk.f32.vlgmr.msrb.gmra.mxu0 %vm384_vm2, %v1728_v34 }
 0xed9   :  { %1999 = vmatpush.msrb.mxu0 %v4521_v35 }
 0xedb   :  { %2000 = vmatpush.msrb.mxu0 %v4520_v37 }
 0xedd   :  { %2001 = vmatpush.msrb.mxu0 %v4519_v40  ;;  %v4555_v40 = vld [vmem:[%s5120_s30 + $0xf0] sm:$0xff] }
 0xedf   :  { %2002 = vmatpush.msrb.mxu0 %v4518_v41  ;;  %v4554_v41 = vld [vmem:[%s5120_s30 + $0xe8] sm:$0xff] }
 0xee0   :  { %4513 = vmatmul.msk.f32.vlgmr.msra.gmra.mxu0 %vm384_vm2, %v1790_v42  ;;  %v4553_v42 = vld [vmem:[%s5120_s30 + $0xe0] sm:$0xff] }
 0xee8   :  { %4523 = vmatmul.msk.f32.vlgmr.msrb.gmra.mxu0 %vm290_vm1, %v5601_v63 }
 0xf55   :  { %v1749_v49 = vpop.f32.mrf.mxu0 }
 0xf56   :  { %4517 = vmatmul.msk.f32.vlgmr.msrb.gmra.mxu3 %vm384_vm2, %v1749_v49 }
 0xf5d   :  { %v1886_v50 = vpop.f32.mrf.mxu0 }
 0xf5e   :  { %v1887_v51 = vadd.f32 %v1886_v50, %v5634_v39 }
 0xf60   :  { %v1889_v52 = vsel %vm384_vm2, %v1887_v51, -inf }
 0xf61   :  { %1890 = vmax.xlane.f32.xlu2 %v1889_v52  ;;  %v4808_v52 = vld [vmem:[%s5105_s14 + $0x7] ss:$0 sm:$0xff] }
 0xf65   :  { %v2004_v15 = vpop.f32.mrf.mxu0 }
 0xf66   :  { %v2005_v45 = vadd.f32 %v4805_v14, %v2004_v15  ;;  %v4811_v14 = vld [vmem:[%s5135_s20 + $0x1] ss:$0 sm:$0xff] }
 0xf68   :  { %v2007_v46 = vmul.f32 0.35355338, %v2005_v45 }
 0xfd4   :  { %v1891_v54 = vpop.xlane.xlu2 %1890 }
 0xfd5   :  { %v1892_v55 = vsub.f32 %v1887_v51, %v1891_v54  ;;  %v2252_v51 = vld.sshfl [vmem:[#allocation1] sm:$0xff pattern:$0x75316420] }
 0xfd7   :  { %v1893_v56 = vmul.f32 1.442695, %v1892_v55 }
 0xfd9   :  { %4898 = vpow2.f32 %v1893_v56  ;;  %v1968_v22 = vpop.f32.mrf.mxu3 }
 0xfdf   :  { %v4899_v57 = vpop.eup %4898 }
 0xfe0   :  { %v1895_v58 = vsel %vm384_vm2, %v4899_v57, 0.0 }
 0xfe1   :  { %1896 = vadd.xlane.f32.xlu0 %v1895_v58 }
0x1054   :  { %v1897_v61 = vpop.xlane.xlu0 %1896 }
0x1055   :  { %4900 = vrcp.f32 %v1897_v61 }
0x105b   :  { %v4901_v62 = vpop.eup %4900 }
0x105c   :  { %v1899_v63 = vmul.f32 %v4901_v62, %v4899_v57  ;;  %v4810_v57 = vld [vmem:[%s5125_s6 + $0x7] ss:$0 sm:$0xff] }
0x105e   :  { %4514 = vmatmul.msk.f32.vlgmr.msrb.gmra.mxu1 %vm384_vm2, %v1899_v63 }
0x1066   :  { %4529 = vmatmul.msk.f32.vlgmr.msra.gmra.mxu1 %vm290_vm1, %v5605_v0  ;;  %v4543_v0 = vld [vmem:[%s5100_s8 + $0xf0] sm:$0xff] }
0x10db   :  { %v1920_v12 = vpop.f32.mrf.mxu1 }
0x10dc   :  { %4516 = vmatmul.msk.f32.vlgmr.msrb.gmra.mxu2 %vm384_vm2, %v1920_v12 }
0x10dd   :  { %2194 = vmatpush.msrb.mxu2 %v4544_v10 }
0x10df   :  { %2195 = vmatpush.msrb.mxu2 %v4543_v0 }
0x10e1   :  { %2196 = vmatpush.msrb.mxu2 %v4542_v13  ;;  %v4562_v13 = vld [vmem:[%s5130_s12 + $0x38] sm:$0xff] }
0x10e3   :  { %v2041_v48 = vpop.f32.mrf.mxu1  ;;  %2197 = vmatpush.msrb.mxu2 %v4541_v17 }
0x10e4   :  { %v2042_v18 = vadd.f32 %v4806_v16, %v2041_v48  ;;  %4535 = vmatmul.msk.f32.vlgmr.msra.gmra.mxu2 %vm290_vm1, %v5609_v1  ;;  %v4539_v1 = vld [vmem:[%s5130_s12 + $0x30] sm:$0xff] }
0x10e5   :  { %2160 = vmatpush.msrb.mxu1 %v4539_v1 }
0x10e6   :  { %4536 = vmatpush.xpose.msk.msra.mxu3 %vm384_vm2, %v2042_v18 }
0x10e9   :  { %4537 = vmatmul.msk.f32.vlgmr.msra.gmra.mxu3 %vm384_vm2, %v2007_v46 }
0x10ea   :  { %2231 = vmatpush.msrb.mxu3 %v4550_v19 }
0x10ec   :  { %2232 = vmatpush.msrb.mxu3 %v4549_v53  ;;  %4546 = vmatmul.msk.f32.vlgmr.msrb.gmra.mxu2 %vm290_vm1, %v5613_v2 }
0x10ee   :  { %2233 = vmatpush.msrb.mxu3 %v4548_v20 }
0x10f0   :  { %2234 = vmatpush.msrb.mxu3 %v4547_v21 }
0x10f1   :  { %4552 = vmatmul.msk.f32.vlgmr.msrb.gmra.mxu3 %vm290_vm1, %v5617_v3 }
0x10f2   :  { %2355 = vmatpush.msra.mxu3 %v4562_v13 }
0x115f   :  { %v1945_v23 = vpop.f32.mrf.mxu2 }
0x1160   :  { %v1969_v24 = vadd.f32 %v1968_v22, %v1945_v23 }
0x1167   :  { %v2077_v25 = vpop.f32.mrf.mxu2 }
0x1168   :  { %v2078_v26 = vadd.f32 %v4807_v44, %v2077_v25 }
0x116a   :  { %2135 = vmatpush.msra.mxu0 %v2078_v26  ;;  %v4570_v26 = vld [vmem:[%s5140_s27 + $0x38] sm:$0xff] }
0x116c   :  { %v2103_v29 = vpop.f32.mrf.mxu3  ;;  %2267 = vmatpush.msrb.mxu0 %v4556_v38 }
0x116d   :  { %v2104_v2 = vadd.f32 %v2103_v29, %v5634_v39  ;;  %v4569_v29 = vld [vmem:[%s5140_s27 + $0x30] sm:$0xff] }
0x116e   :  { %2268 = vmatpush.msrb.mxu0 %v4555_v40 }
0x116f   :  { %v2106_v30 = vsel %vm384_vm2, %v2104_v2, -inf  ;;  %v2199_v54 = vpop.f32.mrf.mxu2 }
0x1170   :  { %2107 = vmax.xlane.f32.xlu1 %v2106_v30  ;;  %2269 = vmatpush.msrb.mxu0 %v4554_v41  ;;  %v2200_v56 = vadd.f32 %v4808_v52, %v2199_v54  ;;  %v4812_v41 = vld [vmem:[%s5160_s25 + $0x1] ss:$0 sm:$0xff] }
0x1171   :  { %v2442_v52 = vrot.slane %v4812_v41, 4 }
0x1172   :  { %2270 = vmatpush.msrb.mxu0 %v4553_v42  ;;  %v2202_v58 = vmul.f32 0.35355338, %v2200_v56 }
0x1174   :  { %v2236_v3 = vpop.f32.mrf.mxu3 }
0x1175   :  { %v2237_v32 = vadd.f32 %v4809_v31, %v2236_v3  ;;  %v5044_v31 = vmov 839922192  }
0x1176   :  { %v2404_v3 = vunpack.c.l.s4 %v5044_v31 }
0x1177   :  { %4559 = vmatpush.xpose.msk.msra.mxu1 %vm384_vm2, %v2237_v32  ;;  %v5045_v32 = vmov 1985246804  }
0x11e3   :  { %v2108_v33 = vpop.xlane.xlu1 %2107 }
0x11e4   :  { %v2109_v34 = vsub.f32 %v2104_v2, %v2108_v33  ;;  %v4568_v2 = vld [vmem:[%s5140_s27 + $0x28] sm:$0xff]  ;;  %v2408_v33 = vunpack.c.l.s4 %v5045_v32 }
0x11e6   :  { %v2110_v35 = vmul.f32 1.442695, %v2109_v34  ;;  %v4567_v34 = vld [vmem:[%s5140_s27 + $0x20] sm:$0xff]  ;;  %v5721_v38 = vunpack.c.0.s8 %v2408_v33 }
0x11e8   :  { %4902 = vpow2.f32 %v2110_v35 }
0x11ee   :  { %v4903_v36 = vpop.eup %4902 }
0x11ef   :  { %v2112_v37 = vsel %vm384_vm2, %v4903_v36, 0.0 }
0x11f0   :  { %2113 = vadd.xlane.f32.xlu2 %v2112_v37  ;;  %v5719_v37 = vunpack.c.0.s8 %v2404_v3 }
0x1263   :  { %v2114_v47 = vpop.xlane.xlu2 %2113 }
0x1264   :  { %4904 = vrcp.f32 %v2114_v47 }
0x126a   :  { %v4905_v49 = vpop.eup %4904 }
0x126b   :  { %v2116_v50 = vmul.f32 %v4905_v49, %v4903_v36 }
0x126d   :  { %4538 = vmatmul.msk.f32.vlgmr.msra.gmra.mxu0 %vm384_vm2, %v2116_v50 }
0x126e   :  { %2483 = vmatpush.msra.mxu0 %v4570_v26 }
0x1270   :  { %2484 = vmatpush.msra.mxu0 %v4569_v29 }
0x1272   :  { %2485 = vmatpush.msra.mxu0 %v4568_v2 }
0x1274   :  { %2486 = vmatpush.msra.mxu0 %v4567_v34 }
0x1275   :  { %4558 = vmatmul.msk.f32.vlgmr.msrb.gmra.mxu0 %vm290_vm1, %v2252_v51  ;;  %v4813_v51 = vld [vmem:[%s6099_s0 + $0x1] ss:$0 sm:$0xff] }
0x12ea   :  { %v2137_v55 = vpop.f32.mrf.mxu0 }
0x12eb   :  { %4540 = vmatmul.msk.f32.vlgmr.msrb.gmra.mxu1 %vm384_vm2, %v2137_v55 }
0x12f2   :  { %v2272_v7 = vpop.f32.mrf.mxu0 }
0x12f3   :  { %v2273_v59 = vadd.f32 %v4810_v57, %v2272_v7  ;;  %4560 = vmatmul.msk.f32.vlgmr.msra.gmra.mxu1 %vm384_vm2, %v2202_v58  ;;  %v2449_v7 = vrot.slane %v4813_v51, 4 }
0x12f5   :  { %2330 = vmatpush.msra.mxu2 %v2273_v59 }
0x1368   :  { %v2162_v60 = vpop.f32.mrf.mxu1 }
0x1369   :  { %v2165_v11 = vadd.f32 %v2162_v60, %v1969_v24 }
0x1370   :  { %v2298_v61 = vpop.f32.mrf.mxu1 }
0x1371   :  { %v2299_v62 = vadd.f32 %v2298_v61, %v5634_v39 }
0x1373   :  { %v2301_v63 = vsel %vm384_vm2, %v2299_v62, -inf }
0x1374   :  { %2302 = vmax.xlane.f32.xlu0 %v2301_v63 }
0x13e7   :  { %v2303_v4 = vpop.xlane.xlu0 %2302 }
0x13e8   :  { %v2304_v5 = vsub.f32 %v2299_v62, %v2303_v4 }
0x13ea   :  { %v2305_v6 = vmul.f32 1.442695, %v2304_v5  ;;  %v4576_v5 = vld [vmem:[%s6100_s17 + $0x38] sm:$0xff] }
0x13eb   :  { %2525 = vmatpush.msrb.mxu1 %v4576_v5  ;;  %v4584_v5 = vld [vmem:[%s6103_s22 + $0x78] sm:$0xff] }
0x13ec   :  { %4906 = vpow2.f32 %v2305_v6  ;;  %v4575_v6 = vld [vmem:[%s6100_s17 + $0x30] sm:$0xff]  ;;  %2714 = vmatpush.msrb.mxu3 %v4584_v5 }
0x13ed   :  { %2526 = vmatpush.msrb.mxu1 %v4575_v6  ;;  %v4582_v6 = vld [vmem:[%s6103_s22 + $0x68] sm:$0xff] }
0x13f2   :  { %v4907_v8 = vpop.eup %4906 }
0x13f3   :  { %v2307_v9 = vsel %vm384_vm2, %v4907_v8, 0.0 }
0x13f4   :  { %2308 = vadd.xlane.f32.xlu1 %v2307_v9  ;;  %v4573_v9 = vld [vmem:[%s6100_s17 + $0x20] sm:$0xff] }
0x1467   :  { %v2309_v10 = vpop.xlane.xlu1 %2308 }
0x1468   :  { %4908 = vrcp.f32 %v2309_v10  ;;  %v4814_v10 = vld [vmem:[%s6101_s29 + $0x1] ss:$0 sm:$0xff] }
0x146e   :  { %v4909_v12 = vpop.eup %4908 }
0x146f   :  { %v2311_v0 = vmul.f32 %v4909_v12, %v4907_v8  ;;  %v4574_v8 = vld [vmem:[%s6100_s17 + $0x28] sm:$0xff] }
0x1470   :  { %2527 = vmatpush.msrb.mxu1 %v4574_v8  ;;  %v4581_v8 = vld [vmem:[%s6103_s22 + $0x60] sm:$0xff] }
0x1471   :  { %4561 = vmatmul.msk.f32.vlgmr.msra.gmra.mxu2 %vm384_vm2, %v2311_v0 }
0x1472   :  { %2528 = vmatpush.msrb.mxu1 %v4573_v9 }
0x14f4   :  { %v2332_v39 = vpop.f32.mrf.mxu2 }
0x14f5   :  { %4563 = vmatmul.msk.f32.vlgmr.msra.gmra.mxu3 %vm384_vm2, %v2332_v39 }
0x1578   :  { %v2357_v15 = vpop.f32.mrf.mxu3 }
0x1579   :  { %v2360_v16 = vadd.f32 %v2357_v15, %v2165_v11 }
0x157b   :  { %v2366_v17 = vadd.f32 %v4811_v14, %v2360_v16 }
0x157d   :  { %v2368_v45 = vrot.slane %v2366_v17, 4  ;;  %v2370_v48 = vadd.f32 %v2366_v17, %v5559_v27 }
0x157f   :  { %v2371_v18 = vadd.f32 %v2368_v45, %v5571_v43  ;;  %2378 = vst [vmem:[#allocation1] ss:$2 sm:$0xff] %v2370_v48  ;;  %v2387_v19 = vmul.f32 %v2370_v48, %v2370_v48 }
0x1581   :  { %2380 = vst [vmem:[#allocation1 + $0x1] ss:$2 sm:$0xff] %v2371_v18  ;;  %v2388_v53 = vmul.f32 %v2371_v18, %v2371_v18 }
0x1588   :  { %v2381_v46 = vld.sshfl [vmem:[#allocation1] sm:$0xff pattern:$0x75316420] }
0x1589   :  { %2391 = vst [vmem:[#allocation1] ss:$2 sm:$0xff] %v2387_v19  ;;  %v2383_v20 = vsel %vm290_vm1, %v2381_v46, 0.0  ;;  %v4815_v19 = vld [vmem:[%s6102_s3 + $0x1] ss:$0 sm:$0xff] }
0x158a   :  { %2393 = vst [vmem:[#allocation1 + $0x1] ss:$2 sm:$0xff] %v2388_v53  ;;  %2384 = vadd.xlane.f32.xlu2 %v2383_v20 }
0x1591   :  { %v2394_v21 = vld.sshfl [vmem:[#allocation1] sm:$0xff pattern:$0x75316420] }
0x1592   :  { %v2396_v1 = vsel %vm290_vm1, %v2394_v21, 0.0 }
0x1593   :  { %2397 = vadd.xlane.f32.xlu0 %v2396_v1 }
0x15fd   :  { %v2385_v27 = vpop.xlane.xlu2 %2384 }
0x15fe   :  { %v2386_v43 = vmul.f32 %v2385_v27, %v5481_v28 }
0x1600   :  { %v2400_v24 = vmul.f32 %v2386_v43, %v2386_v43  ;;  %v2406_v47 = vperm.slane %v2386_v43, %v5719_v37  ;;  %v2410_v49 = vperm.slane %v2386_v43, %v5721_v38 }
0x1602   :  { %v2413_v55 = vsub.f32 %v2370_v48, %v2406_v47  ;;  %v2414_v56 = vsub.f32 %v2371_v18, %v2410_v49  ;;  %v4817_v49 = vld [vmem:[%s6105_s26 + $0x1] ss:$0 sm:$0xff] }
0x1606   :  { %v2398_v22 = vpop.xlane.xlu0 %2397 }
0x1607   :  { %v2399_v23 = vmul.f32 %v2398_v22, %v5481_v28 }
0x1609   :  { %v2401_v44 = vsub.f32 %v2399_v23, %v2400_v24 }
0x160b   :  { %v2415_v25 = vadd.f32 1e-05, %v2401_v44 }
0x160d   :  { %4910 = vrsqrt.f32 %v2415_v25  ;;  %vm2422_vm11 = vweird.f32 %v2415_v25 }
0x1613   :  { %v4911_v30 = vpop.eup %4910 }
0x1614   :  { %v2417_v35 = vmul.f32 %v4911_v30, %v2415_v25  ;;  %vm2423_vm10 = vweird.f32 %v4911_v30 }
0x1615   :  { %vm2424_vm12 = vmor %vm2422_vm11, %vm2423_vm10 }
0x1616   :  { %v2418_v36 = vmul.f32 %v4911_v30, %v2417_v35 }
0x1618   :  { %v2419_v40 = vmul.f32 0.5, %v2418_v36  ;;  %v4816_v36 = vld [vmem:[%s6104_s23 + $0x1] ss:$0 sm:$0xff] }
0x161a   :  { %v2420_v42 = vsub.f32 1.5, %v2419_v40 }
0x161c   :  { %v2421_v50 = vmul.f32 %v4911_v30, %v2420_v42 }
0x161e   :  { %v2425_v54 = vsel %vm2424_vm12, %v4911_v30, %v2421_v50  ;;  %v2608_v50 = vrot.slane %v4816_v36, 4  ;;  %vm4049_vm12 = vcmask 48128  }
0x161f   :  { %v2430_v57 = vperm.slane %v2425_v54, %v5719_v37  ;;  %v2434_v58 = vperm.slane %v2425_v54, %v5721_v38 }
0x1621   :  { %v2437_v59 = vmul.f32 %v2430_v57, %v2413_v55  ;;  %v2438_v60 = vmul.f32 %v2434_v58, %v2414_v56  ;;  %v4587_v58 = vld [vmem:[%s6103_s22 + $0x90] sm:$0xff] }
0x1623   :  { %v2444_v11 = vmul.f32 %v4812_v41, %v2437_v59  ;;  %v2445_v61 = vmul.f32 %v2442_v52, %v2438_v60  ;;  %v4588_v52 = vld [vmem:[%s6103_s22 + $0x98] sm:$0xff] }
0x1624   :  { %2686 = vmatpush.msrb.mxu2 %v4588_v52 }
0x1625   :  { %v2451_v62 = vadd.f32 %v4813_v51, %v2444_v11  ;;  %v2452_v63 = vadd.f32 %v2449_v7, %v2445_v61  ;;  %v2615_v7 = vrot.slane %v4817_v49, 4  ;;  %v4586_v11 = vld [vmem:[%s6103_s22 + $0x88] sm:$0xff] }
0x1626   :  { %2687 = vmatpush.msrb.mxu2 %v4587_v58 }
0x1627   :  { %2465 = vst [vmem:[#allocation1] ss:$2 sm:$0xff] %v2451_v62 }
0x1628   :  { %2467 = vst [vmem:[#allocation1 + $0x1] ss:$2 sm:$0xff] %v2452_v63  ;;  %2688 = vmatpush.msrb.mxu2 %v4586_v11 }
0x162f   :  { %v2468_v4 = vld.sshfl [vmem:[#allocation1] sm:$0xff pattern:$0x75316420] }
0x1630   :  { %4572 = vmatmul.msk.f32.vlgmr.msra.gmra.mxu0 %vm290_vm1, %v2468_v4 }
0x16ad   :  { %v2488_v12 = vpop.f32.mrf.mxu0 }
0x16ae   :  { %v2489_v0 = vadd.f32 %v4814_v10, %v2488_v12  ;;  %v4592_v10 = vld [vmem:[%s6103_s22 + $0xb8] sm:$0xff] }
0x16af   :  { %2742 = vmatpush.msrb.mxu0 %v4592_v10 }
0x16b0   :  { %v2491_v13 = vmul.f32 %v2489_v0, %v2489_v0 }
0x16b2   :  { %v2492_v39 = vmul.f32 %v2491_v13, %v2489_v0  ;;  %v4590_v13 = vld [vmem:[%s6103_s22 + $0xa8] sm:$0xff] }
0x16b4   :  { %v2493_v14 = vmul.f32 0.044715, %v2492_v39  ;;  %v4589_v39 = vld [vmem:[%s6103_s22 + $0xa0] sm:$0xff] }
0x16b6   :  { %v2494_v15 = vadd.f32 %v2493_v14, %v2489_v0 }
0x16b8   :  { %v2495_v16 = vmul.f32 0.7978846, %v2494_v15 }
0x16ba   :  { %4912 = vtanh.f32 %v2495_v16 }
0x16c0   :  { %v4913_v17 = vpop.eup %4912 }
0x16c1   :  { %v2497_v45 = vadd.f32 1.0, %v4913_v17 }
0x16c3   :  { %v2498_v48 = vmul.f32 0.5, %v2497_v45 }
0x16c5   :  { %v2499_v18 = vmul.f32 %v2498_v48, %v2489_v0  ;;  %v4591_v0 = vld [vmem:[%s6103_s22 + $0xb0] sm:$0xff] }
0x16c6   :  { %2743 = vmatpush.msrb.mxu0 %v4591_v0 }
0x16c7   :  { %4578 = vmatmul.msk.f32.vlgmr.msrb.gmra.mxu1 %vm290_vm1, %v2499_v18 }
0x16c8   :  { %2744 = vmatpush.msrb.mxu0 %v4590_v13 }
0x16ca   :  { %2745 = vmatpush.msrb.mxu0 %v4589_v39  ;;  %v4624_v39 = vld [vmem:[%s5100_s8 + $0x138] sm:$0xff] }
0x1744   :  { %v2530_v46 = vpop.f32.mrf.mxu1 }
0x1745   :  { %v2531_v53 = vadd.f32 %v4815_v19, %v2530_v46 }
0x1747   :  { %v2534_v20 = vrot.slane %v2531_v53, 4  ;;  %v2536_v21 = vadd.f32 %v2531_v53, %v2451_v62 }
0x1749   :  { %v2537_v1 = vadd.f32 %v2534_v20, %v2452_v63  ;;  %2544 = vst [vmem:[#allocation1] ss:$2 sm:$0xff] %v2536_v21  ;;  %v2553_v27 = vmul.f32 %v2536_v21, %v2536_v21  ;;  %v4585_v63 = vld [vmem:[%s6103_s22 + $0x80] sm:$0xff] }
0x174a   :  { %2689 = vmatpush.msrb.mxu2 %v4585_v63 }
0x174b   :  { %2546 = vst [vmem:[#allocation1 + $0x1] ss:$2 sm:$0xff] %v2537_v1  ;;  %v2554_v22 = vmul.f32 %v2537_v1, %v2537_v1 }
0x1752   :  { %v2547_v43 = vld.sshfl [vmem:[#allocation1] sm:$0xff pattern:$0x75316420] }
0x1753   :  { %2557 = vst [vmem:[#allocation1] ss:$2 sm:$0xff] %v2553_v27  ;;  %v2549_v23 = vsel %vm290_vm1, %v2547_v43, 0.0 }
0x1754   :  { %2559 = vst [vmem:[#allocation1 + $0x1] ss:$2 sm:$0xff] %v2554_v22  ;;  %2550 = vadd.xlane.f32.xlu1 %v2549_v23 }
0x175b   :  { %v2560_v24 = vld.sshfl [vmem:[#allocation1] sm:$0xff pattern:$0x75316420] }
0x175c   :  { %v2562_v44 = vsel %vm290_vm1, %v2560_v24, 0.0 }
0x175d   :  { %2563 = vadd.xlane.f32.xlu2 %v2562_v44 }
0x17c7   :  { %v2551_v25 = vpop.xlane.xlu1 %2550 }
0x17c8   :  { %v2552_v26 = vmul.f32 %v2551_v25, %v5481_v28 }
0x17ca   :  { %v2566_v30 = vmul.f32 %v2552_v26, %v2552_v26  ;;  %v2572_v41 = vperm.slane %v2552_v26, %v5719_v37  ;;  %v2576_v42 = vperm.slane %v2552_v26, %v5721_v38  ;;  %v4818_v26 = vld [vmem:[%s6106_s28 + $0x1] ss:$0 sm:$0xff] }
0x17cc   :  { %v2579_v54 = vsub.f32 %v2536_v21, %v2572_v41  ;;  %v2580_v55 = vsub.f32 %v2537_v1, %v2576_v42  ;;  %v4599_v42 = vld [vmem:[%s5100_s8 + $0x108] sm:$0xff] }
0x17d0   :  { %v2564_v29 = vpop.xlane.xlu2 %2563 }
0x17d1   :  { %v2565_v2 = vmul.f32 %v2564_v29, %v5481_v28 }
0x17d3   :  { %v2567_v31 = vsub.f32 %v2565_v2, %v2566_v30 }
0x17d5   :  { %v2581_v3 = vadd.f32 1e-05, %v2567_v31 }
0x17d7   :  { %4914 = vrsqrt.f32 %v2581_v3  ;;  %vm2588_vm14 = vweird.f32 %v2581_v3 }
0x17dd   :  { %v4915_v32 = vpop.eup %4914 }
0x17de   :  { %v2583_v33 = vmul.f32 %v4915_v32, %v2581_v3  ;;  %vm2589_vm13 = vweird.f32 %v4915_v32 }
0x17df   :  { %vm2590_vm15 = vmor %vm2588_vm14, %vm2589_vm13 }
0x17e0   :  { %v2584_v34 = vmul.f32 %v4915_v32, %v2583_v33 }
0x17e2   :  { %v2585_v35 = vmul.f32 0.5, %v2584_v34 }
0x17e4   :  { %v2586_v40 = vsub.f32 1.5, %v2585_v35  ;;  %v4601_v35 = vld [vmem:[%s5100_s8 + $0x118] sm:$0xff] }
0x17e5   :  { %2831 = vmatpush.msra.mxu1 %v4601_v35  ;;  %v4634_v35 = vld [vmem:[%s5120_s30 + $0x128] sm:$0xff] }
0x17e6   :  { %v2587_v47 = vmul.f32 %v4915_v32, %v2586_v40  ;;  %v4600_v40 = vld [vmem:[%s5100_s8 + $0x110] sm:$0xff] }
0x17e7   :  { %2832 = vmatpush.msra.mxu1 %v4600_v40 }
0x17e8   :  { %v2591_v51 = vsel %vm2590_vm15, %v4915_v32, %v2587_v47  ;;  %v4598_v47 = vld [vmem:[%s5100_s8 + $0x100] sm:$0xff] }
0x17e9   :  { %v2596_v56 = vperm.slane %v2591_v51, %v5719_v37  ;;  %v2600_v57 = vperm.slane %v2591_v51, %v5721_v38  ;;  %v4583_v38 = vld [vmem:[%s6103_s22 + $0x70] sm:$0xff]  ;;  %2833 = vmatpush.msra.mxu1 %v4599_v42  ;;  %v4823_v42 = vld [vmem:[%s5115_s24 + $0x9] ss:$0 sm:$0xff] }
0x17ea   :  { %2715 = vmatpush.msrb.mxu3 %v4583_v38  ;;  %v4606_v51 = vld [vmem:[%s5110_s19 + $0x110] sm:$0xff] }
0x17eb   :  { %v2603_v59 = vmul.f32 %v2596_v56, %v2579_v54  ;;  %v2604_v60 = vmul.f32 %v2600_v57, %v2580_v55  ;;  %2834 = vmatpush.msra.mxu1 %v4598_v47  ;;  %v4605_v55 = vld [vmem:[%s5110_s19 + $0x108] sm:$0xff] }
0x17ec   :  { %2716 = vmatpush.msrb.mxu3 %v4582_v6 }
0x17ed   :  { %v2610_v61 = vmul.f32 %v4816_v36, %v2603_v59  ;;  %v2611_v62 = vmul.f32 %v2608_v50, %v2604_v60 }
0x17ee   :  { %2717 = vmatpush.msrb.mxu3 %v4581_v8  ;;  %v4611_v8 = vld [vmem:[%s5120_s30 + $0x108] sm:$0xff] }
0x17ef   :  { %v2617_v4 = vadd.f32 %v4817_v49, %v2610_v61  ;;  %v2618_v37 = vadd.f32 %v2615_v7, %v2611_v62  ;;  %v4607_v49 = vld [vmem:[%s5110_s19 + $0x118] sm:$0xff]  ;;  %v4604_v7 = vld [vmem:[%s5110_s19 + $0x100] sm:$0xff] }
0x17f0   :  { %2868 = vmatpush.msra.mxu2 %v4607_v49  ;;  %v4613_v61 = vld [vmem:[%s5120_s30 + $0x118] sm:$0xff] }
0x17f1   :  { %2642 = vst [vmem:[#allocation1] ss:$2 sm:$0xff] %v2617_v4  ;;  %v2638_v17 = vperm.slane %v2617_v4, 3  ;;  %v2639_v45 = vperm.slane %v2618_v37, 3  ;;  %v2662_v21 = vperm.slane %v2617_v4, 0  ;;  %v2663_v1 = vperm.slane %v2618_v37, 0  ;;  %2904 = vmatpush.msra.mxu3 %v4613_v61 }
0x17f2   :  { %2645 = vst [vmem:[#allocation1 + $0x10] ss:$2 sm:$0xff] %v2618_v37  ;;  %2869 = vmatpush.msra.mxu2 %v4606_v51 }
0x17f4   :  { %2870 = vmatpush.msra.mxu2 %v4605_v55  ;;  %v4824_v55 = vld [vmem:[%s5125_s6 + $0x9] ss:$0 sm:$0xff] }
0x17f6   :  { %2871 = vmatpush.msra.mxu2 %v4604_v7 }
0x17f8   :  { %v2643_v9 = vld.sshfl [vmem:[#allocation1] sm:$0xff pattern:$0x75316420] }
0x17f9   :  { %v2646_v12 = vld.sshfl [vmem:[#allocation1 + $0x10] sm:$0xff pattern:$0x75316420]  ;;  %2653 = vst [vmem:[#allocation1] ss:$2 sm:$0xff] %v2617_v4  ;;  %v2647_v15 = vrot.slane %v2643_v9, 7 }
0x17fa   :  { %2656 = vst [vmem:[#allocation1 + $0x10] ss:$2 sm:$0xff] %v2618_v37  ;;  %v2648_v16 = vrot.slane %v2646_v12, 7  ;;  %v4610_v12 = vld [vmem:[%s5120_s30 + $0x100] sm:$0xff] }
0x17fb   :  { %v2651_v48 = vsel %vm179_vm4, %v2638_v17, %v2647_v15  ;;  %v4623_v15 = vld [vmem:[%s5100_s8 + $0x130] sm:$0xff]  ;;  %v4621_v17 = vld [vmem:[%s5100_s8 + $0x120] sm:$0xff] }
0x17fc   :  { %v2652_v19 = vsel %vm179_vm4, %v2639_v45, %v2648_v16  ;;  %v4622_v16 = vld [vmem:[%s5100_s8 + $0x128] sm:$0xff]  ;;  %v4630_v45 = vld [vmem:[%s5110_s19 + $0x138] sm:$0xff] }
0x1800   :  { %v2654_v14 = vld.sshfl [vmem:[#allocation1] sm:$0xff pattern:$0x75316420] }
0x1801   :  { %2668 = vst [vmem:[#allocation1] ss:$2 sm:$0xff] %v2617_v4  ;;  %v2657_v46 = vld.sshfl [vmem:[#allocation1 + $0x10] sm:$0xff pattern:$0x75316420]  ;;  %v2658_v53 = vrot.slane %v2654_v14, 1 }
0x1802   :  { %2670 = vst [vmem:[#allocation1 + $0x1] ss:$2 sm:$0xff] %v2618_v37  ;;  %v2659_v20 = vrot.slane %v2657_v46, 1  ;;  %v4612_v37 = vld [vmem:[%s5120_s30 + $0x110] sm:$0xff]  ;;  %v4627_v46 = vld [vmem:[%s5110_s19 + $0x120] sm:$0xff] }
0x1803   :  { %v2666_v27 = vsel %vm1577_vm9, %v2658_v53, %v2662_v21  ;;  %2905 = vmatpush.msra.mxu3 %v4612_v37  ;;  %v4649_v37 = vld [vmem:[%s5100_s8 + $0x158] sm:$0xff] }
0x1804   :  { %v2667_v22 = vsel %vm1577_vm9, %v2659_v20, %v2663_v1  ;;  %vm3618_vm9 = vcmask 257024  }
0x1805   :  { %2906 = vmatpush.msra.mxu3 %v4611_v8  ;;  %v4647_v8 = vld [vmem:[%s5100_s8 + $0x148] sm:$0xff] }
0x1807   :  { %2907 = vmatpush.msra.mxu3 %v4610_v12  ;;  %v4620_v12 = vld [vmem:[%s5130_s12 + $0x40] sm:$0xff] }
0x1809   :  { %v2671_v18 = vld.sshfl [vmem:[#allocation1] sm:$0xff pattern:$0x75316420] }
0x180a   :  { %2696 = vst [vmem:[#allocation1] ss:$2 sm:$0xff] %v2651_v48  ;;  %4594 = vmatmul.msk.f32.vlgmr.msrb.gmra.mxu2 %vm290_vm1, %v2671_v18  ;;  %v4629_v18 = vld [vmem:[%s5110_s19 + $0x130] sm:$0xff] }
0x180b   :  { %2698 = vst [vmem:[#allocation1 + $0x1] ss:$2 sm:$0xff] %v2652_v19  ;;  %3008 = vmatpush.msrb.mxu2 %v4624_v39  ;;  %v4628_v19 = vld [vmem:[%s5110_s19 + $0x128] sm:$0xff] }
0x180d   :  { %3009 = vmatpush.msrb.mxu2 %v4623_v15 }
0x180f   :  { %3010 = vmatpush.msrb.mxu2 %v4622_v16 }
0x1811   :  { %3011 = vmatpush.msrb.mxu2 %v4621_v17 }
0x1812   :  { %v2699_v43 = vld.sshfl [vmem:[#allocation1] sm:$0xff pattern:$0x75316420] }
0x1813   :  { %2724 = vst [vmem:[#allocation1] ss:$2 sm:$0xff] %v2666_v27  ;;  %4595 = vmatmul.msk.f32.vlgmr.msrb.gmra.mxu3 %vm290_vm1, %v2699_v43 }
0x1814   :  { %2726 = vst [vmem:[#allocation1 + $0x1] ss:$2 sm:$0xff] %v2667_v22  ;;  %3045 = vmatpush.msrb.mxu3 %v4630_v45 }
0x1816   :  { %3046 = vmatpush.msrb.mxu3 %v4629_v18 }
0x1818   :  { %3047 = vmatpush.msrb.mxu3 %v4628_v19 }
0x181a   :  { %3048 = vmatpush.msrb.mxu3 %v4627_v46  ;;  %v4655_v46 = vld [vmem:[%s5110_s19 + $0x158] sm:$0xff] }
0x181b   :  { %v2727_v23 = vld.sshfl [vmem:[#allocation1] sm:$0xff pattern:$0x75316420] }
0x181c   :  { %4596 = vmatmul.msk.f32.vlgmr.msrb.gmra.mxu0 %vm290_vm1, %v2727_v23 }
0x188d   :  { %v2691_v24 = vpop.f32.mrf.mxu2 }
0x1896   :  { %v2719_v44 = vpop.f32.mrf.mxu3 }
0x1897   :  { %v2720_v25 = vadd.f32 %v2719_v44, %v2691_v24 }
0x1899   :  { %v2747_v29 = vpop.f32.mrf.mxu0 }
0x189a   :  { %v2750_v2 = vadd.f32 %v2747_v29, %v2720_v25  ;;  %v4819_v25 = vld [vmem:[%s5105_s14 + $0x8] ss:$0 sm:$0xff] }
0x189b   :  { %v4820_v29 = vld [vmem:[%s5115_s24 + $0x8] ss:$0 sm:$0xff] }
0x189c   :  { %v2754_v30 = vadd.f32 %v4818_v26, %v2750_v2 }
0x189e   :  { %v2755_v31 = vmul.f32 0.999995, %v2754_v30 }
0x18a0   :  { %v2757_v3 = vmin.f32 %v2755_v31, 0.0  ;;  %vm2756_vm3 = vcmp.gt.f32.partialorder %v2755_v31, 0.0 }
0x18a2   :  { %v2758_v32 = vmul.f32 1.442695, %v2757_v3  ;;  %v4636_v3 = vld [vmem:[%s5120_s30 + $0x138] sm:$0xff] }
0x18a4   :  { %4916 = vpow2.f32 %v2758_v32 }
0x18aa   :  { %v4917_v33 = vpop.eup %4916 }
0x18ab   :  { %v4597_v34 = vadd.f32 -1.0, %v4917_v33  ;;  %v4635_v33 = vld [vmem:[%s5120_s30 + $0x130] sm:$0xff] }
0x18ad   :  { %v2761_v36 = vsel %vm2756_vm3, %v2755_v31, %v4597_v34  ;;  %v4821_v34 = vld [vmem:[%s5125_s6 + $0x8] ss:$0 sm:$0xff] }
0x18ae   :  { %v2763_v41 = vrot.slane %v2761_v36, 4  ;;  %2764 = vst [vmem:[#allocation1] ss:$2 sm:$0xff] %v2761_v36  ;;  %v4633_v36 = vld [vmem:[%s5120_s30 + $0x120] sm:$0xff] }
0x18b0   :  { %2767 = vst [vmem:[#allocation1 + $0x10] ss:$2 sm:$0xff] %v2763_v41 }
0x18b5   :  { %v2765_v50 = vld.sshfl [vmem:[#allocation1] sm:$0xff pattern:$0x75316420] }
0x18b6   :  { %v2769_v52 = vrot.slane %v2765_v50, 7  ;;  %v5848_v50 = vld [vmem:[%s6108_s2] sm:$0xf] }
0x18b7   :  { %v2768_v54 = vld.sshfl [vmem:[#allocation1 + $0x10] sm:$0xff pattern:$0x75316420] }
0x18b8   :  { %v2770_v56 = vrot.slane %v2768_v54, 7  ;;  %v2773_v57 = vsel %vm179_vm4, -1e+30, %v2769_v52 }
0x18b9   :  { %v2776_v58 = vsel %vm2775_vm5, %v2773_v57, -1e+30 }
0x18ba   :  { %v2774_v59 = vsel %vm179_vm4, -1e+30, %v2770_v56  ;;  %v2780_v60 = vrot.slane %v2776_v58, 1  ;;  %v2786_v4 = vrot.slane %v2776_v58, 2 }
0x18bb   :  { %v2777_v11 = vsel %vm2775_vm5, %v2774_v59, -1e+30 }
0x18bc   :  { %v2781_v62 = vrot.slane %v2777_v11, 1  ;;  %v2784_v63 = vmax.f32 %v2776_v58, %v2780_v60  ;;  %v2787_v38 = vrot.slane %v2777_v11, 2 }
0x18be   :  { %v2785_v5 = vmax.f32 %v2777_v11, %v2781_v62  ;;  %v2790_v6 = vmax.f32 %v2784_v63, %v2786_v4  ;;  %v4822_v63 = vld [vmem:[%s5105_s14 + $0x9] ss:$0 sm:$0xff] }
0x18c0   :  { %v2791_v9 = vmax.f32 %v2785_v5, %v2787_v38  ;;  %v2794_v10 = vrot.slane %v2790_v6, 1  ;;  %v4648_v38 = vld [vmem:[%s5100_s8 + $0x150] sm:$0xff] }
0x18c2   :  { %v2795_v0 = vrot.slane %v2791_v9, 1  ;;  %v5782_v13 = vsel %vm179_vm4, %v2790_v6, %v2794_v10 }
0x18c3   :  { %2813 = vst [vmem:[#allocation1] ss:$4 sm:$0xff] %v5782_v13 }
0x18c4   :  { %v5787_v14 = vsel %vm179_vm4, %v2791_v9, %v2795_v0  ;;  %vm2954_vm4 = vcmask 1043456   ;;  %v4646_v9 = vld [vmem:[%s5100_s8 + $0x140] sm:$0xff] }
0x18c5   :  { %2815 = vst [vmem:[#allocation1 + $0x1] ss:$4 sm:$0xff] %v5787_v14 }
0x18cc   :  { %v2816_v48 = vld.sshfl [vmem:[#allocation1] sm:$0xff pattern:$0x73625140] }
0x18cd   :  { %2850 = vst [vmem:[#allocation1] ss:$4 sm:$0xff] %v5782_v13  ;;  %4603 = vmatmul.msk.f32.vlgmr.msra.gmra.mxu1 %vm290_vm1, %v2816_v48 }
0x18ce   :  { %2852 = vst [vmem:[#allocation1 + $0x1] ss:$4 sm:$0xff] %v5787_v14 }
0x18d5   :  { %v2853_v53 = vld.sshfl [vmem:[#allocation1] sm:$0xff pattern:$0x73625140] }
0x18d6   :  { %2886 = vst [vmem:[#allocation1] ss:$4 sm:$0xff] %v5782_v13  ;;  %4609 = vmatmul.msk.f32.vlgmr.msra.gmra.mxu2 %vm290_vm1, %v2853_v53  ;;  %v4654_v53 = vld [vmem:[%s5110_s19 + $0x150] sm:$0xff] }
0x18d7   :  { %2888 = vst [vmem:[#allocation1 + $0x1] ss:$4 sm:$0xff] %v5787_v14 }
0x18de   :  { %v2889_v20 = vld.sshfl [vmem:[#allocation1] sm:$0xff pattern:$0x73625140] }
0x18df   :  { %2990 = vst [vmem:[#allocation1] ss:$4 sm:$0xff] %v5782_v13  ;;  %4615 = vmatmul.msk.f32.vlgmr.msra.gmra.mxu3 %vm290_vm1, %v2889_v20  ;;  %v4653_v20 = vld [vmem:[%s5110_s19 + $0x148] sm:$0xff] }
0x18e0   :  { %2992 = vst [vmem:[#allocation1 + $0x1] ss:$4 sm:$0xff] %v5787_v14 }
0x18e7   :  { %v2993_v21 = vld.sshfl [vmem:[#allocation1] sm:$0xff pattern:$0x73625140] }
0x18e8   :  { %3027 = vst [vmem:[#allocation1] ss:$4 sm:$0xff] %v5782_v13  ;;  %4626 = vmatmul.msk.f32.vlgmr.msrb.gmra.mxu2 %vm290_vm1, %v2993_v21  ;;  %v4652_v21 = vld [vmem:[%s5110_s19 + $0x140] sm:$0xff] }
0x18e9   :  { %3029 = vst [vmem:[#allocation1 + $0x1] ss:$4 sm:$0xff] %v5787_v14 }
0x18f0   :  { %v3030_v1 = vld.sshfl [vmem:[#allocation1] sm:$0xff pattern:$0x73625140] }
0x18f1   :  { %3063 = vst [vmem:[#allocation1] ss:$4 sm:$0xff] %v5782_v13  ;;  %4632 = vmatmul.msk.f32.vlgmr.msrb.gmra.mxu3 %vm290_vm1, %v3030_v1 }
0x18f2   :  { %3065 = vst [vmem:[#allocation1 + $0x1] ss:$4 sm:$0xff] %v5787_v14 }
0x18f9   :  { %v3066_v27 = vld.sshfl [vmem:[#allocation1] sm:$0xff pattern:$0x73625140] }
0x18fa   :  { %3210 = vst [vmem:[#allocation1] ss:$4 sm:$0xff] %v5782_v13 }
0x18fb   :  { %3212 = vst [vmem:[#allocation1 + $0x1] ss:$4 sm:$0xff] %v5787_v14 }
0x1902   :  { %v5814_v43 = vld.sshfl [vmem:[#allocation1] sm:$0xff pattern:$0x73625140] }
0x1903   :  { %3247 = vst [vmem:[#allocation1] ss:$4 sm:$0xff] %v5782_v13 }
0x1904   :  { %3249 = vst [vmem:[#allocation1 + $0x1] ss:$4 sm:$0xff] %v5787_v14 }
0x190b   :  { %v5818_v22 = vld.sshfl [vmem:[#allocation1] sm:$0xff pattern:$0x73625140] }
0x190c   :  { %3283 = vst [vmem:[#allocation1] ss:$4 sm:$0xff] %v5782_v13 }
0x190d   :  { %3285 = vst [vmem:[#allocation1 + $0x1] ss:$4 sm:$0xff] %v5787_v14 }
0x1914   :  { %v5822_v23 = vld.sshfl [vmem:[#allocation1] sm:$0xff pattern:$0x73625140] }
0x1915   :  { %3408 = vst [vmem:[#allocation1] ss:$4 sm:$0xff] %v5782_v13 }
0x1916   :  { %3410 = vst [vmem:[#allocation1 + $0x1] ss:$4 sm:$0xff] %v5787_v14 }
0x191d   :  { %v5826_v24 = vld.sshfl [vmem:[#allocation1] sm:$0xff pattern:$0x73625140] }
0x191e   :  { %3445 = vst [vmem:[#allocation1] ss:$4 sm:$0xff] %v5782_v13 }
0x191f   :  { %3447 = vst [vmem:[#allocation1 + $0x1] ss:$4 sm:$0xff] %v5787_v14 }
0x1926   :  { %v5830_v44 = vld.sshfl [vmem:[#allocation1] sm:$0xff pattern:$0x73625140] }
0x1927   :  { %3481 = vst [vmem:[#allocation1] ss:$4 sm:$0xff] %v5782_v13 }
0x1928   :  { %3483 = vst [vmem:[#allocation1 + $0x1] ss:$4 sm:$0xff] %v5787_v14 }
0x194a   :  { %v2836_v26 = vpop.f32.mrf.mxu1 }
0x194b   :  { %v2837_v2 = vadd.f32 %v4819_v25, %v2836_v26  ;;  %v4643_v25 = vld [vmem:[%s5130_s12 + $0x48] sm:$0xff]  ;;  %v4661_v26 = vld [vmem:[%s5120_s30 + $0x158] sm:$0xff] }
0x194c   :  { %3172 = vmatpush.msra.mxu3 %v4643_v25 }
0x194d   :  { %v2839_v32 = vmul.f32 0.35355338, %v2837_v2  ;;  %v4659_v2 = vld [vmem:[%s5120_s30 + $0x148] sm:$0xff] }
0x194e   :  { %3301 = vmatpush.msrb.mxu3 %v4661_v26 }
0x1959   :  { %v2873_v30 = vpop.f32.mrf.mxu2 }
0x195a   :  { %v2874_v31 = vadd.f32 %v4820_v29, %v2873_v30  ;;  %v4660_v29 = vld [vmem:[%s5120_s30 + $0x150] sm:$0xff]  ;;  %v4658_v30 = vld [vmem:[%s5120_s30 + $0x140] sm:$0xff] }
0x195b   :  { %3302 = vmatpush.msrb.mxu3 %v4660_v29 }
0x195c   :  { %4616 = vmatpush.xpose.msk.msra.mxu0 %vm384_vm2, %v2874_v31  ;;  %v4673_v31 = vld [vmem:[%s5100_s8 + $0x178] sm:$0xff] }
0x195d   :  { %3303 = vmatpush.msrb.mxu3 %v4659_v2 }
0x195f   :  { %4617 = vmatmul.msk.f32.vlgmr.msra.gmra.mxu0 %vm384_vm2, %v2839_v32  ;;  %3304 = vmatpush.msrb.mxu3 %v4658_v30  ;;  %v4671_v32 = vld [vmem:[%s5100_s8 + $0x168] sm:$0xff] }
0x1960   :  { %3081 = vmatpush.msrb.mxu0 %v4636_v3 }
0x1962   :  { %3082 = vmatpush.msrb.mxu0 %v4635_v33  ;;  %v2909_v40 = vpop.f32.mrf.mxu3  ;;  %v4825_v33 = vld [vmem:[%s5105_s14 + $0xa] ss:$0 sm:$0xff] }
0x1963   :  { %v2910_v41 = vadd.f32 %v4821_v34, %v2909_v40 }
0x1964   :  { %3083 = vmatpush.msrb.mxu0 %v4634_v35  ;;  %v4826_v35 = vld [vmem:[%s5115_s24 + $0xa] ss:$0 sm:$0xff] }
0x1965   :  { %4618 = vmatpush.msk.msrb.mxu1 %vm2954_vm4, %v2910_v41 }
0x1966   :  { %3084 = vmatpush.msrb.mxu0 %v4633_v36  ;;  %v4670_v36 = vld [vmem:[%s5100_s8 + $0x160] sm:$0xff] }
0x1967   :  { %4638 = vmatmul.msk.f32.vlgmr.msrb.gmra.mxu0 %vm290_vm1, %v3066_v27 }
0x1968   :  { %3195 = vmatpush.msra.mxu0 %v4620_v12 }
0x196b   :  { %v3013_v5 = vpop.f32.mrf.mxu2 }
0x196c   :  { %v3014_v6 = vadd.f32 %v4822_v63, %v3013_v5 }
0x196e   :  { %v3016_v10 = vmul.f32 0.35355338, %v3014_v6  ;;  %v4685_v6 = vld [vmem:[%s5120_s30 + $0x178] sm:$0xff] }
0x1974   :  { %v3050_v47 = vpop.f32.mrf.mxu3 }
0x1975   :  { %v3051_v49 = vadd.f32 %v4823_v42, %v3050_v47  ;;  %v4679_v47 = vld [vmem:[%s5110_s19 + $0x178] sm:$0xff] }
0x1977   :  { %4639 = vmatpush.xpose.msk.msra.mxu1 %vm384_vm2, %v3051_v49 }
0x19dc   :  { %v2935_v51 = vpop.f32.mrf.mxu0 }
0x19dd   :  { %v2936_v52 = vadd.f32 %v2935_v51, %v5848_v50  ;;  %v4678_v51 = vld [vmem:[%s5110_s19 + $0x170] sm:$0xff] }
0x19df   :  { %v2939_v54 = vsel %vm2938_vm7, %v2936_v52, -inf }
0x19e0   :  { %2940 = vmax.xlane.f32.xlu0 %v2939_v54  ;;  %v4676_v54 = vld [vmem:[%s5110_s19 + $0x160] sm:$0xff] }
0x19e4   :  { %v3086_v56 = vpop.f32.mrf.mxu0 }
0x19e5   :  { %v3087_v57 = vadd.f32 %v4824_v55, %v3086_v56 }
0x19e7   :  { %4641 = vmatpush.msk.msra.mxu2 %vm2954_vm4, %v3087_v57 }
0x19e9   :  { %3265 = vmatpush.msrb.mxu2 %v4655_v46 }
0x19eb   :  { %3266 = vmatpush.msrb.mxu2 %v4654_v53 }
0x19ed   :  { %3267 = vmatpush.msrb.mxu2 %v4653_v20 }
0x19ef   :  { %3268 = vmatpush.msrb.mxu2 %v4652_v21 }
0x1a53   :  { %v2941_v58 = vpop.xlane.xlu0 %2940 }
0x1a54   :  { %v2942_v7 = vsub.f32 %v2936_v52, %v2941_v58  ;;  %v4677_v52 = vld [vmem:[%s5110_s19 + $0x168] sm:$0xff]  ;;  %s5048_s19 = smov 127  }
0x1a55   :  { %v4827_v58 = vld [vmem:[%s5125_s6 + $0xa] ss:$0 sm:$0xff] }
0x1a56   :  { %v2943_v59 = vmul.f32 1.442695, %v2942_v7 }
0x1a58   :  { %4918 = vpow2.f32 %v2943_v59 }
0x1a5e   :  { %v4919_v60 = vpop.eup %4918 }
0x1a5f   :  { %v2945_v11 = vsel %vm2938_vm7, %v4919_v60, 0.0 }
0x1a60   :  { %2946 = vadd.xlane.f32.xlu1 %v2945_v11 }
0x1ad3   :  { %v2947_v61 = vpop.xlane.xlu1 %2946 }
0x1ad4   :  { %4920 = vrcp.f32 %v2947_v61 }
0x1ada   :  { %v4921_v62 = vpop.eup %4920 }
0x1adb   :  { %v2949_v4 = vmul.f32 %v4921_v62, %v4919_v60 }
0x1add   :  { %4619 = vmatmul.msk.f32.vlgmr.msrb.gmra.mxu1 %vm2950_vm8, %v2949_v4 }
0x1ade   :  { %3228 = vmatpush.msrb.mxu1 %v4649_v37 }
0x1ae0   :  { %3229 = vmatpush.msrb.mxu1 %v4648_v38 }
0x1ae2   :  { %3230 = vmatpush.msrb.mxu1 %v4647_v8  ;;  %v4684_v8 = vld [vmem:[%s5120_s30 + $0x170] sm:$0xff] }
0x1ae4   :  { %3231 = vmatpush.msrb.mxu1 %v4646_v9  ;;  %v4683_v9 = vld [vmem:[%s5120_s30 + $0x168] sm:$0xff] }
0x1ae5   :  { %4640 = vmatmul.msk.f32.vlgmr.msra.gmra.mxu1 %vm384_vm2, %v3016_v10  ;;  %v4682_v10 = vld [vmem:[%s5120_s30 + $0x160] sm:$0xff]  ;;  %s6114_s30 = sld [smem:[#allocation27_spill]] }
0x1aed   :  { %4651 = vmatmul.msk.f32.vlgmr.msrb.gmra.mxu1 %vm290_vm1, %v5814_v43 }
0x1b5a   :  { %v2975_v0 = vpop.f32.mrf.mxu1 }
0x1b5b   :  { %4645 = vmatmul.msk.f32.vlgmr.msra.gmra.mxu0 %vm384_vm2, %v2975_v0 }
0x1b62   :  { %v3112_v39 = vpop.f32.mrf.mxu1 }
0x1b63   :  { %v3113_v15 = vadd.f32 %v3112_v39, %v5848_v50 }
0x1b65   :  { %v3115_v16 = vsel %vm2938_vm7, %v3113_v15, -inf }
0x1b66   :  { %3116 = vmax.xlane.f32.xlu2 %v3115_v16  ;;  %v4829_v16 = vld [vmem:[%s5105_s14 + $0xb] ss:$0 sm:$0xff]  ;;  %s6110_s14 = sld [smem:[#allocation8_spill]] }
0x1b6a   :  { %v3233_v34 = vpop.f32.mrf.mxu1 }
0x1b6b   :  { %v3234_v40 = vadd.f32 %v4825_v33, %v3233_v34  ;;  %v4831_v33 = vld [vmem:[%s5135_s20 + $0x2] ss:$0 sm:$0xff]  ;;  %s6119_s20 = sld [smem:[#allocation20_spill]] }
0x1b6d   :  { %v3236_v49 = vmul.f32 0.35355338, %v3234_v40 }
0x1bd8   :  { %v3197_v55 = vpop.f32.mrf.mxu0 }
0x1bd9   :  { %v3117_v17 = vpop.xlane.xlu2 %3116 }
0x1bda   :  { %v3118_v45 = vsub.f32 %v3113_v15, %v3117_v17  ;;  %v3484_v15 = vld.sshfl [vmem:[#allocation1] sm:$0xff pattern:$0x73625140] }
0x1bdc   :  { %v3119_v48 = vmul.f32 1.442695, %v3118_v45 }
0x1bde   :  { %4922 = vpow2.f32 %v3119_v48 }
0x1be4   :  { %v4923_v18 = vpop.eup %4922 }
0x1be5   :  { %v3121_v19 = vsel %vm2938_vm7, %v4923_v18, 0.0 }
0x1be6   :  { %3122 = vadd.xlane.f32.xlu0 %v3121_v19 }
0x1c59   :  { %v3123_v1 = vpop.xlane.xlu0 %3122 }
0x1c5a   :  { %4924 = vrcp.f32 %v3123_v1 }
0x1c60   :  { %v4925_v27 = vpop.eup %4924 }
0x1c61   :  { %v3125_v43 = vmul.f32 %v4925_v27, %v4923_v18  ;;  %v4830_v18 = vld [vmem:[%s5125_s6 + $0xb] ss:$0 sm:$0xff]  ;;  %s6116_s6 = sld [smem:[#allocation23_spill]] }
0x1c63   :  { %4642 = vmatmul.msk.f32.vlgmr.msra.gmra.mxu2 %vm2950_vm8, %v3125_v43 }
0x1c6b   :  { %4657 = vmatmul.msk.f32.vlgmr.msrb.gmra.mxu2 %vm290_vm1, %v5818_v22  ;;  %v4672_v22 = vld [vmem:[%s5100_s8 + $0x170] sm:$0xff]  ;;  %s6109_s8 = sld [smem:[#allocation26_spill]] }
0x1ce6   :  { %v3149_v3 = vpop.f32.mrf.mxu2 }
0x1ce7   :  { %4644 = vmatmul.msk.f32.vlgmr.msra.gmra.mxu3 %vm384_vm2, %v3149_v3 }
0x1ce8   :  { %3426 = vmatpush.msra.mxu3 %v4673_v31 }
0x1cea   :  { %3427 = vmatpush.msra.mxu3 %v4672_v22 }
0x1cec   :  { %3428 = vmatpush.msra.mxu3 %v4671_v32  ;;  %v4692_v32 = vld [vmem:[%s5130_s12 + $0x58] sm:$0xff] }
0x1cee   :  { %v3270_v41 = vpop.f32.mrf.mxu2  ;;  %3429 = vmatpush.msra.mxu3 %v4670_v36 }
0x1cef   :  { %v3271_v42 = vadd.f32 %v4826_v35, %v3270_v41  ;;  %4663 = vmatmul.msk.f32.vlgmr.msrb.gmra.mxu3 %vm290_vm1, %v5822_v23  ;;  %v4668_v23 = vld [vmem:[%s5130_s12 + $0x50] sm:$0xff]  ;;  %s6118_s12 = sld [smem:[#allocation29_spill]] }
0x1cf0   :  { %3392 = vmatpush.msra.mxu2 %v4668_v23 }
0x1cf1   :  { %4664 = vmatpush.xpose.msk.msrb.mxu0 %vm384_vm2, %v3271_v42 }
0x1cf4   :  { %4665 = vmatmul.msk.f32.vlgmr.msrb.gmra.mxu0 %vm384_vm2, %v3236_v49 }
0x1cf5   :  { %3463 = vmatpush.msra.mxu0 %v4679_v47 }
0x1cf7   :  { %3464 = vmatpush.msra.mxu0 %v4678_v51  ;;  %4675 = vmatmul.msk.f32.vlgmr.msra.gmra.mxu3 %vm290_vm1, %v5826_v24 }
0x1cf9   :  { %3465 = vmatpush.msra.mxu0 %v4677_v52 }
0x1cfb   :  { %3466 = vmatpush.msra.mxu0 %v4676_v54 }
0x1cfc   :  { %4681 = vmatmul.msk.f32.vlgmr.msra.gmra.mxu0 %vm290_vm1, %v5830_v44  ;;  %v4828_v44 = vld [vmem:[%s5115_s24 + $0xb] ss:$0 sm:$0xff]  ;;  %s6112_s24 = sld [smem:[#allocation28_spill]] }
0x1cfd   :  { %3590 = vmatpush.msrb.mxu0 %v4692_v32  ;;  %v4834_v32 = vld [vmem:[%s6101_s29 + $0x2] ss:$0 sm:$0xff] }
0x1d6a   :  { %v3174_v56 = vpop.f32.mrf.mxu3 }
0x1d6b   :  { %v3198_v57 = vadd.f32 %v3197_v55, %v3174_v56 }
0x1d71   :  { %v3332_v7 = vpop.f32.mrf.mxu0 }
0x1d72   :  { %v3333_v59 = vadd.f32 %v3332_v7, %v5848_v50  ;;  %v3306_v60 = vpop.f32.mrf.mxu3  ;;  %v4699_v7 = vld [vmem:[%s5140_s27 + $0x50] sm:$0xff] }
0x1d73   :  { %v3307_v11 = vadd.f32 %v4827_v58, %v3306_v60  ;;  %v4700_v58 = vld [vmem:[%s5140_s27 + $0x58] sm:$0xff]  ;;  %v4698_v60 = vld [vmem:[%s5140_s27 + $0x48] sm:$0xff] }
0x1d74   :  { %v3335_v24 = vsel %vm2938_vm7, %v3333_v59, -inf }
0x1d75   :  { %3336 = vmax.xlane.f32.xlu1 %v3335_v24  ;;  %4666 = vmatpush.msk.msra.mxu1 %vm2954_vm4, %v3307_v11  ;;  %v4697_v24 = vld [vmem:[%s5140_s27 + $0x40] sm:$0xff]  ;;  %s6120_s27 = sld [smem:[#allocation21_spill]] }
0x1d77   :  { %3499 = vmatpush.msrb.mxu1 %v4685_v6 }
0x1d79   :  { %v3468_v61 = vpop.f32.mrf.mxu0  ;;  %3500 = vmatpush.msrb.mxu1 %v4684_v8 }
0x1d7a   :  { %v3469_v62 = vadd.f32 %v4828_v44, %v3468_v61  ;;  %v3431_v17 = vpop.f32.mrf.mxu3  ;;  %v4024_v44 = vld [vmem:[%s6109_s8 + $0x8] sm:$0xff]  ;;  %v4023_v61 = vld [vmem:[%s6109_s8] sm:$0xff] }
0x1d7b   :  { %3501 = vmatpush.msrb.mxu1 %v4683_v9  ;;  %v3432_v48 = vadd.f32 %v4829_v16, %v3431_v17  ;;  %v4833_v17 = vld [vmem:[%s6099_s0 + $0x2] ss:$0 sm:$0xff] }
0x1d7c   :  { %4688 = vmatpush.xpose.msk.msrb.mxu2 %vm384_vm2, %v3469_v62 }
0x1d7d   :  { %3502 = vmatpush.msrb.mxu1 %v4682_v10  ;;  %v3434_v19 = vmul.f32 0.35355338, %v3432_v48 }
0x1de8   :  { %v3337_v63 = vpop.xlane.xlu1 %3336 }
0x1de9   :  { %v3338_v4 = vsub.f32 %v3333_v59, %v3337_v63  ;;  %v5046_v63 = vmov 269488144  }
0x1deb   :  { %v3339_v37 = vmul.f32 1.442695, %v3338_v4  ;;  %v3640_v4 = vunpack.c.l.s4 %v5046_v63 }
0x1ded   :  { %4926 = vpow2.f32 %v3339_v37  ;;  %v5047_v37 = vmov 842150450   ;;  %v5938_v8 = vunpack.c.0.s8 %v3640_v4 }
0x1df3   :  { %v4927_v5 = vpop.eup %4926 }
0x1df4   :  { %v3341_v38 = vsel %vm2938_vm7, %v4927_v5, 0.0 }
0x1df5   :  { %3342 = vadd.xlane.f32.xlu2 %v3341_v38 }
0x1e68   :  { %v3343_v12 = vpop.xlane.xlu2 %3342 }
0x1e69   :  { %4928 = vrcp.f32 %v3343_v12  ;;  %v4832_v12 = vld [vmem:[%s5160_s25 + $0x2] ss:$0 sm:$0xff]  ;;  %s6111_s25 = sld [smem:[#allocation9_spill]] }
0x1e6f   :  { %v4929_v0 = vpop.eup %4928 }
0x1e70   :  { %v3345_v39 = vmul.f32 %v4929_v0, %v4927_v5  ;;  %v3644_v5 = vunpack.c.l.s4 %v5047_v37 }
0x1e72   :  { %4667 = vmatmul.msk.f32.vlgmr.msra.gmra.mxu1 %vm2950_vm8, %v3345_v39  ;;  %v5940_v9 = vunpack.c.0.s8 %v3644_v5  ;;  %v4836_v5 = vld [vmem:[%s6114_s30] ss:$0 sm:$0xff] }
0x1e73   :  { %3719 = vmatpush.msra.mxu1 %v4700_v58 }
0x1e75   :  { %3720 = vmatpush.msra.mxu1 %v4699_v7 }
0x1e77   :  { %3721 = vmatpush.msra.mxu1 %v4698_v60 }
0x1e79   :  { %3722 = vmatpush.msra.mxu1 %v4697_v24  ;;  %v4835_v24 = vld [vmem:[%s6102_s3 + $0x2] ss:$0 sm:$0xff] }
0x1e7a   :  { %4687 = vmatmul.msk.f32.vlgmr.msrb.gmra.mxu1 %vm290_vm1, %v3484_v15 }
0x1e7b   :  { %4039 = vmatpush.msrb.mxu1 %v4024_v44  ;;  %v4950_v44 = vld [vmem:[%s5060_s5] sm:$0xff] }
0x1e7d   :  { %4040 = vmatpush.msrb.mxu1 %v4023_v61 }
0x1eef   :  { %v3369_v45 = vpop.f32.mrf.mxu1 }
0x1ef0   :  { %4669 = vmatmul.msk.f32.vlgmr.msra.gmra.mxu2 %vm384_vm2, %v3369_v45  ;;  %v3678_v45 = vrot.slane %v4832_v12, 2 }
0x1ef7   :  { %v3504_v46 = vpop.f32.mrf.mxu1 }
0x1ef8   :  { %v3505_v53 = vadd.f32 %v4830_v18, %v3504_v46  ;;  %4689 = vmatmul.msk.f32.vlgmr.msrb.gmra.mxu2 %vm384_vm2, %v3434_v19 }
0x1efa   :  { %4690 = vmatpush.msk.msrb.mxu3 %vm2954_vm4, %v3505_v53 }
0x1f73   :  { %v3394_v20 = vpop.f32.mrf.mxu2 }
0x1f74   :  { %v3397_v21 = vadd.f32 %v3394_v20, %v3198_v57  ;;  %v3685_v20 = vrot.slane %v4833_v17, 2 }
0x1f7b   :  { %v3530_v1 = vpop.f32.mrf.mxu2 }
0x1f7c   :  { %v3531_v27 = vadd.f32 %v3530_v1, %v5848_v50 }
0x1f7e   :  { %v3533_v43 = vsel %vm2938_vm7, %v3531_v27, -inf }
0x1f7f   :  { %3534 = vmax.xlane.f32.xlu0 %v3533_v43 }
0x1ff2   :  { %v3535_v25 = vpop.xlane.xlu0 %3534 }
0x1ff3   :  { %v3536_v26 = vsub.f32 %v3531_v27, %v3535_v25 }
0x1ff5   :  { %v3537_v29 = vmul.f32 1.442695, %v3536_v26 }
0x1ff7   :  { %4930 = vpow2.f32 %v3537_v29 }
0x1ffd   :  { %v4931_v2 = vpop.eup %4930 }
0x1ffe   :  { %v3539_v30 = vsel %vm2938_vm7, %v4931_v2, 0.0 }
0x1fff   :  { %3540 = vadd.xlane.f32.xlu1 %v3539_v30  ;;  %v4706_v30 = vld [vmem:[%s6100_s17 + $0x58] sm:$0xff] }
0x2000   :  { %3761 = vmatpush.msra.mxu2 %v4706_v30 }
0x2072   :  { %v3541_v31 = vpop.xlane.xlu1 %3540 }
0x2073   :  { %4932 = vrcp.f32 %v3541_v31  ;;  %v4705_v31 = vld [vmem:[%s6100_s17 + $0x50] sm:$0xff] }
0x2074   :  { %3762 = vmatpush.msra.mxu2 %v4705_v31  ;;  %v4839_v31 = vld [vmem:[%s6116_s6] ss:$0 sm:$0xff] }
0x2079   :  { %v4933_v3 = vpop.eup %4932 }
0x207a   :  { %v3543_v22 = vmul.f32 %v4933_v3, %v4931_v2  ;;  %v5950_v2 = vld [vmem:[%s6110_s14] sm:$0x3f]  ;;  %v4704_v3 = vld [vmem:[%s6100_s17 + $0x48] sm:$0xff] }
0x207b   :  { %3763 = vmatpush.msra.mxu2 %v4704_v3 }
0x207c   :  { %4691 = vmatmul.msk.f32.vlgmr.msrb.gmra.mxu3 %vm2950_vm8, %v3543_v22  ;;  %v4703_v22 = vld [vmem:[%s6100_s17 + $0x40] sm:$0xff] }
0x207d   :  { %3764 = vmatpush.msra.mxu2 %v4703_v22 }
0x20ff   :  { %v3567_v50 = vpop.f32.mrf.mxu3 }
0x2100   :  { %4693 = vmatmul.msk.f32.vlgmr.msrb.gmra.mxu0 %vm384_vm2, %v3567_v50 }
0x217d   :  { %v3592_v34 = vpop.f32.mrf.mxu0 }
0x217e   :  { %v3595_v35 = vadd.f32 %v3592_v34, %v3397_v21  ;;  %v4132_v34 = vld [vmem:[%s5240_s13 + $0x8] sm:$0xff] }
0x217f   :  { %4138 = vrot.lane.b32.xlu1 %v4132_v34, %s5048_s19 }
0x2180   :  { %v3601_v36 = vadd.f32 %v4831_v33, %v3595_v35  ;;  %v4131_v35 = vld [vmem:[%s5240_s13] sm:$0xff]  ;;  %s6113_s13 = sld [smem:[#allocation22_spill]] }
0x2182   :  { %v3603_v40 = vrot.slane %v3601_v36, 2  ;;  %v3605_v41 = vadd.f32 %v3601_v36, %v5782_v13 }
0x2184   :  { %v3606_v42 = vadd.f32 %v3603_v40, %v5787_v14  ;;  %3613 = vst [vmem:[#allocation1] ss:$4 sm:$0xff] %v3605_v41  ;;  %v3623_v47 = vmul.f32 %v3605_v41, %v3605_v41 }
0x2186   :  { %3615 = vst [vmem:[#allocation1 + $0x1] ss:$4 sm:$0xff] %v3606_v42  ;;  %v3624_v49 = vmul.f32 %v3606_v42, %v3606_v42  ;;  %v3936_v7 = vld [vmem:[%s6113_s13 + $0x8] sm:$0xff] }
0x2187   :  { %3958 = vmatpush.msra.mxu3 %v3936_v7  ;;  %v4838_v7 = vld [vmem:[%s6105_s26 + $0x2] ss:$0 sm:$0xff] }
0x218d   :  { %v3616_v51 = vld.sshfl [vmem:[#allocation1] sm:$0xff pattern:$0x73625140] }
0x218e   :  { %v3619_v52 = vsel %vm3618_vm9, %v3616_v51, 0.0  ;;  %3627 = vst [vmem:[#allocation1] ss:$4 sm:$0xff] %v3623_v47 }
0x218f   :  { %3620 = vadd.xlane.f32.xlu2 %v3619_v52  ;;  %3629 = vst [vmem:[#allocation1 + $0x1] ss:$4 sm:$0xff] %v3624_v49 }
0x2196   :  { %v3630_v54 = vld.sshfl [vmem:[#allocation1] sm:$0xff pattern:$0x73625140] }
0x2197   :  { %v3632_v13 = vsel %vm3618_vm9, %v3630_v54, 0.0 }
0x2198   :  { %3633 = vadd.xlane.f32.xlu0 %v3632_v13 }
0x21a7   :  { %4136 = vrot.lane.b32.xlu2 %v4131_v35, %s5048_s19 }
0x2202   :  { %v3621_v14 = vpop.xlane.xlu2 %3620 }
0x2203   :  { %v3622_v23 = vmul.f32 %v3621_v14, %v5481_v28  ;;  %v4022_v14 = vld [vmem:[%s6111_s25] sm:$0x3f] }
0x2205   :  { %v3636_v57 = vmul.f32 %v3622_v23, %v3622_v23  ;;  %v3642_v39 = vperm.slane %v3622_v23, %v5938_v8  ;;  %v3646_v15 = vperm.slane %v3622_v23, %v5940_v9  ;;  %v4079_v23 = vld [vmem:[%s6112_s24 + $0x10] sm:$0xff] }
0x2207   :  { %v3649_v18 = vsub.f32 %v3605_v41, %v3642_v39  ;;  %v3650_v19 = vsub.f32 %v3606_v42, %v3646_v15 }
0x220a   :  { %v4137_v58 = vpop.permute.xlu2 %4136 }
0x220b   :  { %v3634_v55 = vpop.xlane.xlu0 %3633 }
0x220c   :  { %v3635_v56 = vmul.f32 %v3634_v55, %v5481_v28  ;;  %v4078_v55 = vld [vmem:[%s6112_s24 + $0x8] sm:$0xff] }
0x220e   :  { %v3637_v59 = vsub.f32 %v3635_v56, %v3636_v57  ;;  %v4077_v56 = vld [vmem:[%s6112_s24] sm:$0xff]  ;;  %v4139_v57 = vpop.permute.xlu1 %4138 }
0x220f   :  { %v4143_v60 = vsub.f32 %v4132_v34, %v4139_v57 }
0x2210   :  { %v3651_v11 = vadd.f32 1e-05, %v3637_v59  ;;  %v3935_v59 = vld [vmem:[%s6113_s13] sm:$0xff] }
0x2211   :  { %3959 = vmatpush.msra.mxu3 %v3935_v59 }
0x2212   :  { %4934 = vrsqrt.f32 %v3651_v11  ;;  %vm3658_vm10 = vweird.f32 %v3651_v11  ;;  %4711 = vmatmul.msk.f32.vlgmr.msra.gmra.mxu3 %vm189_vm0, %v4950_v44 }
0x2218   :  { %v4935_v62 = vpop.eup %4934 }
0x2219   :  { %v3653_v38 = vmul.f32 %v4935_v62, %v3651_v11  ;;  %vm3659_vm2 = vweird.f32 %v4935_v62  ;;  %v4142_v11 = vsub.f32 %v4131_v35, %v4137_v58 }
0x221a   :  { %vm3660_vm11 = vmor %vm3658_vm10, %vm3659_vm2 }
0x221b   :  { %v3654_v6 = vmul.f32 %v4935_v62, %v3653_v38  ;;  %v4951_v38 = vld [vmem:[%s5060_s5 + $0x8] sm:$0xff]  ;;  %s6115_s5 = sld [smem:[#allocation24_spill]] }
0x221c   :  { %4712 = vmatmul.msk.f32.gmra.mxu3 %vm189_vm0, %v4951_v38 }
0x221d   :  { %v3655_v10 = vmul.f32 0.5, %v3654_v6 }
0x221f   :  { %v3656_v0 = vsub.f32 1.5, %v3655_v10 }
0x2221   :  { %v3657_v16 = vmul.f32 %v4935_v62, %v3656_v0  ;;  %v3976_v3 = vld [vmem:[%s6115_s5 + $0x18] sm:$0xff] }
0x2223   :  { %v3661_v48 = vsel %vm3660_vm11, %v4935_v62, %v3657_v16 }
0x2224   :  { %v3666_v46 = vperm.slane %v3661_v48, %v5938_v8  ;;  %v3670_v53 = vperm.slane %v3661_v48, %v5940_v9  ;;  %4713 = vmatmul.msk.f32.gmra.mxu3 %vm189_vm0, %v5950_v2  ;;  %v4133_v48 = vld [vmem:[%s5245_s21] sm:$0x1]  ;;  %s6117_s21 = sld [smem:[#allocation25_spill]] }
0x2226   :  { %v3673_v21 = vmul.f32 %v3666_v46, %v3649_v18  ;;  %v3674_v1 = vmul.f32 %v3670_v53, %v3650_v19 }
0x2228   :  { %v3680_v27 = vmul.f32 %v4832_v12, %v3673_v21  ;;  %v3681_v43 = vmul.f32 %v3678_v45, %v3674_v1  ;;  %v3980_v1 = vld [vmem:[%s6115_s5 + $0x38] sm:$0xff] }
0x2229   :  { %4003 = vmatpush.msra.mxu0 %v3980_v1 }
0x222a   :  { %v3687_v25 = vadd.f32 %v4833_v17, %v3680_v27  ;;  %v3688_v26 = vadd.f32 %v3685_v20, %v3681_v43 }
0x222c   :  { %3701 = vst [vmem:[#allocation1] ss:$4 sm:$0xff] %v3687_v25 }
0x222d   :  { %3703 = vst [vmem:[#allocation1 + $0x1] ss:$4 sm:$0xff] %v3688_v26 }
0x2234   :  { %v3704_v29 = vld.sshfl [vmem:[#allocation1] sm:$0xff pattern:$0x73625140] }
0x2235   :  { %4702 = vmatmul.msk.f32.vlgmr.msra.gmra.mxu1 %vm290_vm1, %v3704_v29  ;;  %v3978_v29 = vld [vmem:[%s6115_s5 + $0x28] sm:$0xff] }
0x2236   :  { %4097 = vmatpush.msra.mxu1 %v4079_v23 }
0x2238   :  { %4098 = vmatpush.msra.mxu1 %v4078_v55  ;;  %v5049_v55 = vmov 0  }
0x2239   :  { %4776 = vset.pattern.permute.xlu0 %v5049_v55  ;;  %4777 = vset.pattern.permute.xlu2 %v5049_v55 }
0x223a   :  { %4099 = vmatpush.msra.mxu1 %v4077_v56  ;;  %4778 = vset.pattern.permute.xlu1 %v5049_v55 }
0x223d   :  { %4717 = vmatmul.msk.f32.vlgmr.msrb.gmra.mxu1 %vm189_vm0, %v5950_v2 }
0x223e   :  { %4166 = vmatpush.msrb.mxu1 %v4143_v60 }
0x2240   :  { %4167 = vmatpush.msrb.mxu1 %v4142_v11 }
0x2295   :  { %v3961_v30 = vpop.f32.mrf.mxu3 }
0x2296   :  { %v3962_v22 = vadd.f32 %v4839_v31, %v3961_v30 }
0x22b2   :  { %v3724_v50 = vpop.f32.mrf.mxu1 }
0x22b3   :  { %v3725_v33 = vadd.f32 %v4834_v32, %v3724_v50  ;;  %v3975_v32 = vld [vmem:[%s6115_s5 + $0x10] sm:$0xff] }
0x22b5   :  { %v3727_v36 = vmul.f32 %v3725_v33, %v3725_v33 }
0x22b7   :  { %v3728_v40 = vmul.f32 %v3727_v36, %v3725_v33  ;;  %v3970_v36 = vmax.f32 %v3962_v22, 0.0 }
0x22b9   :  { %v3729_v41 = vmul.f32 0.044715, %v3728_v40  ;;  %v3973_v40 = vld [vmem:[%s6115_s5] sm:$0xff] }
0x22ba   :  { %v4042_v42 = vpop.f32.mrf.mxu1 }
0x22bb   :  { %v3730_v47 = vadd.f32 %v3729_v41, %v3725_v33  ;;  %4718 = vmatpush.msk.msrb.mxu2 %vm1547_vm6, %v4042_v42  ;;  %v3964_v41 = vpop.f32.mrf.mxu3 }
0x22bd   :  { %v3731_v49 = vmul.f32 0.7978846, %v3730_v47 }
0x22bf   :  { %4936 = vtanh.f32 %v3731_v49 }
0x22c5   :  { %v4937_v51 = vpop.eup %4936 }
0x22c6   :  { %v3733_v52 = vadd.f32 1.0, %v4937_v51  ;;  %v3965_v51 = vadd.f32 %v4839_v31, %v3964_v41 }
0x22c8   :  { %v3734_v54 = vmul.f32 0.5, %v3733_v52  ;;  %v4837_v52 = vld [vmem:[%s6104_s23 + $0x2] ss:$0 sm:$0xff]  ;;  %v3971_v59 = vmax.f32 %v3965_v51, 0.0 }
0x22c9   :  { %v3844_v60 = vrot.slane %v4837_v52, 2 }
0x22ca   :  { %v3735_v13 = vmul.f32 %v3734_v54, %v3725_v33  ;;  %v3974_v33 = vld [vmem:[%s6115_s5 + $0x8] sm:$0xff] }
0x22cc   :  { %4708 = vmatmul.msk.f32.vlgmr.msra.gmra.mxu2 %vm290_vm1, %v3735_v13  ;;  %vm4080_vm1 = vcmask 195584  }
0x22d4   :  { %4719 = vmatmul.msk.f32.vlgmr.msrb.gmra.mxu2 %vm4049_vm12, %v4022_v14 }
0x234f   :  { %v3766_v61 = vpop.f32.mrf.mxu2 }
0x2350   :  { %v3767_v62 = vadd.f32 %v4835_v24, %v3766_v61  ;;  %v3967_v61 = vpop.f32.mrf.mxu3 }
0x2352   :  { %v3770_v63 = vrot.slane %v3767_v62, 2  ;;  %v5975_v4 = vadd.f32 %v3767_v62, %v3687_v25  ;;  %v3979_v25 = vld [vmem:[%s6115_s5 + $0x30] sm:$0xff] }
0x2353   :  { %4004 = vmatpush.msra.mxu0 %v3979_v25 }
0x2354   :  { %v5977_v37 = vadd.f32 %v3770_v63, %v3688_v26  ;;  %3780 = vst [vmem:[#allocation1] ss:$4 sm:$0xff] %v5975_v4  ;;  %v3789_v0 = vmul.f32 %v5975_v4, %v5975_v4 }
0x2355   :  { %4005 = vmatpush.msra.mxu0 %v3978_v29 }
0x2356   :  { %3782 = vst [vmem:[#allocation1 + $0x1] ss:$4 sm:$0xff] %v5977_v37  ;;  %v3790_v39 = vmul.f32 %v5977_v37, %v5977_v37 }
0x2357   :  { %v4073_v6 = vpop.f32.mrf.mxu2 }
0x2358   :  { %v4074_v10 = vadd.f32 %v4836_v5, %v4073_v6 }
0x235a   :  { %v4076_v12 = vmax.f32 %v4074_v10, 0.0 }
0x235c   :  { %4720 = vmatmul.msk.f32.vlgmr.msra.gmra.mxu1 %vm4080_vm1, %v4076_v12  ;;  %v3851_v12 = vrot.slane %v4838_v7, 2 }
0x235d   :  { %v3783_v15 = vld.sshfl [vmem:[#allocation1] sm:$0xff pattern:$0x73625140] }
0x235e   :  { %v3785_v16 = vsel %vm3618_vm9, %v3783_v15, 0.0  ;;  %3793 = vst [vmem:[#allocation1] ss:$4 sm:$0xff] %v3789_v0  ;;  %v3968_v15 = vadd.f32 %v4839_v31, %v3967_v61 }
0x235f   :  { %3786 = vadd.xlane.f32.xlu0 %v3785_v16  ;;  %3795 = vst [vmem:[#allocation1 + $0x1] ss:$4 sm:$0xff] %v3790_v39 }
0x2364   :  { %4723 = vmatmul.msk.f32.vlgmr.msrb.gmra.mxu1 %vm189_vm0, %v4950_v44 }
0x2366   :  { %v3796_v17 = vld.sshfl [vmem:[#allocation1] sm:$0xff pattern:$0x73625140] }
0x2367   :  { %v3798_v45 = vsel %vm3618_vm9, %v3796_v17, 0.0 }
0x2368   :  { %3799 = vadd.xlane.f32.xlu0 %v3798_v45 }
0x236c   :  { %4724 = vmatmul.msk.f32.gmra.mxu1 %vm189_vm0, %v4951_v38 }
0x2374   :  { %4725 = vmatmul.msk.f32.gmra.mxu1 %vm189_vm0, %v5950_v2  ;;  %v3977_v2 = vld [vmem:[%s6115_s5 + $0x20] sm:$0xff]  ;;  %vm3985_vm0 = vcmask 523264  }
0x2375   :  { %4006 = vmatpush.msra.mxu0 %v3977_v2 }
0x2377   :  { %4007 = vmatpush.msra.mxu0 %v3976_v3 }
0x2379   :  { %4008 = vmatpush.msra.mxu0 %v3975_v32 }
0x237b   :  { %4009 = vmatpush.msra.mxu0 %v3974_v33 }
0x237c   :  { %4145 = vrot.lane.b32.xlu0 %v4133_v48, %s5048_s19 }
0x237d   :  { %4010 = vmatpush.msra.mxu0 %v3973_v40 }
0x237e   :  { %4714 = vmatmul.msk.f32.vlgmr.msra.gmra.mxu0 %vm3985_vm0, %v3970_v36 }
0x2386   :  { %4715 = vmatmul.msk.f32.gmra.mxu0 %vm3985_vm0, %v3971_v59 }
0x23d2   :  { %v3787_v18 = vpop.xlane.xlu0 %3786 }
0x23d3   :  { %v5999_v19 = vmul.f32 %v3787_v18, %v5481_v28  ;;  %v3972_v18 = vmax.f32 %v3968_v15, 0.0 }
0x23d5   :  { %v3802_v20 = vmul.f32 %v5999_v19, %v5999_v19  ;;  %v3812_v23 = vperm.slane %v5999_v19, %v5940_v9  ;;  %4716 = vmatmul.msk.f32.gmra.mxu0 %vm3985_vm0, %v3972_v18  ;;  %vm4265_vm0 = vcmask 259072  }
0x23d7   :  { %v3816_v63 = vsub.f32 %v5977_v37, %v3812_v23 }
0x23d9   :  { %v4101_v46 = vpop.f32.mrf.mxu1 }
0x23da   :  { %4721 = vmatpush.msk.msra.mxu2 %vm1547_vm6, %v4101_v46 }
0x23db   :  { %v3800_v53 = vpop.xlane.xlu0 %3799  ;;  %4722 = vmatmul.msk.f32.vlgmr.msra.gmra.mxu2 %vm4049_vm12, %v4022_v14  ;;  %v3808_v14 = vperm.slane %v5999_v19, %v5938_v8 }
0x23dc   :  { %v3801_v21 = vmul.f32 %v3800_v53, %v5481_v28 }
0x23dd   :  { %v3815_v62 = vsub.f32 %v5975_v4, %v3808_v14 }
0x23de   :  { %v3803_v27 = vsub.f32 %v3801_v21, %v3802_v20 }
0x23e0   :  { %v3817_v43 = vadd.f32 1e-05, %v3803_v27 }
0x23e1   :  { %v4169_v26 = vpop.f32.mrf.mxu1 }
0x23e2   :  { %4938 = vrsqrt.f32 %v3817_v43  ;;  %vm3824_vm13 = vweird.f32 %v3817_v43 }
0x23e8   :  { %v4939_v50 = vpop.eup %4938 }
0x23e9   :  { %v3819_v34 = vmul.f32 %v4939_v50, %v3817_v43  ;;  %v4172_v35 = vpop.f32.mrf.mxu1  ;;  %vm3825_vm6 = vweird.f32 %v4939_v50 }
0x23ea   :  { %vm3826_vm14 = vmor %vm3824_vm13, %vm3825_vm6 }
0x23eb   :  { %v3820_v42 = vmul.f32 %v4939_v50, %v3819_v34 }
0x23ed   :  { %v3821_v47 = vmul.f32 0.5, %v3820_v42 }
0x23ee   :  { %v4146_v49 = vpop.permute.xlu0 %4145 }
0x23ef   :  { %v3822_v54 = vsub.f32 1.5, %v3821_v47  ;;  %v4148_v13 = vsub.f32 %v4133_v48, %v4146_v49 }
0x23f1   :  { %v3823_v56 = vmul.f32 %v4939_v50, %v3822_v54  ;;  %v4150_v57 = vperm.slane %v4148_v13, 0  ;;  %v4174_v58 = vpop.f32.mrf.mxu1 }
0x23f3   :  { %v3827_v11 = vsel %vm3826_vm14, %v4939_v50, %v3823_v56  ;;  %v4170_v24 = vadd.f32 %v4169_v26, %v4150_v57  ;;  %v4175_v44 = vadd.f32 %v4174_v58, %v4150_v57 }
0x23f4   :  { %v3832_v5 = vperm.slane %v3827_v11, %v5938_v8  ;;  %v3836_v38 = vperm.slane %v3827_v11, %v5940_v9 }
0x23f5   :  { %v4177_v6 = vsub.f32 0.0, %v4170_v24  ;;  %v4178_v10 = vsub.f32 0.0, %v4175_v44 }
0x23f6   :  { %v3839_v0 = vmul.f32 %v3832_v5, %v3815_v62  ;;  %v3840_v39 = vmul.f32 %v3836_v38, %v3816_v63  ;;  %v4841_v62 = vld [vmem:[%s6117_s21] ss:$0 sm:$0xff] }
0x23f7   :  { %v4179_v16 = vmul.f32 1.442695, %v4177_v6  ;;  %v4181_v17 = vmul.f32 1.442695, %v4178_v10  ;;  %v4840_v38 = vld [vmem:[%s6118_s12] ss:$0 sm:$0xff] }
0x23f8   :  { %v3846_v45 = vmul.f32 %v4837_v52, %v3839_v0  ;;  %v3847_v48 = vmul.f32 %v3844_v60, %v3840_v39 }
0x23f9   :  { %4940 = vpow2.f32 %v4179_v16  ;;  %v4842_v16 = vld [vmem:[%s6119_s20] ss:$0 sm:$0xff] }
0x23fa   :  { %v6027_v4 = vadd.f32 %v4838_v7, %v3846_v45  ;;  %v6029_v37 = vadd.f32 %v3851_v12, %v3847_v48  ;;  %4942 = vpow2.f32 %v4181_v17 }
0x23fb   :  { %v4012_v23 = vpop.f32.mrf.mxu0 }
0x23fc   :  { %3859 = vst [vmem:[#allocation1] ss:$4 sm:$0xff] %v6027_v4  ;;  %v3868_v21 = vmul.f32 %v6027_v4, %v6027_v4  ;;  %v3869_v1 = vmul.f32 %v6029_v37, %v6029_v37  ;;  %v4013_v0 = vadd.f32 %v4841_v62, %v4012_v23 }
0x23fd   :  { %3861 = vst [vmem:[#allocation1 + $0x1] ss:$4 sm:$0xff] %v6029_v37 }
0x23ff   :  { %v4941_v19 = vpop.eup %4940 }
0x2400   :  { %v4943_v46 = vpop.eup %4942  ;;  %v4183_v53 = vadd.f32 1.0, %v4941_v19  ;;  %v4020_v19 = vmax.f32 %v4013_v0, 0.0 }
0x2401   :  { %v4184_v20 = vadd.f32 1.0, %v4943_v46  ;;  %v4843_v46 = vld [vmem:[%s6120_s27] ss:$0 sm:$0xff] }
0x2402   :  { %4944 = vrcp.f32 %v4183_v53  ;;  %v4196_v2 = vand.u32 2147483648, %v4183_v53  ;;  %vm4190_vm15 = vweird.f32 %v4183_v53  ;;  %v4194_v3 = vand.u32 2147483647, %v4183_v53 }
0x2403   :  { %4946 = vrcp.f32 %v4184_v20  ;;  %vm4205_vm7 = vweird.f32 %v4184_v20  ;;  %v4211_v42 = vand.u32 2147483648, %v4184_v20  ;;  %v4209_v49 = vand.u32 2147483647, %v4184_v20  ;;  %v4015_v55 = vpop.f32.mrf.mxu0 }
0x2404   :  { %v3862_v27 = vld.sshfl [vmem:[#allocation1] sm:$0xff pattern:$0x73625140]  ;;  %v4197_v33 = vor.u32 1.1754944e-38, %v4196_v2  ;;  %vm4195_vm4 = vcmp.eq.f32.partialorder %v4194_v3, 8.507059e+37 }
0x2405   :  { %v3864_v43 = vsel %vm3618_vm9, %v3862_v27, 0.0  ;;  %3872 = vst [vmem:[#allocation1] ss:$4 sm:$0xff] %v3868_v21  ;;  %v4212_v52 = vor.u32 1.1754944e-38, %v4211_v42  ;;  %vm4210_vm10 = vcmp.eq.f32.partialorder %v4209_v49, 8.507059e+37 }
0x2406   :  { %3865 = vadd.xlane.f32.xlu2 %v3864_v43  ;;  %3874 = vst [vmem:[#allocation1 + $0x1] ss:$4 sm:$0xff] %v3869_v1  ;;  %v3923_v1 = vrot.slane %v4842_v16, 2 }
0x2408   :  { %v4945_v25 = vpop.eup %4944 }
0x2409   :  { %v4947_v26 = vpop.eup %4946  ;;  %v4186_v29 = vmul.f32 %v4945_v25, %v4183_v53  ;;  %vm4191_vm3 = vweird.f32 %v4945_v25 }
0x240a   :  { %v4201_v30 = vmul.f32 %v4947_v26, %v4184_v20  ;;  %vm4192_vm5 = vmor %vm4190_vm15, %vm4191_vm3  ;;  %vm4206_vm8 = vweird.f32 %v4947_v26 }
0x240b   :  { %v4187_v31 = vsub.f32 1.0, %v4186_v29  ;;  %vm4207_vm2 = vmor %vm4205_vm7, %vm4206_vm8 }
0x240c   :  { %v4202_v34 = vsub.f32 1.0, %v4201_v30 }
0x240d   :  { %v3875_v22 = vld.sshfl [vmem:[#allocation1] sm:$0xff pattern:$0x73625140]  ;;  %v4188_v32 = vmul.f32 %v4945_v25, %v4187_v31 }
0x240e   :  { %v3877_v50 = vsel %vm3618_vm9, %v3875_v22, 0.0  ;;  %v4203_v41 = vmul.f32 %v4947_v26, %v4202_v34 }
0x240f   :  { %3878 = vadd.xlane.f32.xlu1 %v3877_v50  ;;  %v4189_v35 = vadd.f32 %v4945_v25, %v4188_v32 }
0x2410   :  { %v4204_v47 = vadd.f32 %v4947_v26, %v4203_v41 }
0x2411   :  { %v4193_v36 = vsel %vm4192_vm5, %v4945_v25, %v4189_v35 }
0x2412   :  { %v4198_v40 = vsel %vm4195_vm4, %v4197_v33, %v4193_v36  ;;  %v4208_v54 = vsel %vm4207_vm2, %v4947_v26, %v4204_v47 }
0x2413   :  { %4219 = vperm.xlu0 %4776, %v4198_v40   ;;  %v4215_v51 = vsub.f32 1.0, %v4198_v40  ;;  %v4213_v13 = vsel %vm4210_vm10, %v4212_v52, %v4208_v54 }
0x2414   :  { %v4216_v14 = vsub.f32 1.0, %v4213_v13 }
0x241b   :  { %4235 = vperm.xlu0 %4776, %v4215_v51  }
0x241e   :  { %4254 = vperm.xlu2 %4777, %v4213_v13  }
0x2428   :  { %4260 = vperm.xlu1 %4778, %v4216_v14  }
0x2452   :  { %v4017_v61 = vpop.f32.mrf.mxu0 }
0x2453   :  { %v4018_v6 = vadd.f32 %v4841_v62, %v4017_v61 }
0x2455   :  { %v4021_v45 = vmax.f32 %v4018_v6, 0.0 }
0x245e   :  { %v4128_v10 = vpop.f32.mrf.mxu2 }
0x245f   :  { %v4129_v17 = vadd.f32 %v4840_v38, %v4128_v10 }
0x2479   :  { %v3866_v56 = vpop.xlane.xlu2 %3865 }
0x247a   :  { %v3867_v57 = vmul.f32 %v3866_v56, %v5481_v28 }
0x247c   :  { %v3881_v59 = vmul.f32 %v3867_v57, %v3867_v57  ;;  %v3887_v39 = vperm.slane %v3867_v57, %v5938_v8 }
0x247e   :  { %v3894_v53 = vsub.f32 %v6027_v4, %v3887_v39  ;;  %v3930_v4 = vrot.slane %v4843_v46, 2 }
0x2481   :  { %v4255_v18 = vpop.permute.xlu2 %4254 }
0x2482   :  { %v3879_v58 = vpop.xlane.xlu1 %3878  ;;  %v4257_v43 = vmul.f32 %v4255_v18, %v4129_v17 }
0x2483   :  { %v3880_v7 = vmul.f32 %v3879_v58, %v5481_v28  ;;  %v3891_v28 = vperm.slane %v3867_v57, %v5940_v9 }
0x2485   :  { %v3882_v60 = vsub.f32 %v3880_v7, %v3881_v59  ;;  %v4220_v5 = vpop.permute.xlu0 %4219  ;;  %v3895_v20 = vsub.f32 %v6029_v37, %v3891_v28 }
0x2487   :  { %v3896_v11 = vadd.f32 1e-05, %v3882_v60 }
0x2489   :  { %4948 = vrsqrt.f32 %v3896_v11  ;;  %vm3903_vm12 = vweird.f32 %v3896_v11 }
0x248d   :  { %v4236_v2 = vpop.permute.xlu0 %4235 }
0x248e   :  { %v4238_v32 = vmul.f32 %v4236_v2, %v4020_v19 }
0x248f   :  { %v4949_v24 = vpop.eup %4948 }
0x2490   :  { %v3898_v44 = vmul.f32 %v4949_v24, %v3896_v11  ;;  %vm3904_vm11 = vweird.f32 %v4949_v24 }
0x2491   :  { %vm3905_vm1 = vmor %vm3903_vm12, %vm3904_vm11 }
0x2492   :  { %v3899_v63 = vmul.f32 %v4949_v24, %v3898_v44 }
0x2494   :  { %v3900_v12 = vmul.f32 0.5, %v3899_v63 }
0x2496   :  { %v3901_v15 = vsub.f32 1.5, %v3900_v12 }
0x2498   :  { %v3902_v48 = vmul.f32 %v4949_v24, %v3901_v15 }
0x249a   :  { %v3906_v21 = vsel %vm3905_vm1, %v4949_v24, %v3902_v48  ;;  %v4261_v27 = vpop.permute.xlu1 %4260 }
0x249b   :  { %v3911_v25 = vperm.slane %v3906_v21, %v5938_v8  ;;  %v3915_v26 = vperm.slane %v3906_v21, %v5940_v9  ;;  %v4263_v29 = vmul.f32 %v4261_v27, %v4021_v45 }
0x249d   :  { %v3918_v37 = vmul.f32 %v3911_v25, %v3894_v53  ;;  %v3919_v30 = vmul.f32 %v3915_v26, %v3895_v20  ;;  %v4264_v31 = vadd.f32 %v4263_v29, %v4257_v43 }
0x249f   :  { %v3925_v3 = vmul.f32 %v4842_v16, %v3918_v37  ;;  %v3926_v22 = vmul.f32 %v3923_v1, %v3919_v30  ;;  %4266 = vst.msk [vmem:[#allocation4] sm:$0x3f] %vm4265_vm0, %v4264_v31 }
0x24a0   :  { %4975 = shalt.err (!%p4972_p4)
}
0x24a1   :  { %4288 = dma.vmem_to_hbm [thread:$0]  %s4284_s10, 128, %s4286_s11, [#allocation5]   ;;  %v3932_v50 = vadd.f32 %v4843_v46, %v3925_v3  ;;  %v3933_v33 = vadd.f32 %v3930_v4, %v3926_v22  ;;  %v4224_v34 = vperm.slane %v4220_v5, %v5938_v8  ;;  %v4228_v35 = vperm.slane %v4220_v5, %v5940_v9 }
0x24a2   :  { %v4240_v41 = vrot.slane %v4238_v32, 2  ;;  %s5051_s9 = smov [#allocation2]   ;;  %s4274_s17 = sshll.u32 %s5250_s4, 4  ;;  %s4275_s17 = int_to_ptr.hbm [resolvable:$true] %s4274_s17 }
0x24a3   :  { %v4231_v36 = vmul.f32 %v4224_v34, %v3932_v50  ;;  %v4232_v40 = vmul.f32 %v4228_v35, %v3933_v33  ;;  %s4272_s0 = sshll.u32 %s5051_s9, 4  ;;  %s4988_s29 = sshra.s32 %s4275_s17, 4  ;;  %s4273_s0 = int_to_ptr.vmem [resolvable:$true] %s4272_s0  ;;  %s4989_s29 = int_to_ptr.hbm [resolvable:$true] %s4988_s29 }
0x24a4   :  { %s4990_s3 = scalar_lea.hbm %s4989_s29, 4  ;;  %s4992_s22 = scalar_lea.hbm %s5250_s4, 4 }
0x24a5   :  { %v4242_v42 = vadd.f32 %v4238_v32, %v4231_v36  ;;  %v4243_v47 = vadd.f32 %v4240_v41, %v4232_v40  ;;  %p4991_p5 = scmp.ne.s32.totalorder %s4989_s29, %s4990_s3  ;;  %p4993_p6 = scmp.lt.s32.totalorder %s4989_s29, %s5250_s4 }
0x24a6   :  { %p4994_p7 = scmp.lt.s32.totalorder %s4992_s22, %s4990_s3 }
0x24a7   :  { %4246 = vst [vmem:[#allocation1] ss:$4 sm:$0xff] %v4242_v42 }
0x24a8   :  { %4248 = vst [vmem:[#allocation1 + $0x1] ss:$4 sm:$0xff] %v4243_v47  ;;  %p4995_p8 = por %p4994_p7, %p4993_p6 }
0x24aa   :  { %p4996_p9 = pnand %p4995_p8, %p4991_p5 }
0x24af   :  { %v4249_v49 = vld.sshfl [vmem:[#allocation1] sm:$0xff pattern:$0x73625140] }
0x24b0   :  { %4251 = vst.msk [vmem:[#allocation2] sm:$0xf] %vm3618_vm9, %v4249_v49 }
0x24b1   :  { %4999 = shalt.err (!%p4996_p9)
}
0x24b2   :  { %4277 = dma.vmem_to_hbm [thread:$0]  %s4273_s0, 64, %s4275_s17, [#allocation3]  }
0x24b3   :  { %5000 = dma.done.wait [#allocation3], 64  }
0x24b4   :  { %5001 = vsyncadd [#allocation3], 4294967232 }
0x24b5   :  { %5002 = dma.done.wait [#allocation5], 128  }
0x24b6   :  { %5003 = vsyncadd [#allocation5], 4294967168 }
0x24b7   :  { %4297 = vsyncpa [#allocation3], 1 }
0x24b8   :  { %4298 = vsyncpa [#allocation5], 1 }

</bundles_post_ra>
